<compile_context>
chip_gen: v6e
topology: v6e:2x2x1
jax: 0.10.0
libtpu: 0.0.40
codegen_flags: <defaults>
</compile_context>

<pallas_src>
import functools

import jax
import jax.numpy as jnp
from jax.experimental import pallas as pl
from jax.experimental.pallas import tpu as pltpu


# ----------------------------------------------------------------------------
# Config (small synthetic BERT)
# ----------------------------------------------------------------------------
VOCAB_SIZE = 1000
TYPE_VOCAB_SIZE = 2
MAX_POS = 128
HIDDEN = 128
NUM_HEADS = 4
HEAD_DIM = HIDDEN // NUM_HEADS
INTERMEDIATE = 256
NUM_LAYERS = 2
LN_EPS = 1e-12
BATCH = 2
SEQ = 128


# ----------------------------------------------------------------------------
# Hardware-aware static choices
# ----------------------------------------------------------------------------
def _device_kind():
    try:
        return jax.devices()[0].device_kind.lower()
    except Exception:  # pragma: no cover
        return ""


_KIND = _device_kind()
_IS_V5E = ("v5e" in _KIND) or ("v5 lite" in _KIND) or ("v5lite" in _KIND)
_IS_V6 = "v6" in _KIND
_IS_V7 = "v7" in _KIND

# Single-TC chips (v5e/v6e): merge batch into the row tile -> grid (1, L).
# v7x (2 TCs/chip) and unknown chips: keep batch as the "parallel" axis.
SEQS_PER_TILE = BATCH if (_IS_V5E or _IS_V6) else 1
# bf16-native VPU/EUP on v6e/v7x -> compute GELU in bf16 there.
GELU_BF16 = _IS_V6 or _IS_V7


# ----------------------------------------------------------------------------
# Fused encoder kernel: grid = (batch_tiles, layer)
# ----------------------------------------------------------------------------
def _encoder_kernel(
    emb_ref,        # (R, H)   f32   summed word+pos+type embeddings (R = seqs_per_tile*S)
    mask_ref,       # (B, S)   f32   additive attention mask (full array, tiny)
    emb_g_ref,      # (1, H)   f32   embedding LayerNorm gamma
    emb_b_ref,      # (1, H)   f32   embedding LayerNorm beta
    wqkv_ref,       # (H, 3H)  bf16  fused Q/K/V weight for layer l (Q cols pre-scaled)
    bqkv_ref,       # (1, 3H)  f32
    wo_ref,         # (H, H)   bf16  attention output projection
    bo_ref,         # (1, H)   f32
    ln1_g_ref,      # (1, H)   f32
    ln1_b_ref,      # (1, H)   f32
    wi_ref,         # (H, I)   bf16  FFN in
    bi_ref,         # (1, I)   f32
    wout_ref,       # (I, H)   bf16  FFN out
    bout_ref,       # (1, H)   f32
    ln2_g_ref,      # (1, H)   f32
    ln2_b_ref,      # (1, H)   f32
    h_ref,          # (R, H)   f32   OUTPUT block; resident across the layer axis
    *,
    num_heads,
    head_dim,
    seqs_per_tile,
    seq,
    eps,
    gelu_bf16,
):
    hidden = emb_ref.shape[1]

    def layernorm(x, g, b):
        mean = jnp.mean(x, axis=-1, keepdims=True)
        cent = x - mean
        var = jnp.mean(cent * cent, axis=-1, keepdims=True)
        return cent * jax.lax.rsqrt(var + eps) * g + b

    # Layer 0: initialize the resident hidden state (= the output block, whose
    # index map ignores the layer axis) with the embedding LayerNorm.
    @pl.when(pl.program_id(1) == 0)
    def _init():
        h_ref[...] = layernorm(emb_ref[...], emb_g_ref[...], emb_b_ref[...])

    h = h_ref[...]                                            # (R, H) f32

    # ---- fused QKV projection: one MXU matmul over all rows in the tile ----
    qkv = jnp.dot(h.astype(jnp.bfloat16), wqkv_ref[...],
                  preferred_element_type=jnp.float32) + bqkv_ref[...]
    qkv_bf = qkv.astype(jnp.bfloat16)                         # single full-width cast

    # global sequence index of the first sequence in this tile
    seq_base = pl.program_id(0) * seqs_per_tile

    # ---- multi-head attention, per sequence (sublane row slices are free) ----
    attn_rows = []
    for si in range(seqs_per_tile):
        r0 = si * seq
        m_row = mask_ref[pl.ds(seq_base + si, 1), :]          # (1, S) additive mask
        attn_s = None
        for hd in range(num_heads):
            lo = hd * head_dim
            hi = lo + head_dim
            qh = qkv_bf[r0:r0 + seq, lo:hi]                               # (S, dh)
            kh = qkv_bf[r0:r0 + seq, hidden + lo:hidden + hi]             # (S, dh)
            vh = qkv_bf[r0:r0 + seq, 2 * hidden + lo:2 * hidden + hi]     # (S, dh)
            # softmax scale already folded into the Q weight columns
            s = jax.lax.dot_general(qh, kh, (((1,), (1,)), ((), ())),
                                    preferred_element_type=jnp.float32)   # (S, S)
            s = s + m_row
            s = s - jnp.max(s, axis=-1, keepdims=True)
            p = jnp.exp(s)
            p = p * pl.reciprocal(jnp.sum(p, axis=-1, keepdims=True), approx=True)
            ctx = jnp.dot(p.astype(jnp.bfloat16), vh,
                          preferred_element_type=jnp.float32)             # (S, dh)
            # accumulate directly into the output projection: ctx @ Wo[rows of this head]
            contrib = jnp.dot(ctx.astype(jnp.bfloat16), wo_ref[lo:hi, :],
                              preferred_element_type=jnp.float32)         # (S, H)
            attn_s = contrib if attn_s is None else attn_s + contrib
        attn_rows.append(attn_s)
    attn = attn_rows[0] if seqs_per_tile == 1 else jnp.concatenate(attn_rows, axis=0)
    attn = attn + bo_ref[...]

    # ---- residual + LayerNorm ----
    h1 = layernorm(attn + h, ln1_g_ref[...], ln1_b_ref[...])

    # ---- feed-forward (GELU) + residual + LayerNorm ----
    f = jnp.dot(h1.astype(jnp.bfloat16), wi_ref[...],
                preferred_element_type=jnp.float32) + bi_ref[...]
    # TODO(synk): tanh-approx GELU; HF BertForQuestionAnswering uses exact erf GELU.
    if gelu_bf16:
        fb = f.astype(jnp.bfloat16)
        g = 0.5 * fb * (1.0 + jnp.tanh(0.7978845608028654 *
                                       (fb + 0.044715 * (fb * fb * fb))))
        g = g.astype(jnp.bfloat16)
    else:
        g = 0.5 * f * (1.0 + jnp.tanh(0.7978845608028654 *
                                      (f + 0.044715 * f * f * f)))
        g = g.astype(jnp.bfloat16)
    f2 = jnp.dot(g, wout_ref[...],
                 preferred_element_type=jnp.float32) + bout_ref[...]
    h_new = layernorm(f2 + h1, ln2_g_ref[...], ln2_b_ref[...])

    # write the resident output block; the last layer's value is what lands in HBM
    h_ref[...] = h_new


def encoder_forward(params, emb, add_mask, batch, seq,
                    seqs_per_tile=SEQS_PER_TILE, gelu_bf16=GELU_BF16):
    """emb: (B*S, H) f32; add_mask: (B, S) f32 additive mask -> (B*S, H) f32."""
    enc = params["enc"]
    assert batch % seqs_per_tile == 0
    n_tiles = batch // seqs_per_tile
    rows = seqs_per_tile * seq
    M = batch * seq

    kernel = functools.partial(
        _encoder_kernel, num_heads=NUM_HEADS, head_dim=HEAD_DIM,
        seqs_per_tile=seqs_per_tile, seq=seq, eps=LN_EPS, gelu_bf16=gelu_bf16)

    layer_w = lambda t, l: (l, 0, 0)
    const2 = lambda t, l: (0, 0)

    return pl.pallas_call(
        kernel,
        out_shape=jax.ShapeDtypeStruct((M, HIDDEN), jnp.float32),
        grid=(n_tiles, NUM_LAYERS),
        in_specs=[
            pl.BlockSpec((rows, HIDDEN), lambda t, l: (t, 0)),       # emb
            pl.BlockSpec((batch, seq), const2),                      # additive mask (full)
            pl.BlockSpec((1, HIDDEN), const2),                       # emb_ln gamma
            pl.BlockSpec((1, HIDDEN), const2),                       # emb_ln beta
            pl.BlockSpec((None, HIDDEN, 3 * HIDDEN), layer_w),       # wqkv
            pl.BlockSpec((None, 1, 3 * HIDDEN), layer_w),            # bqkv
            pl.BlockSpec((None, HIDDEN, HIDDEN), layer_w),           # wo
            pl.BlockSpec((None, 1, HIDDEN), layer_w),                # bo
            pl.BlockSpec((None, 1, HIDDEN), layer_w),                # ln1 gamma
            pl.BlockSpec((None, 1, HIDDEN), layer_w),                # ln1 beta
            pl.BlockSpec((None, HIDDEN, INTERMEDIATE), layer_w),     # wi
            pl.BlockSpec((None, 1, INTERMEDIATE), layer_w),          # bi
            pl.BlockSpec((None, INTERMEDIATE, HIDDEN), layer_w),     # wout
            pl.BlockSpec((None, 1, HIDDEN), layer_w),                # bout
            pl.BlockSpec((None, 1, HIDDEN), layer_w),                # ln2 gamma
            pl.BlockSpec((None, 1, HIDDEN), layer_w),                # ln2 beta
        ],
        # output block index ignores the layer axis -> stays resident in VMEM
        # across layers and doubles as the hidden-state accumulator.
        out_specs=pl.BlockSpec((rows, HIDDEN), lambda t, l: (t, 0)),
        compiler_params=pltpu.CompilerParams(
            dimension_semantics=("parallel", "arbitrary")),
    )(
        emb, add_mask, params["emb_ln_g"], params["emb_ln_b"],
        enc["wqkv"], enc["bqkv"], enc["wo"], enc["bo"],
        enc["ln1_g"], enc["ln1_b"], enc["wi"], enc["bi"],
        enc["wout"], enc["bout"], enc["ln2_g"], enc["ln2_b"],
    )


# ----------------------------------------------------------------------------
# Parameters (encoder weights pre-stacked as [NUM_LAYERS, ...], matmul weights bf16)
# ----------------------------------------------------------------------------
def init_params(key):
    keys = jax.random.split(key, 4 + NUM_LAYERS)
    scale = 1.0 / (HEAD_DIM ** 0.5)

    def dense_w(k, fan_in, fan_out):
        return 0.02 * jax.random.normal(k, (fan_in, fan_out), jnp.float32)

    params = {
        "word_emb": 0.02 * jax.random.normal(keys[0], (VOCAB_SIZE, HIDDEN), jnp.float32),
        "pos_emb": 0.02 * jax.random.normal(keys[1], (MAX_POS, HIDDEN), jnp.float32),
        "type_emb": 0.02 * jax.random.normal(keys[2], (TYPE_VOCAB_SIZE, HIDDEN), jnp.float32),
        "emb_ln_g": jnp.ones((1, HIDDEN), jnp.float32),
        "emb_ln_b": jnp.zeros((1, HIDDEN), jnp.float32),
        "qa_w": dense_w(keys[3], HIDDEN, 2),
        "qa_b": jnp.zeros((2,), jnp.float32),
    }

    wqkv, wo, wi, wout = [], [], [], []
    for l in range(NUM_LAYERS):
        lk = jax.random.split(keys[4 + l], 6)
        # Fold the 1/sqrt(head_dim) softmax scale into the Q projection
        # (Q biases are zero; a non-zero Q bias would also need * scale).
        q = dense_w(lk[0], HIDDEN, HIDDEN) * scale
        k = dense_w(lk[1], HIDDEN, HIDDEN)
        v = dense_w(lk[2], HIDDEN, HIDDEN)
        wqkv.append(jnp.concatenate([q, k, v], axis=1))      # (H, 3H)
        wo.append(dense_w(lk[3], HIDDEN, HIDDEN))
        wi.append(dense_w(lk[4], HIDDEN, INTERMEDIATE))
        wout.append(dense_w(lk[5], INTERMEDIATE, HIDDEN))

    L = NUM_LAYERS
    params["enc"] = {
        "wqkv": jnp.stack(wqkv).astype(jnp.bfloat16),        # (L, H, 3H)
        "bqkv": jnp.zeros((L, 1, 3 * HIDDEN), jnp.float32),
        "wo": jnp.stack(wo).astype(jnp.bfloat16),            # (L, H, H)
        "bo": jnp.zeros((L, 1, HIDDEN), jnp.float32),
        "ln1_g": jnp.ones((L, 1, HIDDEN), jnp.float32),
        "ln1_b": jnp.zeros((L, 1, HIDDEN), jnp.float32),
        "wi": jnp.stack(wi).astype(jnp.bfloat16),            # (L, H, I)
        "bi": jnp.zeros((L, 1, INTERMEDIATE), jnp.float32),
        "wout": jnp.stack(wout).astype(jnp.bfloat16),        # (L, I, H)
        "bout": jnp.zeros((L, 1, HIDDEN), jnp.float32),
        "ln2_g": jnp.ones((L, 1, HIDDEN), jnp.float32),
        "ln2_b": jnp.zeros((L, 1, HIDDEN), jnp.float32),
    }
    return params


# ----------------------------------------------------------------------------
# Forward pass
# ----------------------------------------------------------------------------
@jax.jit
def _forward_logits(params, input_ids, token_type_ids, attention_mask):
    B, S = input_ids.shape

    # ---- embeddings (gathers are glue; LayerNorm is fused into the encoder kernel) ----
    # TODO(synk): embedding gather done with jnp.take (no dedicated Pallas gather here).
    word = jnp.take(params["word_emb"], input_ids, axis=0)
    pos = params["pos_emb"][:S][None, :, :]
    typ = jnp.take(params["type_emb"], token_type_ids, axis=0)
    emb = (word + pos + typ).reshape(B * S, HIDDEN)

    # additive attention mask, (B, S)
    add_mask = (1.0 - attention_mask.astype(jnp.float32)) * -10000.0

    # ---- fused encoder: one pallas_call for all layers ----
    h = encoder_forward(params, emb, add_mask, B, S)          # (B*S, H) f32

    # ---- QA head: hidden -> 2 logits per token (plain JAX; N=2 is MXU-hostile) ----
    logits = (h @ params["qa_w"] + params["qa_b"]).reshape(B, S, 2)
    return logits[..., 0], logits[..., 1]


def bert_qa_forward(params, input_ids, token_type_ids=None, attention_mask=None,
                    start_positions=None, end_positions=None):
    B, S = input_ids.shape
    if token_type_ids is None:
        token_type_ids = jnp.zeros_like(input_ids)
    if attention_mask is None:
        attention_mask = jnp.ones_like(input_ids)

    start_logits, end_logits = _forward_logits(params, input_ids, token_type_ids,
                                               attention_mask)

    if start_positions is not None and end_positions is not None:
        ignored_index = S

        def ce(lg, pos):
            pos = jnp.clip(pos, 0, ignored_index)
            valid = pos != ignored_index
            logp = jax.nn.log_softmax(lg, axis=-1)
            safe = jnp.where(valid, pos, 0)
            nll = -jnp.take_along_axis(logp, safe[:, None], axis=-1)[:, 0]
            nll = jnp.where(valid, nll, 0.0)
            return jnp.sum(nll) / jnp.maximum(jnp.sum(valid.astype(jnp.float32)), 1.0)

        start_loss = ce(start_logits, start_positions)
        end_loss = ce(end_logits, end_positions)
        return (start_loss + end_loss) / 2.0
    return start_logits, end_logits


# ----------------------------------------------------------------------------
# Main
# ----------------------------------------------------------------------------
if __name__ == "__main__":
    key = jax.random.PRNGKey(0)
    pkey, ikey, tkey = jax.random.split(key, 3)

    params = init_params(pkey)
    input_ids = jax.random.randint(ikey, (BATCH, SEQ), 0, VOCAB_SIZE, dtype=jnp.int32)
    token_type_ids = jax.random.randint(tkey, (BATCH, SEQ), 0, TYPE_VOCAB_SIZE, dtype=jnp.int32)
    attention_mask = jnp.ones((BATCH, SEQ), dtype=jnp.int32)

    # inference path: (start_logits, end_logits)
    start_logits, end_logits = bert_qa_forward(params, input_ids, token_type_ids, attention_mask)
    jax.block_until_ready(start_logits)
    jax.block_until_ready(end_logits)
    assert start_logits.shape == (BATCH, SEQ) and end_logits.shape == (BATCH, SEQ)
    assert bool(jnp.all(jnp.isfinite(start_logits))) and bool(jnp.all(jnp.isfinite(end_logits)))

    # training path: scalar loss
    start_pos = jnp.array([3, 10], dtype=jnp.int32)
    end_pos = jnp.array([7, 20], dtype=jnp.int32)
    loss = bert_qa_forward(params, input_ids, token_type_ids, attention_mask,
                           start_positions=start_pos, end_positions=end_pos)
    jax.block_until_ready(loss)
    assert loss.shape == ()

    print("KERNEL_OK")
</pallas_src>

<mosaic_0001>
module attributes {stable_mosaic.version = 11 : i64} {
  func.func @_encoder_kernel(%arg0: i32, %arg1: i32, %arg2: memref<128x128xf32, #tpu.memory_space<vmem>>, %arg3: memref<2x128xf32, #tpu.memory_space<vmem>>, %arg4: memref<1x128xf32, #tpu.memory_space<vmem>>, %arg5: memref<1x128xf32, #tpu.memory_space<vmem>>, %arg6: memref<1x128x384xbf16, #tpu.memory_space<vmem>>, %arg7: memref<1x1x384xf32, #tpu.memory_space<vmem>>, %arg8: memref<1x128x128xbf16, #tpu.memory_space<vmem>>, %arg9: memref<1x1x128xf32, #tpu.memory_space<vmem>>, %arg10: memref<1x1x128xf32, #tpu.memory_space<vmem>>, %arg11: memref<1x1x128xf32, #tpu.memory_space<vmem>>, %arg12: memref<1x128x256xbf16, #tpu.memory_space<vmem>>, %arg13: memref<1x1x256xf32, #tpu.memory_space<vmem>>, %arg14: memref<1x256x128xbf16, #tpu.memory_space<vmem>>, %arg15: memref<1x1x128xf32, #tpu.memory_space<vmem>>, %arg16: memref<1x1x128xf32, #tpu.memory_space<vmem>>, %arg17: memref<1x1x128xf32, #tpu.memory_space<vmem>>, %arg18: memref<128x128xf32, #tpu.memory_space<vmem>>) attributes {dimension_semantics = [#tpu.dimension_semantics<parallel>, #tpu.dimension_semantics<arbitrary>], iteration_bounds = array<i64: 2, 2>, scalar_prefetch = 0 : i64, scratch_operands = 0 : i64, tpu.core_type = #tpu.core_type<tc>, window_params = [{transform_indices = @transform_0, window_bounds = array<i64: 128, 128>}, {pipeline_mode = #tpu.pipeline_mode<synchronous>, transform_indices = @transform_1, window_bounds = array<i64: 2, 128>}, {pipeline_mode = #tpu.pipeline_mode<synchronous>, transform_indices = @transform_2, window_bounds = array<i64: 1, 128>}, {pipeline_mode = #tpu.pipeline_mode<synchronous>, transform_indices = @transform_3, window_bounds = array<i64: 1, 128>}, {transform_indices = @transform_4, window_bounds = array<i64: 1, 128, 384>}, {transform_indices = @transform_5, window_bounds = array<i64: 1, 1, 384>}, {transform_indices = @transform_6, window_bounds = array<i64: 1, 128, 128>}, {transform_indices = @transform_7, window_bounds = array<i64: 1, 1, 128>}, {transform_indices = @transform_8, window_bounds = array<i64: 1, 1, 128>}, {transform_indices = @transform_9, window_bounds = array<i64: 1, 1, 128>}, {transform_indices = @transform_10, window_bounds = array<i64: 1, 128, 256>}, {transform_indices = @transform_11, window_bounds = array<i64: 1, 1, 256>}, {transform_indices = @transform_12, window_bounds = array<i64: 1, 256, 128>}, {transform_indices = @transform_13, window_bounds = array<i64: 1, 1, 128>}, {transform_indices = @transform_14, window_bounds = array<i64: 1, 1, 128>}, {transform_indices = @transform_15, window_bounds = array<i64: 1, 1, 128>}, {transform_indices = @transform_16, window_bounds = array<i64: 128, 128>}]} {
    %c0_i32 = arith.constant 0 : i32
    %0 = arith.cmpi eq, %arg1, %c0_i32 : i32
    %1 = arith.extui %0 : i1 to i32
    %c0_i32_0 = arith.constant 0 : i32
    %2 = arith.cmpi ne, %1, %c0_i32_0 : i32
    scf.if %2 {
      %c0_84 = arith.constant 0 : index
      %c0_85 = arith.constant 0 : index
      %192 = vector.load %arg2[%c0_84, %c0_85] : memref<128x128xf32, #tpu.memory_space<vmem>>, vector<128x128xf32>
      %c0_86 = arith.constant 0 : index
      %c0_87 = arith.constant 0 : index
      %193 = vector.load %arg4[%c0_86, %c0_87] : memref<1x128xf32, #tpu.memory_space<vmem>>, vector<1x128xf32>
      %c0_88 = arith.constant 0 : index
      %c0_89 = arith.constant 0 : index
      %194 = vector.load %arg5[%c0_88, %c0_89] : memref<1x128xf32, #tpu.memory_space<vmem>>, vector<1x128xf32>
      %cst_90 = arith.constant dense<0.000000e+00> : vector<128xf32>
      %195 = vector.multi_reduction <add>, %192, %cst_90 [1] : vector<128x128xf32> to vector<128xf32>
      %196 = vector.shape_cast %195 : vector<128xf32> to vector<128x1xf32>
      %cst_91 = arith.constant 1.280000e+02 : f32
      %197 = vector.broadcast %cst_91 : f32 to vector<128x1xf32>
      %198 = arith.divf %196, %197 : vector<128x1xf32>
      %199 = vector.broadcast %198 : vector<128x1xf32> to vector<128x128xf32>
      %200 = arith.subf %192, %199 : vector<128x128xf32>
      %201 = arith.mulf %200, %200 : vector<128x128xf32>
      %cst_92 = arith.constant dense<0.000000e+00> : vector<128xf32>
      %202 = vector.multi_reduction <add>, %201, %cst_92 [1] : vector<128x128xf32> to vector<128xf32>
      %203 = vector.shape_cast %202 : vector<128xf32> to vector<128x1xf32>
      %cst_93 = arith.constant 1.280000e+02 : f32
      %204 = vector.broadcast %cst_93 : f32 to vector<128x1xf32>
      %205 = arith.divf %203, %204 : vector<128x1xf32>
      %cst_94 = arith.constant 9.99999996E-13 : f32
      %206 = vector.broadcast %cst_94 : f32 to vector<128x1xf32>
      %207 = arith.addf %205, %206 : vector<128x1xf32>
      %208 = math.rsqrt %207 : vector<128x1xf32>
      %209 = vector.broadcast %208 : vector<128x1xf32> to vector<128x128xf32>
      %210 = arith.mulf %200, %209 : vector<128x128xf32>
      %211 = vector.broadcast %193 : vector<1x128xf32> to vector<128x128xf32>
      %212 = arith.mulf %210, %211 : vector<128x128xf32>
      %213 = vector.broadcast %194 : vector<1x128xf32> to vector<128x128xf32>
      %214 = arith.addf %212, %213 : vector<128x128xf32>
      %c0_95 = arith.constant 0 : index
      %c0_96 = arith.constant 0 : index
      %215 = vector.load %arg18[%c0_95, %c0_96] : memref<128x128xf32, #tpu.memory_space<vmem>>, vector<128x128xf32>
      tpu.vector_store %arg18[%c0_95, %c0_96], %214 {strides = array<i32>} : memref<128x128xf32, #tpu.memory_space<vmem>>, vector<128x128xf32>,
    } else {
    }
    %c0 = arith.constant 0 : index
    %c0_1 = arith.constant 0 : index
    %3 = vector.load %arg18[%c0, %c0_1] : memref<128x128xf32, #tpu.memory_space<vmem>>, vector<128x128xf32>
    %4 = arith.truncf %3 : vector<128x128xf32> to vector<128x128xbf16>
    %c0_2 = arith.constant 0 : index
    %c0_3 = arith.constant 0 : index
    %c0_4 = arith.constant 0 : index
    %5 = vector.load %arg6[%c0_2, %c0_3, %c0_4] : memref<1x128x384xbf16, #tpu.memory_space<vmem>>, vector<1x128x384xbf16>
    %6 = vector.shape_cast %5 : vector<1x128x384xbf16> to vector<128x384xbf16>
    %cst = arith.constant dense<0.000000e+00> : vector<128x384xf32>
    %7 = tpu.matmul %4, %6, %cst {dimension_numbers = #tpu.dot_dimension_numbers<[1], [0], [0], [1], [0, 0, 1, 1], [], []>} : vector<128x128xbf16>, vector<128x384xbf16>, vector<128x384xf32> -> vector<128x384xf32>
    %c0_5 = arith.constant 0 : index
    %c0_6 = arith.constant 0 : index
    %c0_7 = arith.constant 0 : index
    %8 = vector.load %arg7[%c0_5, %c0_6, %c0_7] : memref<1x1x384xf32, #tpu.memory_space<vmem>>, vector<1x1x384xf32>
    %9 = vector.shape_cast %8 : vector<1x1x384xf32> to vector<1x384xf32>
    %10 = vector.broadcast %9 : vector<1x384xf32> to vector<128x384xf32>
    %11 = arith.addf %7, %10 : vector<128x384xf32>
    %12 = arith.truncf %11 : vector<128x384xf32> to vector<128x384xbf16>
    %c1_i32 = arith.constant 1 : i32
    %13 = arith.muli %arg0, %c1_i32 : i32
    %c0_i32_8 = arith.constant 0 : i32
    %14 = arith.addi %13, %c0_i32_8 : i32
    %15 = arith.index_cast %14 : i32 to index
    %c0_9 = arith.constant 0 : index
    %16 = vector.load %arg3[%15, %c0_9] : memref<2x128xf32, #tpu.memory_space<vmem>>, vector<1x128xf32>
    %17 = vector.extract_strided_slice %12 {offsets = [0, 0], sizes = [128, 32], strides = [1, 1]} : vector<128x384xbf16> to vector<128x32xbf16>
    %18 = vector.extract_strided_slice %12 {offsets = [0, 128], sizes = [128, 32], strides = [1, 1]} : vector<128x384xbf16> to vector<128x32xbf16>
    %19 = vector.extract_strided_slice %12 {offsets = [0, 256], sizes = [128, 32], strides = [1, 1]} : vector<128x384xbf16> to vector<128x32xbf16>
    %cst_10 = arith.constant dense<0.000000e+00> : vector<128x128xf32>
    %20 = tpu.matmul %17, %18, %cst_10 {dimension_numbers = #tpu.dot_dimension_numbers<[1], [1], [0], [0], [0, 0, 1, 0], [], []>} : vector<128x32xbf16>, vector<128x32xbf16>, vector<128x128xf32> -> vector<128x128xf32>
    %21 = vector.broadcast %16 : vector<1x128xf32> to vector<128x128xf32>
    %22 = arith.addf %20, %21 : vector<128x128xf32>
    %cst_11 = arith.constant dense<0xFF800000> : vector<128xf32>
    %23 = vector.multi_reduction <maximumf>, %22, %cst_11 [1] : vector<128x128xf32> to vector<128xf32>
    %24 = vector.shape_cast %23 : vector<128xf32> to vector<128x1xf32>
    %25 = vector.broadcast %24 : vector<128x1xf32> to vector<128x128xf32>
    %26 = arith.subf %22, %25 : vector<128x128xf32>
    %27 = math.exp %26 : vector<128x128xf32>
    %cst_12 = arith.constant dense<0.000000e+00> : vector<128xf32>
    %28 = vector.multi_reduction <add>, %27, %cst_12 [1] : vector<128x128xf32> to vector<128xf32>
    %29 = vector.shape_cast %28 : vector<128xf32> to vector<128x1xf32>
    %30 = tpu.reciprocal %29 {approx = true} : vector<128x1xf32> -> vector<128x1xf32>
    %31 = vector.broadcast %30 : vector<128x1xf32> to vector<128x128xf32>
    %32 = arith.mulf %27, %31 : vector<128x128xf32>
    %33 = arith.truncf %32 : vector<128x128xf32> to vector<128x128xbf16>
    %cst_13 = arith.constant dense<0.000000e+00> : vector<128x32xf32>
    %34 = tpu.matmul %33, %19, %cst_13 {dimension_numbers = #tpu.dot_dimension_numbers<[1], [0], [0], [1], [0, 0, 1, 1], [], []>} : vector<128x128xbf16>, vector<128x32xbf16>, vector<128x32xf32> -> vector<128x32xf32>
    %35 = arith.truncf %34 : vector<128x32xf32> to vector<128x32xbf16>
    %c0_14 = arith.constant 0 : index
    %c0_15 = arith.constant 0 : index
    %c0_16 = arith.constant 0 : index
    %36 = vector.load %arg8[%c0_14, %c0_15, %c0_16] : memref<1x128x128xbf16, #tpu.memory_space<vmem>>, vector<1x32x128xbf16>
    %37 = vector.shape_cast %36 : vector<1x32x128xbf16> to vector<32x128xbf16>
    %cst_17 = arith.constant dense<0.000000e+00> : vector<128x128xf32>
    %38 = tpu.matmul %35, %37, %cst_17 {dimension_numbers = #tpu.dot_dimension_numbers<[1], [0], [0], [1], [0, 0, 1, 1], [], []>} : vector<128x32xbf16>, vector<32x128xbf16>, vector<128x128xf32> -> vector<128x128xf32>
    %39 = vector.extract_strided_slice %12 {offsets = [0, 32], sizes = [128, 32], strides = [1, 1]} : vector<128x384xbf16> to vector<128x32xbf16>
    %40 = vector.extract_strided_slice %12 {offsets = [0, 160], sizes = [128, 32], strides = [1, 1]} : vector<128x384xbf16> to vector<128x32xbf16>
    %41 = vector.extract_strided_slice %12 {offsets = [0, 288], sizes = [128, 32], strides = [1, 1]} : vector<128x384xbf16> to vector<128x32xbf16>
    %cst_18 = arith.constant dense<0.000000e+00> : vector<128x128xf32>
    %42 = tpu.matmul %39, %40, %cst_18 {dimension_numbers = #tpu.dot_dimension_numbers<[1], [1], [0], [0], [0, 0, 1, 0], [], []>} : vector<128x32xbf16>, vector<128x32xbf16>, vector<128x128xf32> -> vector<128x128xf32>
    %43 = vector.broadcast %16 : vector<1x128xf32> to vector<128x128xf32>
    %44 = arith.addf %42, %43 : vector<128x128xf32>
    %cst_19 = arith.constant dense<0xFF800000> : vector<128xf32>
    %45 = vector.multi_reduction <maximumf>, %44, %cst_19 [1] : vector<128x128xf32> to vector<128xf32>
    %46 = vector.shape_cast %45 : vector<128xf32> to vector<128x1xf32>
    %47 = vector.broadcast %46 : vector<128x1xf32> to vector<128x128xf32>
    %48 = arith.subf %44, %47 : vector<128x128xf32>
    %49 = math.exp %48 : vector<128x128xf32>
    %cst_20 = arith.constant dense<0.000000e+00> : vector<128xf32>
    %50 = vector.multi_reduction <add>, %49, %cst_20 [1] : vector<128x128xf32> to vector<128xf32>
    %51 = vector.shape_cast %50 : vector<128xf32> to vector<128x1xf32>
    %52 = tpu.reciprocal %51 {approx = true} : vector<128x1xf32> -> vector<128x1xf32>
    %53 = vector.broadcast %52 : vector<128x1xf32> to vector<128x128xf32>
    %54 = arith.mulf %49, %53 : vector<128x128xf32>
    %55 = arith.truncf %54 : vector<128x128xf32> to vector<128x128xbf16>
    %cst_21 = arith.constant dense<0.000000e+00> : vector<128x32xf32>
    %56 = tpu.matmul %55, %41, %cst_21 {dimension_numbers = #tpu.dot_dimension_numbers<[1], [0], [0], [1], [0, 0, 1, 1], [], []>} : vector<128x128xbf16>, vector<128x32xbf16>, vector<128x32xf32> -> vector<128x32xf32>
    %57 = arith.truncf %56 : vector<128x32xf32> to vector<128x32xbf16>
    %c0_22 = arith.constant 0 : index
    %c32 = arith.constant 32 : index
    %c0_23 = arith.constant 0 : index
    %58 = vector.load %arg8[%c0_22, %c32, %c0_23] : memref<1x128x128xbf16, #tpu.memory_space<vmem>>, vector<1x32x128xbf16>
    %59 = vector.shape_cast %58 : vector<1x32x128xbf16> to vector<32x128xbf16>
    %cst_24 = arith.constant dense<0.000000e+00> : vector<128x128xf32>
    %60 = tpu.matmul %57, %59, %cst_24 {dimension_numbers = #tpu.dot_dimension_numbers<[1], [0], [0], [1], [0, 0, 1, 1], [], []>} : vector<128x32xbf16>, vector<32x128xbf16>, vector<128x128xf32> -> vector<128x128xf32>
    %61 = arith.addf %38, %60 : vector<128x128xf32>
    %62 = vector.extract_strided_slice %12 {offsets = [0, 64], sizes = [128, 32], strides = [1, 1]} : vector<128x384xbf16> to vector<128x32xbf16>
    %63 = vector.extract_strided_slice %12 {offsets = [0, 192], sizes = [128, 32], strides = [1, 1]} : vector<128x384xbf16> to vector<128x32xbf16>
    %64 = vector.extract_strided_slice %12 {offsets = [0, 320], sizes = [128, 32], strides = [1, 1]} : vector<128x384xbf16> to vector<128x32xbf16>
    %cst_25 = arith.constant dense<0.000000e+00> : vector<128x128xf32>
    %65 = tpu.matmul %62, %63, %cst_25 {dimension_numbers = #tpu.dot_dimension_numbers<[1], [1], [0], [0], [0, 0, 1, 0], [], []>} : vector<128x32xbf16>, vector<128x32xbf16>, vector<128x128xf32> -> vector<128x128xf32>
    %66 = vector.broadcast %16 : vector<1x128xf32> to vector<128x128xf32>
    %67 = arith.addf %65, %66 : vector<128x128xf32>
    %cst_26 = arith.constant dense<0xFF800000> : vector<128xf32>
    %68 = vector.multi_reduction <maximumf>, %67, %cst_26 [1] : vector<128x128xf32> to vector<128xf32>
    %69 = vector.shape_cast %68 : vector<128xf32> to vector<128x1xf32>
    %70 = vector.broadcast %69 : vector<128x1xf32> to vector<128x128xf32>
    %71 = arith.subf %67, %70 : vector<128x128xf32>
    %72 = math.exp %71 : vector<128x128xf32>
    %cst_27 = arith.constant dense<0.000000e+00> : vector<128xf32>
    %73 = vector.multi_reduction <add>, %72, %cst_27 [1] : vector<128x128xf32> to vector<128xf32>
    %74 = vector.shape_cast %73 : vector<128xf32> to vector<128x1xf32>
    %75 = tpu.reciprocal %74 {approx = true} : vector<128x1xf32> -> vector<128x1xf32>
    %76 = vector.broadcast %75 : vector<128x1xf32> to vector<128x128xf32>
    %77 = arith.mulf %72, %76 : vector<128x128xf32>
    %78 = arith.truncf %77 : vector<128x128xf32> to vector<128x128xbf16>
    %cst_28 = arith.constant dense<0.000000e+00> : vector<128x32xf32>
    %79 = tpu.matmul %78, %64, %cst_28 {dimension_numbers = #tpu.dot_dimension_numbers<[1], [0], [0], [1], [0, 0, 1, 1], [], []>} : vector<128x128xbf16>, vector<128x32xbf16>, vector<128x32xf32> -> vector<128x32xf32>
    %80 = arith.truncf %79 : vector<128x32xf32> to vector<128x32xbf16>
    %c0_29 = arith.constant 0 : index
    %c64 = arith.constant 64 : index
    %c0_30 = arith.constant 0 : index
    %81 = vector.load %arg8[%c0_29, %c64, %c0_30] : memref<1x128x128xbf16, #tpu.memory_space<vmem>>, vector<1x32x128xbf16>
    %82 = vector.shape_cast %81 : vector<1x32x128xbf16> to vector<32x128xbf16>
    %cst_31 = arith.constant dense<0.000000e+00> : vector<128x128xf32>
    %83 = tpu.matmul %80, %82, %cst_31 {dimension_numbers = #tpu.dot_dimension_numbers<[1], [0], [0], [1], [0, 0, 1, 1], [], []>} : vector<128x32xbf16>, vector<32x128xbf16>, vector<128x128xf32> -> vector<128x128xf32>
    %84 = arith.addf %61, %83 : vector<128x128xf32>
    %85 = vector.extract_strided_slice %12 {offsets = [0, 96], sizes = [128, 32], strides = [1, 1]} : vector<128x384xbf16> to vector<128x32xbf16>
    %86 = vector.extract_strided_slice %12 {offsets = [0, 224], sizes = [128, 32], strides = [1, 1]} : vector<128x384xbf16> to vector<128x32xbf16>
    %87 = vector.extract_strided_slice %12 {offsets = [0, 352], sizes = [128, 32], strides = [1, 1]} : vector<128x384xbf16> to vector<128x32xbf16>
    %cst_32 = arith.constant dense<0.000000e+00> : vector<128x128xf32>
    %88 = tpu.matmul %85, %86, %cst_32 {dimension_numbers = #tpu.dot_dimension_numbers<[1], [1], [0], [0], [0, 0, 1, 0], [], []>} : vector<128x32xbf16>, vector<128x32xbf16>, vector<128x128xf32> -> vector<128x128xf32>
    %89 = vector.broadcast %16 : vector<1x128xf32> to vector<128x128xf32>
    %90 = arith.addf %88, %89 : vector<128x128xf32>
    %cst_33 = arith.constant dense<0xFF800000> : vector<128xf32>
    %91 = vector.multi_reduction <maximumf>, %90, %cst_33 [1] : vector<128x128xf32> to vector<128xf32>
    %92 = vector.shape_cast %91 : vector<128xf32> to vector<128x1xf32>
    %93 = vector.broadcast %92 : vector<128x1xf32> to vector<128x128xf32>
    %94 = arith.subf %90, %93 : vector<128x128xf32>
    %95 = math.exp %94 : vector<128x128xf32>
    %cst_34 = arith.constant dense<0.000000e+00> : vector<128xf32>
    %96 = vector.multi_reduction <add>, %95, %cst_34 [1] : vector<128x128xf32> to vector<128xf32>
    %97 = vector.shape_cast %96 : vector<128xf32> to vector<128x1xf32>
    %98 = tpu.reciprocal %97 {approx = true} : vector<128x1xf32> -> vector<128x1xf32>
    %99 = vector.broadcast %98 : vector<128x1xf32> to vector<128x128xf32>
    %100 = arith.mulf %95, %99 : vector<128x128xf32>
    %101 = arith.truncf %100 : vector<128x128xf32> to vector<128x128xbf16>
    %cst_35 = arith.constant dense<0.000000e+00> : vector<128x32xf32>
    %102 = tpu.matmul %101, %87, %cst_35 {dimension_numbers = #tpu.dot_dimension_numbers<[1], [0], [0], [1], [0, 0, 1, 1], [], []>} : vector<128x128xbf16>, vector<128x32xbf16>, vector<128x32xf32> -> vector<128x32xf32>
    %103 = arith.truncf %102 : vector<128x32xf32> to vector<128x32xbf16>
    %c0_36 = arith.constant 0 : index
    %c96 = arith.constant 96 : index
    %c0_37 = arith.constant 0 : index
    %104 = vector.load %arg8[%c0_36, %c96, %c0_37] : memref<1x128x128xbf16, #tpu.memory_space<vmem>>, vector<1x32x128xbf16>
    %105 = vector.shape_cast %104 : vector<1x32x128xbf16> to vector<32x128xbf16>
    %cst_38 = arith.constant dense<0.000000e+00> : vector<128x128xf32>
    %106 = tpu.matmul %103, %105, %cst_38 {dimension_numbers = #tpu.dot_dimension_numbers<[1], [0], [0], [1], [0, 0, 1, 1], [], []>} : vector<128x32xbf16>, vector<32x128xbf16>, vector<128x128xf32> -> vector<128x128xf32>
    %107 = arith.addf %84, %106 : vector<128x128xf32>
    %c0_39 = arith.constant 0 : index
    %c0_40 = arith.constant 0 : index
    %c0_41 = arith.constant 0 : index
    %108 = vector.load %arg9[%c0_39, %c0_40, %c0_41] : memref<1x1x128xf32, #tpu.memory_space<vmem>>, vector<1x1x128xf32>
    %109 = vector.shape_cast %108 : vector<1x1x128xf32> to vector<1x128xf32>
    %110 = vector.broadcast %109 : vector<1x128xf32> to vector<128x128xf32>
    %111 = arith.addf %107, %110 : vector<128x128xf32>
    %112 = arith.addf %111, %3 : vector<128x128xf32>
    %c0_42 = arith.constant 0 : index
    %c0_43 = arith.constant 0 : index
    %c0_44 = arith.constant 0 : index
    %113 = vector.load %arg10[%c0_42, %c0_43, %c0_44] : memref<1x1x128xf32, #tpu.memory_space<vmem>>, vector<1x1x128xf32>
    %114 = vector.shape_cast %113 : vector<1x1x128xf32> to vector<1x128xf32>
    %c0_45 = arith.constant 0 : index
    %c0_46 = arith.constant 0 : index
    %c0_47 = arith.constant 0 : index
    %115 = vector.load %arg11[%c0_45, %c0_46, %c0_47] : memref<1x1x128xf32, #tpu.memory_space<vmem>>, vector<1x1x128xf32>
    %116 = vector.shape_cast %115 : vector<1x1x128xf32> to vector<1x128xf32>
    %cst_48 = arith.constant dense<0.000000e+00> : vector<128xf32>
    %117 = vector.multi_reduction <add>, %112, %cst_48 [1] : vector<128x128xf32> to vector<128xf32>
    %118 = vector.shape_cast %117 : vector<128xf32> to vector<128x1xf32>
    %cst_49 = arith.constant 1.280000e+02 : f32
    %119 = vector.broadcast %cst_49 : f32 to vector<128x1xf32>
    %120 = arith.divf %118, %119 : vector<128x1xf32>
    %121 = vector.broadcast %120 : vector<128x1xf32> to vector<128x128xf32>
    %122 = arith.subf %112, %121 : vector<128x128xf32>
    %123 = arith.mulf %122, %122 : vector<128x128xf32>
    %cst_50 = arith.constant dense<0.000000e+00> : vector<128xf32>
    %124 = vector.multi_reduction <add>, %123, %cst_50 [1] : vector<128x128xf32> to vector<128xf32>
    %125 = vector.shape_cast %124 : vector<128xf32> to vector<128x1xf32>
    %cst_51 = arith.constant 1.280000e+02 : f32
    %126 = vector.broadcast %cst_51 : f32 to vector<128x1xf32>
    %127 = arith.divf %125, %126 : vector<128x1xf32>
    %cst_52 = arith.constant 9.99999996E-13 : f32
    %128 = vector.broadcast %cst_52 : f32 to vector<128x1xf32>
    %129 = arith.addf %127, %128 : vector<128x1xf32>
    %130 = math.rsqrt %129 : vector<128x1xf32>
    %131 = vector.broadcast %130 : vector<128x1xf32> to vector<128x128xf32>
    %132 = arith.mulf %122, %131 : vector<128x128xf32>
    %133 = vector.broadcast %114 : vector<1x128xf32> to vector<128x128xf32>
    %134 = arith.mulf %132, %133 : vector<128x128xf32>
    %135 = vector.broadcast %116 : vector<1x128xf32> to vector<128x128xf32>
    %136 = arith.addf %134, %135 : vector<128x128xf32>
    %137 = arith.truncf %136 : vector<128x128xf32> to vector<128x128xbf16>
    %c0_53 = arith.constant 0 : index
    %c0_54 = arith.constant 0 : index
    %c0_55 = arith.constant 0 : index
    %138 = vector.load %arg12[%c0_53, %c0_54, %c0_55] : memref<1x128x256xbf16, #tpu.memory_space<vmem>>, vector<1x128x256xbf16>
    %139 = vector.shape_cast %138 : vector<1x128x256xbf16> to vector<128x256xbf16>
    %cst_56 = arith.constant dense<0.000000e+00> : vector<128x256xf32>
    %140 = tpu.matmul %137, %139, %cst_56 {dimension_numbers = #tpu.dot_dimension_numbers<[1], [0], [0], [1], [0, 0, 1, 1], [], []>} : vector<128x128xbf16>, vector<128x256xbf16>, vector<128x256xf32> -> vector<128x256xf32>
    %c0_57 = arith.constant 0 : index
    %c0_58 = arith.constant 0 : index
    %c0_59 = arith.constant 0 : index
    %141 = vector.load %arg13[%c0_57, %c0_58, %c0_59] : memref<1x1x256xf32, #tpu.memory_space<vmem>>, vector<1x1x256xf32>
    %142 = vector.shape_cast %141 : vector<1x1x256xf32> to vector<1x256xf32>
    %143 = vector.broadcast %142 : vector<1x256xf32> to vector<128x256xf32>
    %144 = arith.addf %140, %143 : vector<128x256xf32>
    %cst_60 = arith.constant 5.000000e-01 : f32
    %145 = vector.broadcast %cst_60 : f32 to vector<128x256xf32>
    %146 = arith.mulf %145, %144 : vector<128x256xf32>
    %cst_61 = arith.constant 4.471500e-02 : f32
    %147 = vector.broadcast %cst_61 : f32 to vector<128x256xf32>
    %148 = arith.mulf %147, %144 : vector<128x256xf32>
    %149 = arith.mulf %148, %144 : vector<128x256xf32>
    %150 = arith.mulf %149, %144 : vector<128x256xf32>
    %151 = arith.addf %144, %150 : vector<128x256xf32>
    %cst_62 = arith.constant 0.797884583 : f32
    %152 = vector.broadcast %cst_62 : f32 to vector<128x256xf32>
    %153 = arith.mulf %152, %151 : vector<128x256xf32>
    %154 = math.tanh %153 : vector<128x256xf32>
    %cst_63 = arith.constant 1.000000e+00 : f32
    %155 = vector.broadcast %cst_63 : f32 to vector<128x256xf32>
    %156 = arith.addf %155, %154 : vector<128x256xf32>
    %157 = arith.mulf %146, %156 : vector<128x256xf32>
    %158 = arith.truncf %157 : vector<128x256xf32> to vector<128x256xbf16>
    %c0_64 = arith.constant 0 : index
    %c0_65 = arith.constant 0 : index
    %c0_66 = arith.constant 0 : index
    %159 = vector.load %arg14[%c0_64, %c0_65, %c0_66] : memref<1x256x128xbf16, #tpu.memory_space<vmem>>, vector<1x256x128xbf16>
    %160 = vector.shape_cast %159 : vector<1x256x128xbf16> to vector<256x128xbf16>
    %cst_67 = arith.constant dense<0.000000e+00> : vector<128x128xf32>
    %161 = tpu.matmul %158, %160, %cst_67 {dimension_numbers = #tpu.dot_dimension_numbers<[1], [0], [0], [1], [0, 0, 1, 1], [], []>} : vector<128x256xbf16>, vector<256x128xbf16>, vector<128x128xf32> -> vector<128x128xf32>
    %c0_68 = arith.constant 0 : index
    %c0_69 = arith.constant 0 : index
    %c0_70 = arith.constant 0 : index
    %162 = vector.load %arg15[%c0_68, %c0_69, %c0_70] : memref<1x1x128xf32, #tpu.memory_space<vmem>>, vector<1x1x128xf32>
    %163 = vector.shape_cast %162 : vector<1x1x128xf32> to vector<1x128xf32>
    %164 = vector.broadcast %163 : vector<1x128xf32> to vector<128x128xf32>
    %165 = arith.addf %161, %164 : vector<128x128xf32>
    %166 = arith.addf %165, %136 : vector<128x128xf32>
    %c0_71 = arith.constant 0 : index
    %c0_72 = arith.constant 0 : index
    %c0_73 = arith.constant 0 : index
    %167 = vector.load %arg16[%c0_71, %c0_72, %c0_73] : memref<1x1x128xf32, #tpu.memory_space<vmem>>, vector<1x1x128xf32>
    %168 = vector.shape_cast %167 : vector<1x1x128xf32> to vector<1x128xf32>
    %c0_74 = arith.constant 0 : index
    %c0_75 = arith.constant 0 : index
    %c0_76 = arith.constant 0 : index
    %169 = vector.load %arg17[%c0_74, %c0_75, %c0_76] : memref<1x1x128xf32, #tpu.memory_space<vmem>>, vector<1x1x128xf32>
    %170 = vector.shape_cast %169 : vector<1x1x128xf32> to vector<1x128xf32>
    %cst_77 = arith.constant dense<0.000000e+00> : vector<128xf32>
    %171 = vector.multi_reduction <add>, %166, %cst_77 [1] : vector<128x128xf32> to vector<128xf32>
    %172 = vector.shape_cast %171 : vector<128xf32> to vector<128x1xf32>
    %cst_78 = arith.constant 1.280000e+02 : f32
    %173 = vector.broadcast %cst_78 : f32 to vector<128x1xf32>
    %174 = arith.divf %172, %173 : vector<128x1xf32>
    %175 = vector.broadcast %174 : vector<128x1xf32> to vector<128x128xf32>
    %176 = arith.subf %166, %175 : vector<128x128xf32>
    %177 = arith.mulf %176, %176 : vector<128x128xf32>
    %cst_79 = arith.constant dense<0.000000e+00> : vector<128xf32>
    %178 = vector.multi_reduction <add>, %177, %cst_79 [1] : vector<128x128xf32> to vector<128xf32>
    %179 = vector.shape_cast %178 : vector<128xf32> to vector<128x1xf32>
    %cst_80 = arith.constant 1.280000e+02 : f32
    %180 = vector.broadcast %cst_80 : f32 to vector<128x1xf32>
    %181 = arith.divf %179, %180 : vector<128x1xf32>
    %cst_81 = arith.constant 9.99999996E-13 : f32
    %182 = vector.broadcast %cst_81 : f32 to vector<128x1xf32>
    %183 = arith.addf %181, %182 : vector<128x1xf32>
    %184 = math.rsqrt %183 : vector<128x1xf32>
    %185 = vector.broadcast %184 : vector<128x1xf32> to vector<128x128xf32>
    %186 = arith.mulf %176, %185 : vector<128x128xf32>
    %187 = vector.broadcast %168 : vector<1x128xf32> to vector<128x128xf32>
    %188 = arith.mulf %186, %187 : vector<128x128xf32>
    %189 = vector.broadcast %170 : vector<1x128xf32> to vector<128x128xf32>
    %190 = arith.addf %188, %189 : vector<128x128xf32>
    %c0_82 = arith.constant 0 : index
    %c0_83 = arith.constant 0 : index
    %191 = vector.load %arg18[%c0_82, %c0_83] : memref<128x128xf32, #tpu.memory_space<vmem>>, vector<128x128xf32>
    tpu.vector_store %arg18[%c0_82, %c0_83], %190 {strides = array<i32>} : memref<128x128xf32, #tpu.memory_space<vmem>>, vector<128x128xf32>,
    return
  }
  func.func @transform_0(%arg0: i32, %arg1: i32) -> (i32, i32) {
    %c0_i32 = arith.constant 0 : i32
    %c0_i32_0 = arith.constant 0 : i32
    return %arg0, %c0_i32 : i32, i32
  }
  func.func @transform_1(%arg0: i32, %arg1: i32) -> (i32, i32) {
    %c0_i32 = arith.constant 0 : i32
    %c0_i32_0 = arith.constant 0 : i32
    %c0_i32_1 = arith.constant 0 : i32
    return %c0_i32, %c0_i32_0 : i32, i32
  }
  func.func @transform_2(%arg0: i32, %arg1: i32) -> (i32, i32) {
    %c0_i32 = arith.constant 0 : i32
    %c0_i32_0 = arith.constant 0 : i32
    %c0_i32_1 = arith.constant 0 : i32
    return %c0_i32, %c0_i32_0 : i32, i32
  }
  func.func @transform_3(%arg0: i32, %arg1: i32) -> (i32, i32) {
    %c0_i32 = arith.constant 0 : i32
    %c0_i32_0 = arith.constant 0 : i32
    %c0_i32_1 = arith.constant 0 : i32
    return %c0_i32, %c0_i32_0 : i32, i32
  }
  func.func @transform_4(%arg0: i32, %arg1: i32) -> (i32, i32, i32) {
    %c0_i32 = arith.constant 0 : i32
    %c0_i32_0 = arith.constant 0 : i32
    %c0_i32_1 = arith.constant 0 : i32
    return %arg1, %c0_i32, %c0_i32_0 : i32, i32, i32
  }
  func.func @transform_5(%arg0: i32, %arg1: i32) -> (i32, i32, i32) {
    %c0_i32 = arith.constant 0 : i32
    %c0_i32_0 = arith.constant 0 : i32
    %c0_i32_1 = arith.constant 0 : i32
    return %arg1, %c0_i32, %c0_i32_0 : i32, i32, i32
  }
  func.func @transform_6(%arg0: i32, %arg1: i32) -> (i32, i32, i32) {
    %c0_i32 = arith.constant 0 : i32
    %c0_i32_0 = arith.constant 0 : i32
    %c0_i32_1 = arith.constant 0 : i32
    return %arg1, %c0_i32, %c0_i32_0 : i32, i32, i32
  }
  func.func @transform_7(%arg0: i32, %arg1: i32) -> (i32, i32, i32) {
    %c0_i32 = arith.constant 0 : i32
    %c0_i32_0 = arith.constant 0 : i32
    %c0_i32_1 = arith.constant 0 : i32
    return %arg1, %c0_i32, %c0_i32_0 : i32, i32, i32
  }
  func.func @transform_8(%arg0: i32, %arg1: i32) -> (i32, i32, i32) {
    %c0_i32 = arith.constant 0 : i32
    %c0_i32_0 = arith.constant 0 : i32
    %c0_i32_1 = arith.constant 0 : i32
    return %arg1, %c0_i32, %c0_i32_0 : i32, i32, i32
  }
  func.func @transform_9(%arg0: i32, %arg1: i32) -> (i32, i32, i32) {
    %c0_i32 = arith.constant 0 : i32
    %c0_i32_0 = arith.constant 0 : i32
    %c0_i32_1 = arith.constant 0 : i32
    return %arg1, %c0_i32, %c0_i32_0 : i32, i32, i32
  }
  func.func @transform_10(%arg0: i32, %arg1: i32) -> (i32, i32, i32) {
    %c0_i32 = arith.constant 0 : i32
    %c0_i32_0 = arith.constant 0 : i32
    %c0_i32_1 = arith.constant 0 : i32
    return %arg1, %c0_i32, %c0_i32_0 : i32, i32, i32
  }
  func.func @transform_11(%arg0: i32, %arg1: i32) -> (i32, i32, i32) {
    %c0_i32 = arith.constant 0 : i32
    %c0_i32_0 = arith.constant 0 : i32
    %c0_i32_1 = arith.constant 0 : i32
    return %arg1, %c0_i32, %c0_i32_0 : i32, i32, i32
  }
  func.func @transform_12(%arg0: i32, %arg1: i32) -> (i32, i32, i32) {
    %c0_i32 = arith.constant 0 : i32
    %c0_i32_0 = arith.constant 0 : i32
    %c0_i32_1 = arith.constant 0 : i32
    return %arg1, %c0_i32, %c0_i32_0 : i32, i32, i32
  }
  func.func @transform_13(%arg0: i32, %arg1: i32) -> (i32, i32, i32) {
    %c0_i32 = arith.constant 0 : i32
    %c0_i32_0 = arith.constant 0 : i32
    %c0_i32_1 = arith.constant 0 : i32
    return %arg1, %c0_i32, %c0_i32_0 : i32, i32, i32
  }
  func.func @transform_14(%arg0: i32, %arg1: i32) -> (i32, i32, i32) {
    %c0_i32 = arith.constant 0 : i32
    %c0_i32_0 = arith.constant 0 : i32
    %c0_i32_1 = arith.constant 0 : i32
    return %arg1, %c0_i32, %c0_i32_0 : i32, i32, i32
  }
  func.func @transform_15(%arg0: i32, %arg1: i32) -> (i32, i32, i32) {
    %c0_i32 = arith.constant 0 : i32
    %c0_i32_0 = arith.constant 0 : i32
    %c0_i32_1 = arith.constant 0 : i32
    return %arg1, %c0_i32, %c0_i32_0 : i32, i32, i32
  }
  func.func @transform_16(%arg0: i32, %arg1: i32) -> (i32, i32) {
    %c0_i32 = arith.constant 0 : i32
    %c0_i32_0 = arith.constant 0 : i32
    return %arg0, %c0_i32 : i32, i32
  }
}

</mosaic_0001>

<bundles_post_ra>
// kernel: _forward_logits.1
= control target key start
LH: loop header
LB: loop body
LE: loop exit
PB: predicated region body
PF: predicated region fallthrough
CT: control target
= control target key end

     0   :  { %s6789_s21 = smov 0   ;;  %s6791_s22 = smov 0   ;;  %s9252_s0 = inlined_call_operand.vmem [shape: f32[256,128], index: 0, kind: input, shape index: {}]   ;;  %s9253_s1 = inlined_call_operand.vmem [shape: f32[2,128], index: 1, kind: input, shape index: {}]   ;;  %s9254_s2 = inlined_call_operand.vmem [shape: f32[1,128], index: 2, kind: input, shape index: {}]   ;;  %s9255_s3 = inlined_call_operand.vmem [shape: f32[1,128], index: 3, kind: input, shape index: {}]   ;;  %s9256_s4 = inlined_call_operand.vmem [shape: bf16[2,128,384], index: 4, kind: input, shape index: {}]   ;;  %s9257_s5 = inlined_call_operand.vmem [shape: f32[2,1,384], index: 5, kind: input, shape index: {}]   ;;  %s9258_s6 = inlined_call_operand.vmem [shape: bf16[2,128,128], index: 6, kind: input, shape index: {}]   ;;  %s9259_s7 = inlined_call_operand.vmem [shape: f32[2,1,128], index: 7, kind: input, shape index: {}]   ;;  %s9260_s8 = inlined_call_operand.vmem [shape: f32[2,1,128], index: 8, kind: input, shape index: {}]   ;;  %s9261_s9 = inlined_call_operand.vmem [shape: f32[2,1,128], index: 9, kind: input, shape index: {}]   ;;  %s9262_s10 = inlined_call_operand.vmem [shape: bf16[2,128,256], index: 10, kind: input, shape index: {}]   ;;  %s9263_s11 = inlined_call_operand.vmem [shape: f32[2,1,256], index: 11, kind: input, shape index: {}]   ;;  %s9264_s12 = inlined_call_operand.vmem [shape: bf16[2,256,128], index: 12, kind: input, shape index: {}]   ;;  %s9265_s13 = inlined_call_operand.vmem [shape: f32[2,1,128], index: 13, kind: input, shape index: {}]   ;;  %s9266_s14 = inlined_call_operand.vmem [shape: f32[2,1,128], index: 14, kind: input, shape index: {}]   ;;  %s9267_s15 = inlined_call_operand.vmem [shape: f32[2,1,128], index: 15, kind: input, shape index: {}]   ;;  %s9268_s16 = inlined_call_operand.vmem [shape: f32[256,128], index: 16, kind: output, shape index: {}]  }
   0x1   :  { %9280 = sst [smem:[#allocation15_spill]] %s9252_s0  ;;  %s6793_s23 = smov 0  }
   0x2   :  { %9281 = sst [smem:[#allocation16_spill]] %s9253_s1  ;;  %s6795_s24 = smov 0  }
   0x3   :  { %9282 = sst [smem:[#allocation17_spill]] %s9254_s2  ;;  %s6797_s25 = smov 0  }
   0x4   :  { %9283 = sst [smem:[#allocation18_spill]] %s9255_s3 }
   0x5   :  { %9284 = sst [smem:[#allocation19_spill]] %s9256_s4 }
   0x6   :  { %9285 = sst [smem:[#allocation20_spill]] %s9257_s5 }
   0x7   :  { %9286 = sst [smem:[#allocation21_spill]] %s9258_s6 }
   0x8   :  { %9287 = sst [smem:[#allocation22_spill]] %s9261_s9 }
   0x9   :  { %9288 = sst [smem:[#allocation23_spill]] %s9262_s10 }
   0xa   :  { %9289 = sst [smem:[#allocation24_spill]] %s9263_s11 }
   0xb   :  { %9290 = sst [smem:[#allocation25_spill]] %s9267_s15 }
   0xc   :  { %9291 = sst [smem:[#allocation26_spill]] %s9268_s16 }
   0xd LB: > { %9292 = sst [smem:[#allocation2_spill]] %s6682_s21  ;;  %s35_s26 = sadd.s32 1, %s6690_s23  ;;  %s6698_s25 = sphi %s6797_s25, %s26_s25   ;;  %s6694_s24 = sphi %s6795_s24, %s9337_s24   ;;  %s6690_s23 = sphi %s6793_s23, %s9336_s23   ;;  %s6686_s22 = sphi %s6791_s22, %s9335_s22   ;;  %s6682_s21 = sphi %s6789_s21, %s9334_s21  }
   0xe   : > { %9293 = sst [smem:[#allocation3_spill]] %s6686_s22  ;;  %s38_s27 = sadd.s32 1, %s6694_s24 }
   0xf   : > { %9294 = sst [smem:[#allocation4_spill]] %s6690_s23  ;;  %p36_p0 = scmp.ge.s32.totalorder %s35_s26, 2 }
  0x10   : > { %9295 = sst [smem:[#allocation5_spill]] %s6694_s24  ;;  %p5297_p1 = scmp.ge.s32.totalorder %s6698_s25, 1 }
  0x11   : > { %9296 = sst [smem:[#allocation6_spill]] %s6698_s25  ;;  %p581_p2 = scmp.lt.s32.totalorder %s6698_s25, 5 }
  0x12   : > { %s9339_s26 = smov (%p36_p0, %s35_s26), 0  ;;  %s9341_s27 = smov (!%p36_p0, %s38_s27), %s6694_s24 }
  0x13   : > { %9297 = sst [smem:[#allocation7_spill]] %s9339_s26  ;;  %p582_p3 = pnand %p5297_p1, %p581_p2 }
  0x14   : > { %p40_p4 = scmp.ge.s32.totalorder %s9341_s27, 2 }
  0x15   : > { %585 = sbr.rel (%p582_p3) target bundleno = 4494 (0x118e), region = 84 }
  0x16   : > { %s9343_s27 = smov (%p40_p4, %s9341_s27), 0 }
  0x17   : > { %9298 = sst [smem:[#allocation8_spill]] %s9343_s27 }
  0x1a   : > { %s5298_s28 = sshll.u32 %s6686_s22, 4  ;;  %p683_p5 = scmp.lt.s32.totalorder %s6682_s21, 1 }
  0x1b   : > { %p678_p6 = scmp.lt.s32.totalorder %s5298_s28, 31  ;;  %s9299_s27 = sld [smem:[#allocation15_spill]] }
  0x1c   : > { %s6826_s29 = scalar_select %p683_p5, %s6682_s21, 1 }
  0x1d   : > { %s9345_s28 = smov (!%p678_p6, %s5298_s28), 31  ;;  %s9300_s4 = sld [smem:[#allocation19_spill]] }
  0x1e   : > { %s6101_s30 = smul.u32 192, %s6826_s29  ;;  %s5450_s0 = sshll.u32 %s6826_s29, 6 }
  0x1f   : > { %s5299_s17 = sshll.u32 %s9345_s28, 3  ;;  %s6102_s18 = smul.u32 3, %s6826_s29 }
  0x20   : > { %s9301_s5 = sld [smem:[#allocation20_spill]]  ;;  %s5451_s1 = sshll.u32 %s6826_s29, 7 }
  0x21   : > { %s6834_s26 = scalar_lea.vmem %s9299_s27, %s5299_s17  ;;  %s9302_s6 = sld [smem:[#allocation21_spill]] }
  0x22   : > { %s9304_s10 = sld [smem:[#allocation23_spill]]  ;;  %s5305_s2 = sshll.u32 %s6826_s29, 1 }
  0x23   : > { %s6839_s25 = scalar_lea.vmem %s9300_s4, %s6101_s30  ;;  %s9305_s11 = sld [smem:[#allocation24_spill]] }
  0x24   : > { %s6878_s19 = scalar_lea.vmem %s9264_s12, %s5451_s1  ;;  %s722_s30 = scalar_lea.vmem %s9265_s13, %s6826_s29 }
  0x25   : > { %s725_s22 = scalar_lea.vmem %s9266_s14, %s6826_s29  ;;  %s9308_s27 = sld [smem:[#allocation2_spill]] }
  0x26   : > { %s6844_s3 = scalar_lea.vmem %s9301_s5, %s6102_s18 }
  0x27   : > { %s6849_s28 = scalar_lea.vmem %s9302_s6, %s5450_s0  ;;  %s9307_s0 = sld [smem:[#allocation26_spill]] }
  0x28   : > { %s6867_s5 = scalar_lea.vmem %s9304_s10, %s5451_s1  ;;  %s9306_s10 = sld [smem:[#allocation25_spill]] }
  0x29   : > { %s6873_s15 = scalar_lea.vmem %s9305_s11, %s5305_s2 }
  0x2b   : > { %p5310_p7 = scmp.ne.s32.totalorder %s9308_s27, 0 }
  0x2c   : > { %s9310_s23 = sld [smem:[#allocation18_spill]] (!%p5310_p7) }
  0x2d   : > { %s6895_s11 = scalar_lea.vmem %s9307_s0, %s5299_s17  ;;  %739 = sbr.rel (%p5310_p7) target bundleno = 390 (0x186), region = 88 }
  0x2e   : > { %s728_s9 = scalar_lea.vmem %s9306_s10, %s6826_s29  ;;  %s9309_s10 = sld [smem:[#allocation17_spill]] (!%p5310_p7) }
  0x32   : > { %v740_v0 = vld [vmem:[%s6834_s26] sm:$0xff]  ;;  %v742_v1 = vld [vmem:[%s6834_s26 + $0x10] sm:$0xff]  ;;  %v741_v2 = vld [vmem:[%s6834_s26 + $0x8] sm:$0xff] }
  0x33   : > { %758 = vadd.xlane.f32.xlu0 %v740_v0  ;;  %762 = vadd.xlane.f32.xlu1 %v742_v1  ;;  %v743_v3 = vld [vmem:[%s6834_s26 + $0x18] sm:$0xff]  ;;  %v744_v4 = vld [vmem:[%s6834_s26 + $0x20] sm:$0xff]  ;;  %v745_v5 = vld [vmem:[%s6834_s26 + $0x28] sm:$0xff] }
  0x34   : > { %v746_v6 = vld [vmem:[%s6834_s26 + $0x30] sm:$0xff]  ;;  %v747_v7 = vld [vmem:[%s6834_s26 + $0x38] sm:$0xff]  ;;  %v748_v8 = vld [vmem:[%s6834_s26 + $0x40] sm:$0xff] }
  0x35   : > { %v749_v9 = vld [vmem:[%s6834_s26 + $0x48] sm:$0xff]  ;;  %v750_v10 = vld [vmem:[%s6834_s26 + $0x50] sm:$0xff]  ;;  %v6910_v11 = vld [vmem:[%s6834_s26 + $0x58] sm:$0xff] }
  0x36   : > { %v6914_v12 = vld [vmem:[%s6834_s26 + $0x60] sm:$0xff]  ;;  %v6917_v13 = vld [vmem:[%s6834_s26 + $0x68] sm:$0xff]  ;;  %v6922_v14 = vld [vmem:[%s6834_s26 + $0x70] sm:$0xff] }
  0x37   : > { %760 = vadd.xlane.f32.xlu0 %v741_v2  ;;  %764 = vadd.xlane.f32.xlu1 %v743_v3  ;;  %v6925_v15 = vld [vmem:[%s6834_s26 + $0x78] sm:$0xff] }
  0x3b   : > { %766 = vadd.xlane.f32.xlu0 %v744_v4  ;;  %768 = vadd.xlane.f32.xlu1 %v745_v5 }
  0x3f   : > { %770 = vadd.xlane.f32.xlu0 %v746_v6  ;;  %772 = vadd.xlane.f32.xlu1 %v747_v7 }
  0x43   : > { %774 = vadd.xlane.f32.xlu0 %v748_v8  ;;  %776 = vadd.xlane.f32.xlu1 %v749_v9 }
  0x47   : > { %778 = vadd.xlane.f32.xlu0 %v750_v10  ;;  %780 = vadd.xlane.f32.xlu1 %v6910_v11 }
  0x4b   : > { %782 = vadd.xlane.f32.xlu0 %v6914_v12  ;;  %784 = vadd.xlane.f32.xlu1 %v6917_v13 }
  0x4f   : > { %786 = vadd.xlane.f32.xlu0 %v6922_v14  ;;  %788 = vadd.xlane.f32.xlu1 %v6925_v15 }
  0xbc   : > { %v759_v16 = vpop.xlane.xlu0 %758  ;;  %v763_v17 = vpop.xlane.xlu1 %762 }
  0xbd   : > { %v791_v18 = vmul.f32 0.0078125, %v759_v16  ;;  %v793_v19 = vmul.f32 0.0078125, %v763_v17 }
  0xbf   : > { %v6929_v20 = vsub.f32 %v740_v0, %v791_v18  ;;  %v6931_v21 = vsub.f32 %v742_v1, %v793_v19 }
  0xc0   : > { %v761_v22 = vpop.xlane.xlu0 %760  ;;  %v765_v23 = vpop.xlane.xlu1 %764 }
  0xc1   : > { %v792_v24 = vmul.f32 0.0078125, %v761_v22  ;;  %v823_v25 = vmul.f32 %v6929_v20, %v6929_v20  ;;  %v794_v26 = vmul.f32 0.0078125, %v765_v23  ;;  %v825_v29 = vmul.f32 %v6931_v21, %v6931_v21 }
  0xc3   : > { %v6935_v27 = vsub.f32 %v741_v2, %v792_v24  ;;  %839 = vadd.xlane.f32.xlu0 %v823_v25  ;;  %v6937_v28 = vsub.f32 %v743_v3, %v794_v26 }
  0xc4   : > { %v767_v30 = vpop.xlane.xlu0 %766  ;;  %v769_v31 = vpop.xlane.xlu1 %768 }
  0xc5   : > { %v795_v32 = vmul.f32 0.0078125, %v767_v30  ;;  %v824_v33 = vmul.f32 %v6935_v27, %v6935_v27  ;;  %v796_v34 = vmul.f32 0.0078125, %v769_v31  ;;  %v826_v37 = vmul.f32 %v6937_v28, %v6937_v28 }
  0xc7   : > { %v6943_v35 = vsub.f32 %v744_v4, %v795_v32  ;;  %843 = vadd.xlane.f32.xlu0 %v825_v29  ;;  %841 = vadd.xlane.f32.xlu1 %v824_v33  ;;  %v6945_v36 = vsub.f32 %v745_v5, %v796_v34 }
  0xc8   : > { %v771_v38 = vpop.xlane.xlu0 %770  ;;  %v773_v39 = vpop.xlane.xlu1 %772 }
  0xc9   : > { %v797_v40 = vmul.f32 0.0078125, %v771_v38  ;;  %v827_v41 = vmul.f32 %v6943_v35, %v6943_v35  ;;  %v798_v42 = vmul.f32 0.0078125, %v773_v39  ;;  %v828_v45 = vmul.f32 %v6945_v36, %v6945_v36 }
  0xcb   : > { %v6951_v43 = vsub.f32 %v746_v6, %v797_v40  ;;  %845 = vadd.xlane.f32.xlu1 %v826_v37  ;;  %847 = vadd.xlane.f32.xlu0 %v827_v41  ;;  %v6953_v44 = vsub.f32 %v747_v7, %v798_v42 }
  0xcc   : > { %v775_v46 = vpop.xlane.xlu0 %774  ;;  %v777_v47 = vpop.xlane.xlu1 %776 }
  0xcd   : > { %v799_v48 = vmul.f32 0.0078125, %v775_v46  ;;  %v829_v49 = vmul.f32 %v6951_v43, %v6951_v43  ;;  %v800_v50 = vmul.f32 0.0078125, %v777_v47  ;;  %v830_v53 = vmul.f32 %v6953_v44, %v6953_v44 }
  0xcf   : > { %v6959_v51 = vsub.f32 %v748_v8, %v799_v48  ;;  %849 = vadd.xlane.f32.xlu1 %v828_v45  ;;  %851 = vadd.xlane.f32.xlu0 %v829_v49  ;;  %v6961_v52 = vsub.f32 %v749_v9, %v800_v50  ;;  %v7001_v50 = vld [vmem:[%s9309_s10] ss:$0 sm:$0xff] }
  0xd0   : > { %v779_v54 = vpop.xlane.xlu0 %778  ;;  %v781_v55 = vpop.xlane.xlu1 %780 }
  0xd1   : > { %v801_v56 = vmul.f32 0.0078125, %v779_v54  ;;  %v831_v57 = vmul.f32 %v6959_v51, %v6959_v51  ;;  %v802_v58 = vmul.f32 0.0078125, %v781_v55  ;;  %v832_v61 = vmul.f32 %v6961_v52, %v6961_v52 }
  0xd3   : > { %v6967_v59 = vsub.f32 %v750_v10, %v801_v56  ;;  %853 = vadd.xlane.f32.xlu1 %v830_v53  ;;  %855 = vadd.xlane.f32.xlu0 %v831_v57  ;;  %v6970_v60 = vsub.f32 %v6910_v11, %v802_v58  ;;  %v7007_v56 = vld [vmem:[%s9310_s23] ss:$0 sm:$0xff] }
  0xd4   : > { %v783_v62 = vpop.xlane.xlu0 %782  ;;  %v785_v63 = vpop.xlane.xlu1 %784 }
  0xd5   : > { %v803_v0 = vmul.f32 0.0078125, %v783_v62  ;;  %v833_v1 = vmul.f32 %v6967_v59, %v6967_v59  ;;  %v804_v2 = vmul.f32 0.0078125, %v785_v63  ;;  %v834_v5 = vmul.f32 %v6970_v60, %v6970_v60 }
  0xd7   : > { %v6977_v3 = vsub.f32 %v6914_v12, %v803_v0  ;;  %857 = vadd.xlane.f32.xlu1 %v832_v61  ;;  %859 = vadd.xlane.f32.xlu0 %v833_v1  ;;  %v6980_v4 = vsub.f32 %v6917_v13, %v804_v2 }
  0xd8   : > { %v787_v6 = vpop.xlane.xlu0 %786  ;;  %v789_v7 = vpop.xlane.xlu1 %788 }
  0xd9   : > { %v805_v8 = vmul.f32 0.0078125, %v787_v6  ;;  %v835_v9 = vmul.f32 %v6977_v3, %v6977_v3  ;;  %v806_v10 = vmul.f32 0.0078125, %v789_v7  ;;  %v836_v13 = vmul.f32 %v6980_v4, %v6980_v4 }
  0xdb   : > { %v6987_v11 = vsub.f32 %v6922_v14, %v805_v8  ;;  %861 = vadd.xlane.f32.xlu1 %v834_v5  ;;  %863 = vadd.xlane.f32.xlu0 %v835_v9  ;;  %v6990_v12 = vsub.f32 %v6925_v15, %v806_v10 }
  0xdd   : > { %v837_v16 = vmul.f32 %v6987_v11, %v6987_v11  ;;  %v838_v17 = vmul.f32 %v6990_v12, %v6990_v12 }
  0xdf   : > { %865 = vadd.xlane.f32.xlu1 %v836_v13  ;;  %867 = vadd.xlane.f32.xlu0 %v837_v16 }
  0xe3   : > { %869 = vadd.xlane.f32.xlu1 %v838_v17 }
 0x14c   : > { %v840_v18 = vpop.xlane.xlu0 %839 }
 0x14d   : > { %v871_v14 = vmul.f32 0.0078125, %v840_v18 }
 0x14f   : > { %v887_v19 = vadd.f32 1e-12, %v871_v14 }
 0x150   : > { %v842_v22 = vpop.xlane.xlu1 %841  ;;  %v844_v23 = vpop.xlane.xlu0 %843 }
 0x151   : > { %6147 = vrsqrt.f32 %v887_v19  ;;  %v872_v15 = vmul.f32 0.0078125, %v842_v22  ;;  %v873_v24 = vmul.f32 0.0078125, %v844_v23 }
 0x153   : > { %v888_v25 = vadd.f32 1e-12, %v872_v15  ;;  %v889_v26 = vadd.f32 1e-12, %v873_v24 }
 0x154   : > { %v846_v29 = vpop.xlane.xlu1 %845  ;;  %v848_v30 = vpop.xlane.xlu0 %847 }
 0x155   : > { %6149 = vrsqrt.f32 %v888_v25  ;;  %v874_v31 = vmul.f32 0.0078125, %v846_v29  ;;  %v875_v32 = vmul.f32 0.0078125, %v848_v30 }
 0x156   : > { %6151 = vrsqrt.f32 %v889_v26 }
 0x157   : > { %v890_v33 = vadd.f32 1e-12, %v874_v31  ;;  %v891_v34 = vadd.f32 1e-12, %v875_v32 }
 0x158   : > { %v850_v37 = vpop.xlane.xlu1 %849  ;;  %v852_v38 = vpop.xlane.xlu0 %851 }
 0x159   : > { %6153 = vrsqrt.f32 %v890_v33  ;;  %v876_v39 = vmul.f32 0.0078125, %v850_v37  ;;  %v877_v40 = vmul.f32 0.0078125, %v852_v38 }
 0x15a   : > { %6155 = vrsqrt.f32 %v891_v34 }
 0x15b   : > { %v892_v41 = vadd.f32 1e-12, %v876_v39  ;;  %v893_v42 = vadd.f32 1e-12, %v877_v40 }
 0x15c   : > { %v854_v45 = vpop.xlane.xlu1 %853  ;;  %v856_v46 = vpop.xlane.xlu0 %855 }
 0x15d   : > { %6157 = vrsqrt.f32 %v892_v41  ;;  %v878_v47 = vmul.f32 0.0078125, %v854_v45  ;;  %v879_v48 = vmul.f32 0.0078125, %v856_v46 }
 0x15e   : > { %v6148_v49 = vpop.eup %6147  ;;  %6159 = vrsqrt.f32 %v893_v42 }
 0x15f   : > { %v919_v53 = vmul.f32 %v6148_v49, %v6929_v20  ;;  %v894_v54 = vadd.f32 1e-12, %v878_v47  ;;  %v895_v55 = vadd.f32 1e-12, %v879_v48 }
 0x160   : > { %v858_v57 = vpop.xlane.xlu1 %857  ;;  %v860_v58 = vpop.xlane.xlu0 %859 }
 0x161   : > { %v941_v61 = vmul.f32 %v7001_v50, %v919_v53  ;;  %6161 = vrsqrt.f32 %v894_v54  ;;  %v880_v62 = vmul.f32 0.0078125, %v858_v57  ;;  %v881_v63 = vmul.f32 0.0078125, %v860_v58 }
 0x162   : > { %v6150_v0 = vpop.eup %6149  ;;  %6163 = vrsqrt.f32 %v895_v55 }
 0x163   : > { %v6152_v1 = vpop.eup %6151  ;;  %v963_v20 = vadd.f32 %v7007_v56, %v941_v61  ;;  %v920_v2 = vmul.f32 %v6150_v0, %v6935_v27  ;;  %v896_v5 = vadd.f32 1e-12, %v880_v62  ;;  %v897_v6 = vadd.f32 1e-12, %v881_v63 }
 0x164   : > { %v921_v7 = vmul.f32 %v6152_v1, %v6931_v21  ;;  %v862_v8 = vpop.xlane.xlu1 %861  ;;  %v864_v9 = vpop.xlane.xlu0 %863 }
 0x165   : > { %979 = vst [vmem:[%s6895_s11] sm:$0xff] %v963_v20  ;;  %v942_v10 = vmul.f32 %v7001_v50, %v920_v2  ;;  %6165 = vrsqrt.f32 %v896_v5  ;;  %v882_v13 = vmul.f32 0.0078125, %v862_v8  ;;  %v883_v16 = vmul.f32 0.0078125, %v864_v9 }
 0x166   : > { %v6154_v17 = vpop.eup %6153  ;;  %v943_v18 = vmul.f32 %v7001_v50, %v921_v7  ;;  %6167 = vrsqrt.f32 %v897_v6 }
 0x167   : > { %v6156_v14 = vpop.eup %6155  ;;  %v964_v27 = vadd.f32 %v7007_v56, %v942_v10  ;;  %v922_v19 = vmul.f32 %v6154_v17, %v6937_v28  ;;  %v898_v21 = vadd.f32 1e-12, %v882_v13  ;;  %v899_v22 = vadd.f32 1e-12, %v883_v16 }
 0x168   : > { %v965_v23 = vadd.f32 %v7007_v56, %v943_v18  ;;  %v923_v15 = vmul.f32 %v6156_v14, %v6943_v35  ;;  %v866_v24 = vpop.xlane.xlu1 %865  ;;  %v868_v25 = vpop.xlane.xlu0 %867 }
 0x169   : > { %980 = vst [vmem:[%s6895_s11 + $0x8] sm:$0xff] %v964_v27  ;;  %v944_v26 = vmul.f32 %v7001_v50, %v922_v19  ;;  %6169 = vrsqrt.f32 %v898_v21  ;;  %v884_v29 = vmul.f32 0.0078125, %v866_v24  ;;  %v885_v30 = vmul.f32 0.0078125, %v868_v25 }
 0x16a   : > { %v6158_v31 = vpop.eup %6157  ;;  %981 = vst [vmem:[%s6895_s11 + $0x10] sm:$0xff] %v965_v23  ;;  %v945_v28 = vmul.f32 %v7001_v50, %v923_v15  ;;  %6171 = vrsqrt.f32 %v899_v22 }
 0x16b   : > { %v6160_v32 = vpop.eup %6159  ;;  %v966_v33 = vadd.f32 %v7007_v56, %v944_v26  ;;  %v924_v35 = vmul.f32 %v6158_v31, %v6945_v36  ;;  %v900_v34 = vadd.f32 1e-12, %v884_v29  ;;  %v901_v37 = vadd.f32 1e-12, %v885_v30 }
 0x16c   : > { %v967_v38 = vadd.f32 %v7007_v56, %v945_v28  ;;  %v925_v39 = vmul.f32 %v6160_v32, %v6951_v43  ;;  %v870_v40 = vpop.xlane.xlu1 %869 }
 0x16d   : > { %982 = vst [vmem:[%s6895_s11 + $0x18] sm:$0xff] %v966_v33  ;;  %v946_v41 = vmul.f32 %v7001_v50, %v924_v35  ;;  %6173 = vrsqrt.f32 %v900_v34  ;;  %v886_v42 = vmul.f32 0.0078125, %v870_v40 }
 0x16e   : > { %v6162_v45 = vpop.eup %6161  ;;  %983 = vst [vmem:[%s6895_s11 + $0x20] sm:$0xff] %v967_v38  ;;  %v947_v46 = vmul.f32 %v7001_v50, %v925_v39  ;;  %6175 = vrsqrt.f32 %v901_v37 }
 0x16f   : > { %v6164_v36 = vpop.eup %6163  ;;  %v968_v47 = vadd.f32 %v7007_v56, %v946_v41  ;;  %v926_v48 = vmul.f32 %v6162_v45, %v6953_v44  ;;  %v902_v43 = vadd.f32 1e-12, %v886_v42 }
 0x170   : > { %v969_v49 = vadd.f32 %v7007_v56, %v947_v46  ;;  %v927_v53 = vmul.f32 %v6164_v36, %v6959_v51 }
 0x171   : > { %984 = vst [vmem:[%s6895_s11 + $0x28] sm:$0xff] %v968_v47  ;;  %v948_v54 = vmul.f32 %v7001_v50, %v926_v48  ;;  %6177 = vrsqrt.f32 %v902_v43 }
 0x172   : > { %v6166_v55 = vpop.eup %6165  ;;  %985 = vst [vmem:[%s6895_s11 + $0x30] sm:$0xff] %v969_v49  ;;  %v949_v57 = vmul.f32 %v7001_v50, %v927_v53 }
 0x173   : > { %v6168_v58 = vpop.eup %6167  ;;  %v970_v61 = vadd.f32 %v7007_v56, %v948_v54  ;;  %v928_v44 = vmul.f32 %v6166_v55, %v6961_v52 }
 0x174   : > { %v971_v62 = vadd.f32 %v7007_v56, %v949_v57  ;;  %v929_v63 = vmul.f32 %v6168_v58, %v6967_v59 }
 0x175   : > { %986 = vst [vmem:[%s6895_s11 + $0x38] sm:$0xff] %v970_v61  ;;  %v950_v51 = vmul.f32 %v7001_v50, %v928_v44 }
 0x176   : > { %v6170_v0 = vpop.eup %6169  ;;  %987 = vst [vmem:[%s6895_s11 + $0x40] sm:$0xff] %v971_v62  ;;  %v951_v1 = vmul.f32 %v7001_v50, %v929_v63 }
 0x177   : > { %v6172_v20 = vpop.eup %6171  ;;  %v972_v2 = vadd.f32 %v7007_v56, %v950_v51  ;;  %v930_v5 = vmul.f32 %v6170_v0, %v6970_v60 }
 0x178   : > { %v973_v52 = vadd.f32 %v7007_v56, %v951_v1  ;;  %v931_v6 = vmul.f32 %v6172_v20, %v6977_v3 }
 0x179   : > { %988 = vst [vmem:[%s6895_s11 + $0x48] sm:$0xff] %v972_v2  ;;  %v952_v59 = vmul.f32 %v7001_v50, %v930_v5 }
 0x17a   : > { %v6174_v7 = vpop.eup %6173  ;;  %989 = vst [vmem:[%s6895_s11 + $0x50] sm:$0xff] %v973_v52  ;;  %v953_v8 = vmul.f32 %v7001_v50, %v931_v6 }
 0x17b   : > { %v6176_v9 = vpop.eup %6175  ;;  %v974_v10 = vadd.f32 %v7007_v56, %v952_v59  ;;  %v932_v60 = vmul.f32 %v6174_v7, %v6980_v4 }
 0x17c   : > { %v975_v13 = vadd.f32 %v7007_v56, %v953_v8  ;;  %v933_v16 = vmul.f32 %v6176_v9, %v6987_v11 }
 0x17d   : > { %990 = vst [vmem:[%s6895_s11 + $0x58] sm:$0xff] %v974_v10  ;;  %v954_v3 = vmul.f32 %v7001_v50, %v932_v60 }
 0x17e   : > { %v6178_v17 = vpop.eup %6177  ;;  %991 = vst [vmem:[%s6895_s11 + $0x60] sm:$0xff] %v975_v13  ;;  %v955_v18 = vmul.f32 %v7001_v50, %v933_v16 }
 0x17f   : > { %v976_v14 = vadd.f32 %v7007_v56, %v954_v3  ;;  %v934_v27 = vmul.f32 %v6178_v17, %v6990_v12 }
 0x180   : > { %v977_v19 = vadd.f32 %v7007_v56, %v955_v18 }
 0x181   : > { %992 = vst [vmem:[%s6895_s11 + $0x68] sm:$0xff] %v976_v14  ;;  %v956_v4 = vmul.f32 %v7001_v50, %v934_v27 }
 0x182   : > { %993 = vst [vmem:[%s6895_s11 + $0x70] sm:$0xff] %v977_v19 }
 0x183   : > { %v978_v21 = vadd.f32 %v7007_v56, %v956_v4 }
 0x185   : > { %994 = vst [vmem:[%s6895_s11 + $0x78] sm:$0xff] %v978_v21 }
 0x186 PF: > { %v6179_v11 = vld [vmem:[%s6839_s25 + $0xac] ss:$12 sps:$4 sm:$0xff]   ;;  %v6181_v12 = vld [vmem:[%s6839_s25 + $0xa8] ss:$12 sps:$4 sm:$0xff]   ;;  %v9276_v22 = vmov 0   ;;  %v995_v25 = vld [vmem:[%s6895_s11] sm:$0xff]  ;;  %v1053_v7 = vlaneseq  ;;  %s9324_s0 = scalar_lea.vmem %s9259_s7, %s6826_s29  ;;  %s9325_s4 = scalar_lea.vmem %s9260_s8, %s6826_s29 }
 0x187   : > { %1228 = vmatprep.mubr.bf16.mxu0 %v9276_v22  ;;  %1196 = vmatprep.subr.bf16.mxu0 %v6179_v11  ;;  %v6182_v50 = vld [vmem:[%s6839_s25 + $0x94] ss:$12 sps:$4 sm:$0xff]   ;;  %v6184_v56 = vld [vmem:[%s6839_s25 + $0x90] ss:$12 sps:$4 sm:$0xff]   ;;  %v6187_v15 = vld [vmem:[%s6839_s25 + $0x78] ss:$12 sps:$4 sm:$0xff]  }
 0x188   : > { %1197 = vmatpush1.bf16.msra.mxu0 %v6181_v12  ;;  %v6185_v23 = vld [vmem:[%s6839_s25 + $0x7c] ss:$12 sps:$4 sm:$0xff]   ;;  %v6188_v24 = vld [vmem:[%s6839_s25 + $0x64] ss:$12 sps:$4 sm:$0xff]   ;;  %v6190_v26 = vld [vmem:[%s6839_s25 + $0x60] ss:$12 sps:$4 sm:$0xff]  }
 0x189   : > { %1198 = vmatprep.subr.bf16.mxu0 %v6182_v50  ;;  %v996_v29 = vld [vmem:[%s6895_s11 + $0x8] sm:$0xff]  ;;  %v6194_v32 = vld [vmem:[%s6839_s25 + $0x34] ss:$12 sps:$4 sm:$0xff]   ;;  %v6203_v33 = vld [vmem:[%s6839_s25 + $0xb0] ss:$12 sps:$4 sm:$0xff]   ;;  %v7120_v8 = vshrl.u32 %v1053_v7, 7 }
 0x18a   : > { %v6191_v30 = vld [vmem:[%s6839_s25 + $0x4c] ss:$12 sps:$4 sm:$0xff]   ;;  %v1011_v31 = vpack.c.bf16 %v996_v29, %v995_v25  ;;  %v6193_v28 = vld [vmem:[%s6839_s25 + $0x48] ss:$12 sps:$4 sm:$0xff]   ;;  %v6196_v34 = vld [vmem:[%s6839_s25 + $0x30] ss:$12 sps:$4 sm:$0xff]   ;;  %5701 = vmatprep.subr.bf16.mxu1 %v6203_v33 }
 0x18b   : > { %v6204_v35 = vld [vmem:[%s6839_s25 + $0x98] ss:$12 sps:$4 sm:$0xff]   ;;  %v6197_v37 = vld [vmem:[%s6839_s25 + $0x1c] ss:$12 sps:$4 sm:$0xff]   ;;  %5702 = vmatpush3.bf16.msra.mxu1 %v6203_v33  ;;  %v6205_v38 = vld [vmem:[%s6839_s25 + $0x80] ss:$12 sps:$4 sm:$0xff]  }
 0x18c   : > { %1199 = vmatpush1.bf16.msra.mxu0 %v6184_v56  ;;  %5717 = vmatprep.mubr.bf16.mxu1 %v1011_v31  ;;  %v6199_v39 = vld [vmem:[%s6839_s25 + $0x18] ss:$12 sps:$4 sm:$0xff]   ;;  %v6206_v41 = vld [vmem:[%s6839_s25 + $0x68] ss:$12 sps:$4 sm:$0xff]   ;;  %v6202_v42 = vld [vmem:[%s6839_s25] ss:$12 sps:$4 sm:$0xff]  }
 0x18d   : > { %1200 = vmatprep.subr.bf16.mxu0 %v6185_v23  ;;  %5703 = vmatprep.subr.bf16.mxu1 %v6204_v35  ;;  %v6200_v40 = vld [vmem:[%s6839_s25 + $0x4] ss:$12 sps:$4 sm:$0xff]   ;;  %v998_v47 = vld [vmem:[%s6895_s11 + $0x18] sm:$0xff]  ;;  %v6209_v48 = vld [vmem:[%s6839_s25 + $0x20] ss:$12 sps:$4 sm:$0xff]   ;;  %9311 = vst [vmem:[#allocation9_spill] sm:$0xff] %v7120_v8 }
 0x18e   : > { %v6207_v45 = vld [vmem:[%s6839_s25 + $0x50] ss:$12 sps:$4 sm:$0xff]   ;;  %v6208_v46 = vld [vmem:[%s6839_s25 + $0x38] ss:$12 sps:$4 sm:$0xff]   ;;  %v6210_v49 = vld [vmem:[%s6839_s25 + $0x8] ss:$12 sps:$4 sm:$0xff]  }
 0x18f   : > { %5704 = vmatpush3.bf16.msra.mxu1 %v6204_v35  ;;  %v997_v36 = vld [vmem:[%s6895_s11 + $0x10] sm:$0xff]  ;;  %v999_v53 = vld [vmem:[%s6895_s11 + $0x20] sm:$0xff]  ;;  %v1000_v54 = vld [vmem:[%s6895_s11 + $0x28] sm:$0xff]  ;;  %v9275_v9 = vsub.s32 0, %v7120_v8  ;;  %vm1436_vm0 = vcmask 261120   ;;  %s9312_s25 = sld [smem:[#allocation3_spill]] }
 0x190   : > { %1201 = vmatpush1.bf16.msra.mxu0 %v6187_v15  ;;  %5705 = vmatprep.subr.bf16.mxu1 %v6205_v38  ;;  %v1012_v43 = vpack.c.bf16 %v998_v47, %v997_v36  ;;  %v1013_v55 = vpack.c.bf16 %v1000_v54, %v999_v53  ;;  %v1001_v57 = vld [vmem:[%s6895_s11 + $0x30] sm:$0xff]  ;;  %v1002_v58 = vld [vmem:[%s6895_s11 + $0x38] sm:$0xff]  ;;  %v1003_v44 = vld [vmem:[%s6895_s11 + $0x40] sm:$0xff]  ;;  %v1063_v54 = vsub.s32 2, %v7120_v8  ;;  %s9313_s20 = sld [smem:[#allocation16_spill]]  ;;  %s6702_s18 = smov 64  }
 0x191   : > { %1202 = vmatprep.subr.bf16.mxu0 %v6188_v24  ;;  %v1014_v61 = vpack.c.bf16 %v1002_v58, %v1001_v57  ;;  %v1004_v62 = vld [vmem:[%s6895_s11 + $0x48] sm:$0xff]  ;;  %v1005_v51 = vld [vmem:[%s6895_s11 + $0x50] sm:$0xff]  ;;  %v1006_v0 = vld [vmem:[%s6895_s11 + $0x58] sm:$0xff]  ;;  %s6703_s21 = smov 32   ;;  %s9326_s26 = sld [smem:[#allocation22_spill]] }
 0x192   : > { %v1015_v63 = vpack.c.bf16 %v1004_v62, %v1003_v44  ;;  %v1007_v1 = vld [vmem:[%s6895_s11 + $0x60] sm:$0xff]  ;;  %v1008_v20 = vld [vmem:[%s6895_s11 + $0x68] sm:$0xff]  ;;  %v1016_v2 = vpack.c.bf16 %v1006_v0, %v1005_v51  ;;  %v1009_v52 = vld [vmem:[%s6895_s11 + $0x70] sm:$0xff] }
 0x193   : > { %5706 = vmatpush3.bf16.msra.mxu1 %v6205_v38  ;;  %v1017_v5 = vpack.c.bf16 %v1008_v20, %v1007_v1  ;;  %v1010_v6 = vld [vmem:[%s6895_s11 + $0x78] sm:$0xff]  ;;  %v7124_v10 = vld [vmem:[%s6844_s3] sm:$0x7]  ;;  %s6701_s3 = smov 96  }
 0x194   : > { %1203 = vmatpush1.bf16.msra.mxu0 %v6190_v26  ;;  %5707 = vmatprep.subr.bf16.mxu1 %v6206_v41  ;;  %v1018_v59 = vpack.c.bf16 %v1010_v6, %v1009_v52  ;;  %v7129_v13 = vrot.slane %v7124_v10, %v9275_v9 }
 0x195   : > { %1204 = vmatprep.subr.bf16.mxu0 %v6191_v30 }
 0x196   : > { %s7367_s24 = scalar_lea.vmem %s9313_s20, %s9312_s25 }
 0x197   : > { %5708 = vmatpush3.bf16.msra.mxu1 %v6206_v41  ;;  %s9327_s17 = scalar_lea.vmem %s9326_s26, %s6826_s29 }
 0x198   : > { %1205 = vmatpush1.bf16.msra.mxu0 %v6193_v28  ;;  %5709 = vmatprep.subr.bf16.mxu1 %v6207_v45 }
 0x199   : > { %1206 = vmatprep.subr.bf16.mxu0 %v6194_v32 }
 0x19b   : > { %5710 = vmatpush3.bf16.msra.mxu1 %v6207_v45 }
 0x19c   : > { %1207 = vmatpush1.bf16.msra.mxu0 %v6196_v34  ;;  %5711 = vmatprep.subr.bf16.mxu1 %v6208_v46 }
 0x19d   : > { %1208 = vmatprep.subr.bf16.mxu0 %v6197_v37 }
 0x19f   : > { %5712 = vmatpush3.bf16.msra.mxu1 %v6208_v46 }
 0x1a0   : > { %1209 = vmatpush1.bf16.msra.mxu0 %v6199_v39  ;;  %5713 = vmatprep.subr.bf16.mxu1 %v6209_v48 }
 0x1a1   : > { %1210 = vmatprep.subr.bf16.mxu0 %v6200_v40 }
 0x1a3   : > { %5714 = vmatpush3.bf16.msra.mxu1 %v6209_v48 }
 0x1a4   : > { %1211 = vmatpush1.bf16.msra.mxu0 %v6202_v42  ;;  %5715 = vmatprep.subr.bf16.mxu1 %v6210_v49 }
 0x1a7   : > { %1229 = vmatmul.mubr.bf16.vlgmr.msra.gmra.mxu0 %v1011_v31  ;;  %5716 = vmatpush3.bf16.msra.mxu1 %v6210_v49 }
 0x1a8   : > { %1238 = vmatprep.mubr.bf16.mxu0 %v9276_v22 }
 0x1aa   : > { %5718 = vmatmul.mubr.bf16.vlgmr.msra.gmra.mxu1 %v1012_v43 }
 0x1ab   : > { %5721 = vmatprep.mubr.bf16.mxu1 %v1013_v55 }
 0x1af   : > { %1239 = vmatmul.mubr.bf16.gmra.mxu0 %v1012_v43 }
 0x1b0   : > { %1248 = vmatprep.mubr.bf16.mxu0 %v9276_v22 }
 0x1b2   : > { %5722 = vmatmul.mubr.bf16.gmra.mxu1 %v1014_v61 }
 0x1b3   : > { %5725 = vmatprep.mubr.bf16.mxu1 %v1015_v63 }
 0x1b7   : > { %1249 = vmatmul.mubr.bf16.gmra.mxu0 %v1013_v55 }
 0x1b8   : > { %1258 = vmatprep.mubr.bf16.mxu0 %v9276_v22 }
 0x1ba   : > { %5726 = vmatmul.mubr.bf16.gmra.mxu1 %v1016_v2 }
 0x1bb   : > { %5729 = vmatprep.mubr.bf16.mxu1 %v1017_v5 }
 0x1bf   : > { %1259 = vmatmul.mubr.bf16.gmra.mxu0 %v1014_v61 }
 0x1c0   : > { %1268 = vmatprep.mubr.bf16.mxu0 %v9276_v22 }
 0x1c2   : > { %5730 = vmatmul.mubr.bf16.gmra.mxu1 %v1018_v59 }
 0x1c7   : > { %1269 = vmatmul.mubr.bf16.gmra.mxu0 %v1015_v63  ;;  %v7187_v63 = vrot.slane %v7124_v10, %v1063_v54 }
 0x1c8   : > { %1278 = vmatprep.mubr.bf16.mxu0 %v9276_v22 }
 0x1cf   : > { %1279 = vmatmul.mubr.bf16.gmra.mxu0 %v1016_v2 }
 0x1d0   : > { %1288 = vmatprep.mubr.bf16.mxu0 %v9276_v22 }
 0x1d7   : > { %1289 = vmatmul.mubr.bf16.gmra.mxu0 %v1017_v5 }
 0x1d8   : > { %1298 = vmatprep.mubr.bf16.mxu0 %v9276_v22 }
 0x1df   : > { %1299 = vmatmul.mubr.bf16.gmra.mxu0 %v1018_v59 }
 0x267   : > { %v1230_v60 = vpop.f32.mrf.mxu0 }
 0x268   : > { %v1231_v17 = vadd.f32 %v1230_v60, %v7129_v13 }
 0x269   : > { %v7131_v16 = vpop.f32.mrf.mxu0 }
 0x26a   : > { %v7149_v15 = vpop.f32.mrf.mxu1 }
 0x26b   : > { %v1234_v3 = vpop.f32.mrf.mxu0 }
 0x26c   : > { %v1235_v18 = vadd.f32 %v1234_v3, %v7129_v13  ;;  %v7154_v26 = vpop.f32.mrf.mxu1 }
 0x26d   : > { %v7135_v14 = vpop.f32.mrf.mxu0 }
 0x26e   : > { %v7137_v27 = vpack.c.bf16 %v1235_v18, %v1231_v17  ;;  %v7156_v30 = vpop.f32.mrf.mxu1 }
 0x26f   : > { %v1240_v19 = vpop.f32.mrf.mxu0 }
 0x270   : > { %v1241_v4 = vadd.f32 %v1240_v19, %v7129_v13  ;;  %5749 = vmatprep.mubr.msk.bf16.mxu0 %vm1436_vm0, %v7137_v27  ;;  %v7161_v32 = vpop.f32.mrf.mxu1 }
 0x271   : > { %v7142_v21 = vpop.f32.mrf.mxu0 }
 0x272   : > { %v5723_v34 = vpop.f32.mrf.mxu1 }
 0x273   : > { %v1244_v11 = vpop.f32.mrf.mxu0 }
 0x274   : > { %v1245_v12 = vadd.f32 %v1244_v11, %v7129_v13  ;;  %v7168_v39 = vpop.f32.mrf.mxu1 }
 0x275   : > { %v7145_v50 = vpop.f32.mrf.mxu0 }
 0x276   : > { %v7147_v56 = vpack.c.bf16 %v1245_v12, %v1241_v4  ;;  %v5724_v41 = vpop.f32.mrf.mxu1 }
 0x277   : > { %v1250_v23 = vpop.f32.mrf.mxu0 }
 0x278   : > { %v1251_v24 = vadd.f32 %v1250_v23, %v7129_v13  ;;  %v7173_v46 = vpop.f32.mrf.mxu1 }
 0x279   : > { %v7152_v25 = vpop.f32.mrf.mxu0 }
 0x27a   : > { %v5727_v48 = vpop.f32.mrf.mxu1 }
 0x27b   : > { %v1254_v29 = vpop.f32.mrf.mxu0  ;;  %v1384_v17 = vadd.f32 %v5727_v48, %v7187_v63 }
 0x27c   : > { %v1255_v31 = vadd.f32 %v1254_v29, %v7129_v13  ;;  %v1375_v53 = vpop.f32.mrf.mxu1 }
 0x27d   : > { %v7159_v28 = vpop.f32.mrf.mxu0 }
 0x27e   : > { %v7163_v33 = vpack.c.bf16 %v1255_v31, %v1251_v24  ;;  %v5728_v57 = vpop.f32.mrf.mxu1  ;;  %v9274_v24 = vsub.s32 1, %v7120_v8 }
 0x27f   : > { %v1260_v35 = vpop.f32.mrf.mxu0  ;;  %v1387_v4 = vadd.f32 %v5728_v57, %v7187_v63  ;;  %v1371_v57 = vadd.f32 %v5724_v41, %v7187_v63 }
 0x280   : > { %v1261_v37 = vadd.f32 %v1260_v35, %v7129_v13  ;;  %v1378_v44 = vpop.f32.mrf.mxu1  ;;  %v7219_v48 = vrot.slane %v7124_v10, %v9274_v24 }
 0x281   : > { %v7166_v38 = vpop.f32.mrf.mxu0 }
 0x282   : > { %v5731_v0 = vpop.f32.mrf.mxu1 }
 0x283   : > { %v1264_v40 = vpop.f32.mrf.mxu0  ;;  %v1400_v5 = vadd.f32 %v5731_v0, %v7187_v63 }
 0x284   : > { %v1265_v42 = vadd.f32 %v1264_v40, %v7129_v13  ;;  %v1391_v2 = vpop.f32.mrf.mxu1  ;;  %v7212_v40 = vpack.c.bf16 %v1387_v4, %v1384_v17 }
 0x285   : > { %v7171_v45 = vpop.f32.mrf.mxu0  ;;  %v1392_v7 = vadd.f32 %v1391_v2, %v7187_v63 }
 0x286   : > { %v7175_v36 = vpack.c.bf16 %v1265_v42, %v1261_v37  ;;  %v5732_v6 = vpop.f32.mrf.mxu1  ;;  %v1376_v37 = vadd.f32 %v1375_v53, %v7187_v63  ;;  %v1379_v42 = vadd.f32 %v1378_v44, %v7187_v63 }
 0x287   : > { %v1270_v47 = vpop.f32.mrf.mxu0  ;;  %v1403_v60 = vadd.f32 %v5732_v6, %v7187_v63 }
 0x288   : > { %v1271_v43 = vadd.f32 %v1270_v47, %v7129_v13  ;;  %v1394_v18 = vpop.f32.mrf.mxu1 }
 0x289   : > { %v7178_v49 = vpop.f32.mrf.mxu0  ;;  %v7202_v11 = vpack.c.bf16 %v1403_v60, %v1400_v5  ;;  %v1395_v12 = vadd.f32 %v1394_v18, %v7187_v63  ;;  %v1360_v5 = vadd.f32 %v7168_v39, %v7187_v63  ;;  %v1355_v39 = vadd.f32 %v7156_v30, %v7187_v63 }
 0x28a   : > { %v1344_v30 = vadd.f32 %v7154_v26, %v7187_v63 }
 0x28b   : > { %v1274_v55 = vpop.f32.mrf.mxu0  ;;  %v7207_v31 = vpack.c.bf16 %v1395_v12, %v1392_v7  ;;  %5765 = vmatprep.subr.bf16.mxu1 %v7202_v11  ;;  %v1352_v7 = vadd.f32 %v7149_v15, %v7187_v63  ;;  %v1347_v12 = vadd.f32 %v7161_v32, %v7187_v63 }
 0x28c   : > { %v1275_v58 = vadd.f32 %v1274_v55, %v7129_v13  ;;  %5766 = vmatpush3.bf16.msra.mxu1 %v7202_v11  ;;  %v1368_v55 = vadd.f32 %v5723_v34, %v7187_v63 }
 0x28d   : > { %v7182_v61 = vpop.f32.mrf.mxu0  ;;  %5767 = vmatprep.subr.bf16.mxu1 %v7207_v31  ;;  %v7269_v4 = vpack.c.bf16 %v1355_v39, %v1352_v7 }
 0x28e   : > { %v7184_v62 = vpack.c.bf16 %v1275_v58, %v1271_v43  ;;  %v7238_v41 = vpack.c.bf16 %v1371_v57, %v1368_v55  ;;  %v1243_v57 = vadd.f32 %v7142_v21, %v7219_v48 }
 0x28f   : > { %v1280_v51 = vpop.f32.mrf.mxu0 }
 0x290   : > { %v1281_v1 = vadd.f32 %v1280_v51, %v7129_v13  ;;  %5768 = vmatpush3.bf16.msra.mxu1 %v7207_v31  ;;  %v7229_v51 = vpack.c.bf16 %v1379_v42, %v1376_v37  ;;  %v1267_v42 = vadd.f32 %v7171_v45, %v7219_v48  ;;  %v1247_v45 = vadd.f32 %v7145_v50, %v7219_v48 }
 0x291   : > { %v7190_v20 = vpop.f32.mrf.mxu0  ;;  %5769 = vmatprep.subr.bf16.mxu1 %v7212_v40 }
 0x292   : > { %v1283_v26 = vadd.f32 %v7190_v20, %v7219_v48  ;;  %v1273_v20 = vadd.f32 %v7178_v49, %v7219_v48 }
 0x293   : > { %v1284_v52 = vpop.f32.mrf.mxu0 }
 0x294   : > { %v1285_v59 = vadd.f32 %v1284_v52, %v7129_v13  ;;  %5770 = vmatpush3.bf16.msra.mxu1 %v7212_v40  ;;  %v1363_v52 = vadd.f32 %v7173_v46, %v7187_v63 }
 0x295   : > { %v7196_v3 = vpop.f32.mrf.mxu0  ;;  %5771 = vmatprep.subr.bf16.mxu1 %v7229_v51 }
 0x296   : > { %v7199_v19 = vpack.c.bf16 %v1285_v59, %v1281_v1  ;;  %v7256_v46 = vpack.c.bf16 %v1363_v52, %v1360_v5 }
 0x297   : > { %v1290_v23 = vpop.f32.mrf.mxu0 }
 0x298   : > { %v1291_v29 = vadd.f32 %v1290_v23, %v7129_v13  ;;  %5772 = vmatpush3.bf16.msra.mxu1 %v7229_v51  ;;  %v1287_v23 = vadd.f32 %v7196_v3, %v7219_v48  ;;  %v1277_v3 = vadd.f32 %v7182_v61, %v7219_v48  ;;  %v1257_v61 = vadd.f32 %v7159_v28, %v7219_v48 }
 0x299   : > { %v1292_v35 = vpop.f32.mrf.mxu0  ;;  %5773 = vmatprep.subr.bf16.mxu1 %v7238_v41  ;;  %v1237_v28 = vadd.f32 %v7135_v14, %v7219_v48  ;;  %v7370_v14 = vld [vmem:[%s7367_s24] ss:$0 sm:$0xff] }
 0x29a   : > { %v1293_v53 = vadd.f32 %v1292_v35, %v7219_v48  ;;  %v7285_v32 = vpack.c.bf16 %v1287_v23, %v1283_v26  ;;  %v7297_v35 = vpack.c.bf16 %v1277_v3, %v1273_v20 }
 0x29b   : > { %v1294_v47 = vpop.f32.mrf.mxu0 }
 0x29c   : > { %v1295_v43 = vadd.f32 %v1294_v47, %v7129_v13  ;;  %5774 = vmatpush3.bf16.msra.mxu1 %v7238_v41  ;;  %v1477_v37 = vsel %vm1436_vm0, %v7285_v32, 0  ;;  %v1263_v47 = vadd.f32 %v7166_v38, %v7219_v48  ;;  %v1474_v49 = vsel %vm1436_vm0, %v7297_v35, 0 }
 0x29d   : > { %v1296_v54 = vpop.f32.mrf.mxu0  ;;  %5775 = vmatprep.subr.bf16.mxu1 %v7256_v46 }
 0x29e   : > { %v7226_v58 = vpack.c.bf16 %v1295_v43, %v1291_v29  ;;  %v1297_v44 = vadd.f32 %v1296_v54, %v7219_v48  ;;  %v7279_v29 = vpack.c.bf16 %v1347_v12, %v1344_v30  ;;  %v7307_v43 = vpack.c.bf16 %v1267_v42, %v1263_v47 }
 0x29f   : > { %v1300_v10 = vpop.f32.mrf.mxu0  ;;  %v1253_v54 = vadd.f32 %v7152_v25, %v7219_v48 }
 0x2a0   : > { %v7232_v0 = vpack.c.bf16 %v1297_v44, %v1293_v53  ;;  %v1301_v1 = vadd.f32 %v1300_v10, %v7129_v13  ;;  %5776 = vmatpush3.bf16.msra.mxu1 %v7256_v46  ;;  %v1471_v38 = vsel %vm1436_vm0, %v7307_v43, 0  ;;  %v7327_v53 = vpack.c.bf16 %v1247_v45, %v1243_v57 }
 0x2a1   : > { %v1302_v34 = vpop.f32.mrf.mxu0  ;;  %5777 = vmatprep.subr.bf16.mxu1 %v7269_v4  ;;  %v7317_v55 = vpack.c.bf16 %v1257_v61, %v1253_v54  ;;  %v1233_v44 = vadd.f32 %v7131_v16, %v7219_v48 }
 0x2a2   : > { %1887 = vrot.lane.b32.xlu1 %v7232_v0, %s6701_s3  ;;  %v1303_v60 = vadd.f32 %v1302_v34, %v7219_v48  ;;  %v1480_v63 = vsel %vm1436_vm0, %v7232_v0, 0  ;;  %v1465_v21 = vsel %vm1436_vm0, %v7327_v53, 0 }
 0x2a3   : > { %v1304_v2 = vpop.f32.mrf.mxu0  ;;  %v1468_v25 = vsel %vm1436_vm0, %v7317_v55, 0  ;;  %v7337_v50 = vpack.c.bf16 %v1237_v28, %v1233_v44 }
 0x2a4   : > { %v1305_v6 = vadd.f32 %v1304_v2, %v7129_v13  ;;  %5778 = vmatpush3.bf16.msra.mxu1 %v7269_v4 }
 0x2a5   : > { %v1306_v59 = vpop.f32.mrf.mxu0  ;;  %5779 = vmatprep.subr.bf16.mxu1 %v7279_v29  ;;  %v1462_v10 = vsel %vm1436_vm0, %v7337_v50, 0 }
 0x2a6   : > { %v7250_v17 = vpack.c.bf16 %v1305_v6, %v1301_v1  ;;  %v1307_v18 = vadd.f32 %v1306_v59, %v7219_v48 }
 0x2a8   : > { %v7258_v13 = vpack.c.bf16 %v1307_v18, %v1303_v60  ;;  %5780 = vmatpush3.bf16.msra.mxu1 %v7279_v29 }
 0x2aa   : > { %1889 = vrot.lane.b32.xlu0 %v7258_v13, %s6701_s3  ;;  %6069 = vmatprep.subr.msk.bf16.mxu0 %vm1436_vm0, %v7258_v13  ;;  %v1483_v15 = vsel %vm1436_vm0, %v7258_v13, 0 }
 0x2ab   : > { %5734 = vmatpush3.bf16.xpose.msra.mxu0 %v1483_v15 }
 0x2ac   : > { %6070 = vmatprep.subr.msk.bf16.mxu0 %vm1436_vm0, %v7232_v0 }
 0x2b3   : > { %5736 = vmatpush3.bf16.xpose.msra.mxu0 %v1480_v63 }
 0x2b4   : > { %6071 = vmatprep.subr.msk.bf16.mxu0 %vm1436_vm0, %v7285_v32 }
 0x2bb   : > { %5738 = vmatpush3.bf16.xpose.msra.mxu0 %v1477_v37 }
 0x2bc   : > { %6072 = vmatprep.subr.msk.bf16.mxu0 %vm1436_vm0, %v7297_v35 }
 0x2c3   : > { %5740 = vmatpush3.bf16.xpose.msra.mxu0 %v1474_v49 }
 0x2c4   : > { %6073 = vmatprep.subr.msk.bf16.mxu0 %vm1436_vm0, %v7307_v43 }
 0x2cb   : > { %5742 = vmatpush3.bf16.xpose.msra.mxu0 %v1471_v38 }
 0x2cc   : > { %6074 = vmatprep.subr.msk.bf16.mxu0 %vm1436_vm0, %v7317_v55 }
 0x2d3   : > { %5744 = vmatpush3.bf16.xpose.msra.mxu0 %v1468_v25 }
 0x2d4   : > { %6075 = vmatprep.subr.msk.bf16.mxu0 %vm1436_vm0, %v7327_v53 }
 0x2db   : > { %5746 = vmatpush3.bf16.xpose.msra.mxu0 %v1465_v21 }
 0x2dc   : > { %6076 = vmatprep.subr.msk.bf16.mxu0 %vm1436_vm0, %v7337_v50 }
 0x2e3   : > { %5748 = vmatpush3.bf16.xpose.msra.mxu0 %v1462_v10 }
 0x2ea   : > { %5750 = vmatmul.mubr.msk.bf16.vlgmr.msra.gmra.mxu0 %vm1436_vm0, %v7147_v56 }
 0x2eb   : > { %5753 = vmatprep.mubr.msk.bf16.mxu0 %vm1436_vm0, %v7163_v33 }
 0x2f2   : > { %5754 = vmatmul.mubr.msk.bf16.gmra.mxu0 %vm1436_vm0, %v7175_v36 }
 0x2f3   : > { %5757 = vmatprep.mubr.msk.bf16.mxu0 %vm1436_vm0, %v7184_v62 }
 0x2fa   : > { %5758 = vmatmul.mubr.msk.bf16.gmra.mxu0 %vm1436_vm0, %v7199_v19 }
 0x2fb   : > { %5761 = vmatprep.mubr.msk.bf16.mxu0 %vm1436_vm0, %v7226_v58 }
 0x302   : > { %5762 = vmatmul.mubr.msk.bf16.gmra.mxu0 %vm1436_vm0, %v7250_v17 }
 0x314   : > { %v7428_v21 = vpop.permute.xlu1 %1887 }
 0x31c   : > { %v7359_v16 = vpop.permute.xlu0 %1889 }
 0x31d   : > { %6077 = vmatprep.subr.msk.bf16.mxu1 %vm1436_vm0, %v7359_v16 }
 0x3aa   : > { %v5751_v48 = vpop.f32.mrf.mxu0 }
 0x3ab   : > { %v1528_v1 = vadd.f32 %v5751_v48, %v7370_v14 }
 0x3ac   : > { %v1519_v34 = vpop.f32.mrf.mxu0 }
 0x3ad   : > { %v1520_v2 = vadd.f32 %v7370_v14, %v1519_v34  ;;  %1586 = vmax.xlane.f32.xlu1 %v1528_v1 }
 0x3ae   : > { %v5752_v5 = vpop.f32.mrf.mxu0 }
 0x3af   : > { %v1531_v52 = vadd.f32 %v5752_v5, %v7370_v14  ;;  %1582 = vmax.xlane.f32.xlu0 %v1520_v2 }
 0x3b0   : > { %v1522_v6 = vpop.f32.mrf.mxu0 }
 0x3b1   : > { %v1523_v59 = vadd.f32 %v7370_v14, %v1522_v6  ;;  %1588 = vmax.xlane.f32.xlu1 %v1531_v52 }
 0x3b2   : > { %v5755_v7 = vpop.f32.mrf.mxu0 }
 0x3b3   : > { %1584 = vmax.xlane.f32.xlu0 %v1523_v59  ;;  %v7377_v18 = vadd.f32 %v5755_v7, %v7370_v14 }
 0x3b4   : > { %v1535_v60 = vpop.f32.mrf.mxu0 }
 0x3b5   : > { %v7384_v12 = vadd.f32 %v7370_v14, %v1535_v60 }
 0x3b6   : > { %v5756_v39 = vpop.f32.mrf.mxu0 }
 0x3b7   : > { %v7380_v15 = vadd.f32 %v5756_v39, %v7370_v14  ;;  %1594 = vmax.xlane.f32.xlu0 %v7377_v18 }
 0x3b8   : > { %v1538_v30 = vpop.f32.mrf.mxu0 }
 0x3b9   : > { %1596 = vmax.xlane.f32.xlu1 %v7380_v15  ;;  %v7388_v26 = vadd.f32 %v7370_v14, %v1538_v30 }
 0x3ba   : > { %v5759_v23 = vpop.f32.mrf.mxu0 }
 0x3bb   : > { %1590 = vmax.xlane.f32.xlu0 %v7384_v12  ;;  %v7392_v3 = vadd.f32 %v5759_v23, %v7370_v14 }
 0x3bc   : > { %v1551_v63 = vpop.f32.mrf.mxu0 }
 0x3bd   : > { %1592 = vmax.xlane.f32.xlu1 %v7388_v26  ;;  %v7400_v47 = vadd.f32 %v7370_v14, %v1551_v63 }
 0x3be   : > { %v5760_v20 = vpop.f32.mrf.mxu0 }
 0x3bf   : > { %v7396_v37 = vadd.f32 %v5760_v20, %v7370_v14  ;;  %1602 = vmax.xlane.f32.xlu0 %v7392_v3 }
 0x3c0   : > { %v1554_v42 = vpop.f32.mrf.mxu0 }
 0x3c1   : > { %1604 = vmax.xlane.f32.xlu1 %v7396_v37  ;;  %v7404_v61 = vadd.f32 %v7370_v14, %v1554_v42 }
 0x3c2   : > { %v5763_v49 = vpop.f32.mrf.mxu0 }
 0x3c3   : > { %1598 = vmax.xlane.f32.xlu0 %v7400_v47  ;;  %v7408_v54 = vadd.f32 %v5763_v49, %v7370_v14 }
 0x3c4   : > { %v1567_v38 = vpop.f32.mrf.mxu0 }
 0x3c5   : > { %1600 = vmax.xlane.f32.xlu1 %v7404_v61  ;;  %v7413_v45 = vadd.f32 %v7370_v14, %v1567_v38 }
 0x3c6   : > { %v5764_v57 = vpop.f32.mrf.mxu0 }
 0x3c7   : > { %1610 = vmax.xlane.f32.xlu0 %v7408_v54  ;;  %v7421_v25 = vadd.f32 %v5764_v57, %v7370_v14 }
 0x3c8   : > { %v1570_v28 = vpop.f32.mrf.mxu0 }
 0x3c9   : > { %v7425_v44 = vadd.f32 %v7370_v14, %v1570_v28 }
 0x3cb   : > { %1606 = vmax.xlane.f32.xlu0 %v7413_v45 }
 0x3d6   : > { %1883 = vrot.lane.b32.xlu1 %v7297_v35, %s6701_s3 }
 0x3e1   : > { %1885 = vrot.lane.b32.xlu0 %v7285_v32, %s6701_s3 }
 0x3fa   : > { %1612 = vmax.xlane.f32.xlu1 %v7421_v25 }
 0x3fe   : > { %1608 = vmax.xlane.f32.xlu1 %v7425_v44 }
 0x436   : > { %v1587_v10 = vpop.xlane.xlu1 %1586 }
 0x437   : > { %v1616_v48 = vsub.f32 %v1528_v1, %v1587_v10 }
 0x438   : > { %v1583_v34 = vpop.xlane.xlu0 %1582 }
 0x439   : > { %v1634_v5 = vmul.f32 1.442695, %v1616_v48  ;;  %v1614_v6 = vsub.f32 %v1520_v2, %v1583_v34 }
 0x43a   : > { %v1589_v7 = vpop.xlane.xlu1 %1588 }
 0x43b   : > { %6259 = vpow2.f32 %v1634_v5  ;;  %v1630_v60 = vmul.f32 1.442695, %v1614_v6  ;;  %v1617_v39 = vsub.f32 %v1531_v52, %v1589_v7 }
 0x43c   : > { %v1585_v30 = vpop.xlane.xlu0 %1584 }
 0x43d   : > { %v1636_v23 = vmul.f32 1.442695, %v1617_v39  ;;  %v1615_v63 = vsub.f32 %v1523_v59, %v1585_v30  ;;  %6261 = vpow2.f32 %v1630_v60 }
 0x43f   : > { %6263 = vpow2.f32 %v1636_v23  ;;  %v1632_v20 = vmul.f32 1.442695, %v1615_v63 }
 0x440   : > { %v1595_v52 = vpop.xlane.xlu0 %1594 }
 0x441   : > { %6265 = vpow2.f32 %v1632_v20  ;;  %v1620_v10 = vsub.f32 %v7377_v18, %v1595_v52 }
 0x442   : > { %v1597_v57 = vpop.xlane.xlu1 %1596 }
 0x443   : > { %v1642_v6 = vmul.f32 1.442695, %v1620_v10  ;;  %v1621_v60 = vsub.f32 %v7380_v15, %v1597_v57 }
 0x444   : > { %v1591_v59 = vpop.xlane.xlu0 %1590 }
 0x445   : > { %v1618_v34 = vsub.f32 %v7384_v12, %v1591_v59  ;;  %6267 = vpow2.f32 %v1642_v6  ;;  %v1644_v24 = vmul.f32 1.442695, %v1621_v60 }
 0x446   : > { %v1593_v48 = vpop.xlane.xlu1 %1592 }
 0x447   : > { %v1619_v7 = vsub.f32 %v7388_v26, %v1593_v48  ;;  %v1638_v39 = vmul.f32 1.442695, %v1618_v34 }
 0x448   : > { %v7430_v42 = vpop.eup %6259  ;;  %v1603_v38 = vpop.xlane.xlu0 %1602 }
 0x449   : > { %1666 = vadd.xlane.f32.xlu0 %v7430_v42  ;;  %v1640_v23 = vmul.f32 1.442695, %v1619_v7  ;;  %6269 = vpow2.f32 %v1638_v39  ;;  %v1624_v18 = vsub.f32 %v7392_v3, %v1603_v38 }
 0x44a   : > { %v7433_v49 = vpop.eup %6261  ;;  %v1605_v30 = vpop.xlane.xlu1 %1604 }
 0x44b   : > { %6271 = vpow2.f32 %v1640_v23  ;;  %v1650_v26 = vmul.f32 1.442695, %v1624_v18  ;;  %v1625_v10 = vsub.f32 %v7396_v37, %v1605_v30 }
 0x44c   : > { %v7435_v1 = vpop.eup %6263  ;;  %v1599_v28 = vpop.xlane.xlu0 %1598  ;;  %6273 = vpow2.f32 %v1644_v24 }
 0x44d   : > { %1668 = vadd.xlane.f32.xlu1 %v7435_v1  ;;  %1662 = vadd.xlane.f32.xlu0 %v7433_v49  ;;  %v1622_v15 = vsub.f32 %v7400_v47, %v1599_v28  ;;  %v1652_v3 = vmul.f32 1.442695, %v1625_v10 }
 0x44e   : > { %v7439_v2 = vpop.eup %6265  ;;  %v1601_v59 = vpop.xlane.xlu1 %1600 }
 0x44f   : > { %v1646_v48 = vmul.f32 1.442695, %v1622_v15  ;;  %v1623_v24 = vsub.f32 %v7404_v61, %v1601_v59 }
 0x450   : > { %v1611_v5 = vpop.xlane.xlu0 %1610 }
 0x451   : > { %1664 = vadd.xlane.f32.xlu1 %v7439_v2  ;;  %v1628_v63 = vsub.f32 %v7408_v54, %v1611_v5  ;;  %v1648_v7 = vmul.f32 1.442695, %v1623_v24 }
 0x452   : > { %v7455_v54 = vpop.permute.xlu1 %1883  ;;  %v7457_v34 = vpop.eup %6267 }
 0x453   : > { %v1658_v52 = vmul.f32 1.442695, %v1628_v63 }
 0x454   : > { %v1607_v20 = vpop.xlane.xlu0 %1606 }
 0x455   : > { %v1626_v12 = vsub.f32 %v7413_v45, %v1607_v20  ;;  %6275 = vpow2.f32 %v1658_v52 }
 0x456   : > { %6277 = vpow2.f32 %v1650_v26  ;;  %v7460_v38 = vpop.eup %6269 }
 0x457   : > { %v1654_v57 = vmul.f32 1.442695, %v1626_v12 }
 0x458   : > { %v7464_v28 = vpop.eup %6271  ;;  %v1886_v52 = vpop.permute.xlu0 %1885 }
 0x459   : > { %6279 = vpow2.f32 %v1654_v57  ;;  %v7468_v6 = vpop.eup %6273 }
 0x45a   : > { %6281 = vpow2.f32 %v1646_v48 }
 0x45b   : > { %6283 = vpow2.f32 %v1652_v3 }
 0x462   : > { %1879 = vrot.lane.b32.xlu1 %v7317_v55, %s6701_s3  ;;  %v7471_v39 = vpop.eup %6275 }
 0x463   : > { %1881 = vrot.lane.b32.xlu0 %v7307_v43, %s6701_s3  ;;  %v7475_v61 = vpop.eup %6277 }
 0x466   : > { %v7477_v30 = vpop.eup %6279 }
 0x467   : > { %v7481_v23 = vpop.eup %6281 }
 0x482   : > { %1674 = vadd.xlane.f32.xlu0 %v7457_v34 }
 0x483   : > { %v1613_v45 = vpop.xlane.xlu1 %1612 }
 0x484   : > { %v1629_v47 = vsub.f32 %v7421_v25, %v1613_v45 }
 0x486   : > { %v1660_v37 = vmul.f32 1.442695, %v1629_v47  ;;  %1672 = vadd.xlane.f32.xlu0 %v7464_v28  ;;  %1670 = vadd.xlane.f32.xlu1 %v7460_v38 }
 0x487   : > { %v1609_v5 = vpop.xlane.xlu1 %1608 }
 0x488   : > { %6285 = vpow2.f32 %v1660_v37  ;;  %v1627_v60 = vsub.f32 %v7425_v44, %v1609_v5  ;;  %v7484_v44 = vpop.eup %6283 }
 0x489   : > { %6287 = vpow2.f32 %v1648_v7 }
 0x48a   : > { %1676 = vadd.xlane.f32.xlu1 %v7468_v6  ;;  %1690 = vadd.xlane.f32.xlu0 %v7471_v39  ;;  %v1656_v25 = vmul.f32 1.442695, %v1627_v60  ;;  %v1937_v60 = vsel %vm1436_vm0, %v7359_v16, 0 }
 0x48c   : > { %6289 = vpow2.f32 %v1656_v25 }
 0x48e   : > { %1682 = vadd.xlane.f32.xlu1 %v7475_v61  ;;  %1686 = vadd.xlane.f32.xlu0 %v7477_v30 }
 0x492   : > { %1678 = vadd.xlane.f32.xlu1 %v7481_v23 }
 0x495   : > { %v7486_v63 = vpop.eup %6285 }
 0x496   : > { %1684 = vadd.xlane.f32.xlu1 %v7484_v44  ;;  %1692 = vadd.xlane.f32.xlu0 %v7486_v63  ;;  %v7490_v20 = vpop.eup %6287 }
 0x499   : > { %v7493_v18 = vpop.eup %6289 }
 0x49a   : > { %1680 = vadd.xlane.f32.xlu1 %v7490_v20 }
 0x49e   : > { %1688 = vadd.xlane.f32.xlu1 %v7493_v18 }
 0x4ac   : > { %1877 = vrot.lane.b32.xlu0 %v7327_v53, %s6701_s3 }
 0x4af   : > { %1875 = vrot.lane.b32.xlu1 %v7337_v50, %s6701_s3 }
 0x4b0   : > { %1851 = vrot.lane.b32.xlu0 %v7137_v27, %s6701_s3 }
 0x4b3   : > { %1853 = vrot.lane.b32.xlu1 %v7147_v56, %s6701_s3 }
 0x4b4   : > { %1855 = vrot.lane.b32.xlu0 %v7163_v33, %s6701_s3 }
 0x4b7   : > { %1857 = vrot.lane.b32.xlu1 %v7175_v36, %s6701_s3 }
 0x4b8   : > { %1859 = vrot.lane.b32.xlu0 %v7184_v62, %s6701_s3 }
 0x4bb   : > { %1861 = vrot.lane.b32.xlu1 %v7199_v19, %s6701_s3 }
 0x4bc   : > { %1863 = vrot.lane.b32.xlu0 %v7226_v58, %s6701_s3 }
 0x4bf   : > { %1865 = vrot.lane.b32.xlu1 %v7250_v17, %s6701_s3 }
 0x4c3   : > { %2208 = vrot.lane.b32.xlu1 %v7207_v31, %s6701_s3 }
 0x4d2   : > { %v1667_v12 = vpop.xlane.xlu0 %1666 }
 0x4d6   : > { %v1669_v59 = vpop.xlane.xlu1 %1668  ;;  %v1663_v26 = vpop.xlane.xlu0 %1662 }
 0x4d7   : > { %6291 = vrcp.f32 %v1669_v59 }
 0x4d8   : > { %6293 = vrcp.f32 %v1663_v26 }
 0x4d9   : > { %6295 = vrcp.f32 %v1667_v12 }
 0x4da   : > { %v1665_v15 = vpop.xlane.xlu1 %1664  ;;  %v1882_v16 = vpop.permute.xlu0 %1881 }
 0x4db   : > { %6297 = vrcp.f32 %v1665_v15 }
 0x4e4   : > { %v6292_v57 = vpop.eup %6291 }
 0x4e5   : > { %v6294_v10 = vpop.eup %6293  ;;  %v1713_v45 = vmul.f32 %v6292_v57, %v7435_v1  ;;  %v1934_v1 = vsel %vm1436_vm0, %v7428_v21, 0 }
 0x4e6   : > { %v6296_v48 = vpop.eup %6295  ;;  %v1710_v24 = vmul.f32 %v6294_v10, %v7433_v49  ;;  %v1931_v49 = vsel %vm1436_vm0, %v1886_v52, 0 }
 0x4e7   : > { %v1712_v37 = vmul.f32 %v6296_v48, %v7430_v42  ;;  %v1928_v42 = vsel %vm1436_vm0, %v7455_v54, 0 }
 0x4e8   : > { %v6298_v3 = vpop.eup %6297 }
 0x4e9   : > { %v1711_v47 = vmul.f32 %v6298_v3, %v7439_v2  ;;  %v1727_v7 = vpack.c.bf16 %v1713_v45, %v1712_v37  ;;  %v1880_v2 = vpop.permute.xlu1 %1879 }
 0x4eb   : > { %v1726_v5 = vpack.c.bf16 %v1711_v47, %v1710_v24 }
 0x4ed   : > { %5781 = vmatprep.mubr.bf16.mxu1 %v1726_v5 }
 0x4ee   : > { %5782 = vmatmul.mubr.bf16.vlgmr.msra.gmra.mxu1 %v1727_v7 }
 0x4ef   : > { %5798 = vmatpush3.bf16.xpose.msra.mxu1 %v1937_v60 }
 0x4f0   : > { %6078 = vmatprep.subr.msk.bf16.mxu1 %vm1436_vm0, %v7428_v21  ;;  %v1925_v21 = vsel %vm1436_vm0, %v1882_v16, 0 }
 0x4f7   : > { %5800 = vmatpush3.bf16.xpose.msra.mxu1 %v1934_v1 }
 0x4f8   : > { %6079 = vmatprep.subr.msk.bf16.mxu1 %vm1436_vm0, %v1886_v52 }
 0x4ff   : > { %5802 = vmatpush3.bf16.xpose.msra.mxu1 %v1931_v49 }
 0x500   : > { %6080 = vmatprep.subr.msk.bf16.mxu1 %vm1436_vm0, %v7455_v54  ;;  %v1922_v54 = vsel %vm1436_vm0, %v1880_v2, 0 }
 0x507   : > { %5804 = vmatpush3.bf16.xpose.msra.mxu1 %v1928_v42 }
 0x508   : > { %6081 = vmatprep.subr.msk.bf16.mxu1 %vm1436_vm0, %v1882_v16 }
 0x50b   : > { %v1675_v25 = vpop.xlane.xlu0 %1674 }
 0x50f   : > { %5806 = vmatpush3.bf16.xpose.msra.mxu1 %v1925_v21  ;;  %v1671_v12 = vpop.xlane.xlu1 %1670  ;;  %v1673_v59 = vpop.xlane.xlu0 %1672 }
 0x510   : > { %6299 = vrcp.f32 %v1671_v12  ;;  %6082 = vmatprep.subr.msk.bf16.mxu1 %vm1436_vm0, %v1880_v2  ;;  %v6211_v12 = vld [vmem:[%s6849_s28 + $0x8] sm:$0xff]  }
 0x511   : > { %6301 = vrcp.f32 %v1673_v59 }
 0x512   : > { %6303 = vrcp.f32 %v1675_v25 }
 0x513   : > { %v1677_v52 = vpop.xlane.xlu1 %1676  ;;  %v1691_v26 = vpop.xlane.xlu0 %1690 }
 0x514   : > { %6305 = vrcp.f32 %v1677_v52 }
 0x517   : > { %5808 = vmatpush3.bf16.xpose.msra.mxu1 %v1922_v54  ;;  %v1683_v15 = vpop.xlane.xlu1 %1682  ;;  %v1687_v57 = vpop.xlane.xlu0 %1686 }
 0x51b   : > { %v1679_v10 = vpop.xlane.xlu1 %1678 }
 0x51d   : > { %v6300_v48 = vpop.eup %6299 }
 0x51e   : > { %v6302_v3 = vpop.eup %6301  ;;  %v1714_v45 = vmul.f32 %v6300_v48, %v7460_v38 }
 0x51f   : > { %v6304_v24 = vpop.eup %6303  ;;  %v1685_v47 = vpop.xlane.xlu1 %1684  ;;  %v1715_v5 = vmul.f32 %v6302_v3, %v7464_v28 }
 0x520   : > { %v1693_v37 = vpop.xlane.xlu0 %1692  ;;  %6307 = vrcp.f32 %v1685_v47  ;;  %v1716_v1 = vmul.f32 %v6304_v24, %v7457_v34 }
 0x521   : > { %v6306_v7 = vpop.eup %6305  ;;  %v1728_v60 = vpack.c.bf16 %v1715_v5, %v1714_v45  ;;  %6309 = vrcp.f32 %v1679_v10 }
 0x522   : > { %v1717_v49 = vmul.f32 %v6306_v7, %v7468_v6  ;;  %6311 = vrcp.f32 %v1683_v15 }
 0x523   : > { %5785 = vmatprep.mubr.bf16.mxu1 %v1728_v60  ;;  %v1681_v42 = vpop.xlane.xlu1 %1680  ;;  %v6212_v60 = vld [vmem:[%s6849_s28] sm:$0xff]  }
 0x524   : > { %v1878_v16 = vpop.permute.xlu0 %1877  ;;  %6313 = vrcp.f32 %v1681_v42  ;;  %v1729_v2 = vpack.c.bf16 %v1717_v49, %v1716_v1 }
 0x525   : > { %6083 = vmatprep.subr.msk.bf16.mxu1 %vm1436_vm0, %v1878_v16  ;;  %v1919_v38 = vsel %vm1436_vm0, %v1878_v16, 0  ;;  %6315 = vrcp.f32 %v1687_v57 }
 0x526   : > { %5810 = vmatpush3.bf16.xpose.msra.mxu1 %v1919_v38 }
 0x527   : > { %5786 = vmatmul.mubr.bf16.gmra.mxu1 %v1729_v2  ;;  %v1689_v28 = vpop.xlane.xlu1 %1688 }
 0x528   : > { %6317 = vrcp.f32 %v1689_v28 }
 0x529   : > { %6319 = vrcp.f32 %v1693_v37 }
 0x52a   : > { %6321 = vrcp.f32 %v1691_v26 }
 0x52b   : > { %v1876_v34 = vpop.permute.xlu1 %1875 }
 0x52c   : > { %6084 = vmatprep.subr.msk.bf16.mxu1 %vm1436_vm0, %v1876_v34  ;;  %v1916_v6 = vsel %vm1436_vm0, %v1876_v34, 0 }
 0x52d   : > { %v6308_v25 = vpop.eup %6307 }
 0x52e   : > { %5812 = vmatpush3.bf16.xpose.msra.mxu1 %v1916_v6  ;;  %v6310_v21 = vpop.eup %6309  ;;  %v1721_v54 = vmul.f32 %v6308_v25, %v7484_v44 }
 0x52f   : > { %v6312_v59 = vpop.eup %6311  ;;  %5881 = vmatprep.subr.bf16.mxu1 %v6211_v12  ;;  %v1718_v15 = vmul.f32 %v6310_v21, %v7481_v23  ;;  %v1854_v1 = vpop.permute.xlu1 %1853 }
 0x530   : > { %v1720_v26 = vmul.f32 %v6312_v59, %v7475_v61  ;;  %v1852_v61 = vpop.permute.xlu0 %1851 }
 0x531   : > { %v6314_v52 = vpop.eup %6313 }
 0x532   : > { %v1719_v57 = vmul.f32 %v6314_v52, %v7490_v20  ;;  %v6316_v10 = vpop.eup %6315  ;;  %v1731_v45 = vpack.c.bf16 %v1721_v54, %v1720_v26 }
 0x533   : > { %v1722_v47 = vmul.f32 %v6316_v10, %v7477_v30  ;;  %v1858_v30 = vpop.permute.xlu1 %1857 }
 0x534   : > { %v1730_v48 = vpack.c.bf16 %v1719_v57, %v1718_v15  ;;  %v1856_v49 = vpop.permute.xlu0 %1855 }
 0x535   : > { %v6318_v3 = vpop.eup %6317 }
 0x536   : > { %v6320_v24 = vpop.eup %6319  ;;  %5789 = vmatprep.mubr.bf16.mxu1 %v1730_v48  ;;  %v1723_v37 = vmul.f32 %v6318_v3, %v7493_v18 }
 0x537   : > { %5790 = vmatmul.mubr.bf16.gmra.mxu1 %v1731_v45  ;;  %v6322_v44 = vpop.eup %6321  ;;  %v1725_v23 = vmul.f32 %v6320_v24, %v7486_v63 }
 0x538   : > { %v1732_v5 = vpack.c.bf16 %v1723_v37, %v1722_v47  ;;  %v1724_v20 = vmul.f32 %v6322_v44, %v7471_v39  ;;  %v1860_v63 = vpop.permute.xlu0 %1859  ;;  %v1862_v39 = vpop.permute.xlu1 %1861 }
 0x53a   : > { %5793 = vmatprep.mubr.bf16.mxu1 %v1732_v5  ;;  %v1733_v7 = vpack.c.bf16 %v1725_v23, %v1724_v20 }
 0x53c   : > { %v1864_v18 = vpop.permute.xlu0 %1863  ;;  %v1866_v42 = vpop.permute.xlu1 %1865 }
 0x53f   : > { %5794 = vmatmul.mubr.bf16.gmra.mxu1 %v1733_v7 }
 0x540   : > { %5813 = vmatprep.mubr.msk.bf16.mxu1 %vm1436_vm0, %v1852_v61 }
 0x547   : > { %5814 = vmatmul.mubr.msk.bf16.vlgmr.msra.gmra.mxu1 %vm1436_vm0, %v1854_v1 }
 0x548   : > { %5817 = vmatprep.mubr.msk.bf16.mxu1 %vm1436_vm0, %v1856_v49  ;;  %5882 = vmatpush3.bf16.msra.mxu1 %v6211_v12 }
 0x549   : > { %5883 = vmatprep.subr.bf16.mxu1 %v6212_v60 }
 0x54c   : > { %5884 = vmatpush3.bf16.msra.mxu1 %v6212_v60 }
 0x54f   : > { %5818 = vmatmul.mubr.msk.bf16.gmra.mxu1 %vm1436_vm0, %v1858_v30 }
 0x550   : > { %5821 = vmatprep.mubr.msk.bf16.mxu1 %vm1436_vm0, %v1860_v63 }
 0x557   : > { %5822 = vmatmul.mubr.msk.bf16.gmra.mxu1 %vm1436_vm0, %v1862_v39 }
 0x558   : > { %5825 = vmatprep.mubr.msk.bf16.mxu1 %vm1436_vm0, %v1864_v18 }
 0x55f   : > { %5826 = vmatmul.mubr.msk.bf16.gmra.mxu1 %vm1436_vm0, %v1866_v42 }
 0x5ae   : > { %v5783_v16 = vpop.f32.mrf.mxu1 }
 0x5b0   : > { %v1768_v38 = vpop.f32.mrf.mxu1 }
 0x5b2   : > { %v5784_v2 = vpop.f32.mrf.mxu1 }
 0x5b3   : > { %v1832_v6 = vpack.c.bf16 %v5784_v2, %v5783_v16 }
 0x5b4   : > { %v1771_v28 = vpop.f32.mrf.mxu1 }
 0x5b5   : > { %v1831_v34 = vpack.c.bf16 %v1771_v28, %v1768_v38 }
 0x5b7   : > { %5885 = vmatprep.mubr.msk.bf16.mxu1 %vm1436_vm0, %v1831_v34 }
 0x5b8   : > { %5886 = vmatmul.mubr.msk.bf16.vlgmr.msra.gmra.mxu1 %vm1436_vm0, %v1832_v6 }
 0x5e7   : > { %v5787_v25 = vpop.f32.mrf.mxu1 }
 0x5e9   : > { %v1784_v21 = vpop.f32.mrf.mxu1 }
 0x5eb   : > { %v5788_v12 = vpop.f32.mrf.mxu1 }
 0x5ec   : > { %v1834_v54 = vpack.c.bf16 %v5788_v12, %v5787_v25 }
 0x5ed   : > { %v1787_v59 = vpop.f32.mrf.mxu1 }
 0x5ee   : > { %v1833_v52 = vpack.c.bf16 %v1787_v59, %v1784_v21 }
 0x5f0   : > { %5889 = vmatprep.mubr.msk.bf16.mxu1 %vm1436_vm0, %v1833_v52 }
 0x5f1   : > { %5890 = vmatmul.mubr.msk.bf16.gmra.mxu1 %vm1436_vm0, %v1834_v54 }
 0x5f7   : > { %v5791_v15 = vpop.f32.mrf.mxu1 }
 0x5f9   : > { %v1800_v57 = vpop.f32.mrf.mxu1 }
 0x5fb   : > { %v5792_v10 = vpop.f32.mrf.mxu1 }
 0x5fc   : > { %v1836_v3 = vpack.c.bf16 %v5792_v10, %v5791_v15 }
 0x5fd   : > { %v1803_v26 = vpop.f32.mrf.mxu1 }
 0x5fe   : > { %v1835_v48 = vpack.c.bf16 %v1803_v26, %v1800_v57 }
 0x5ff   : > { %v5795_v45 = vpop.f32.mrf.mxu1 }
 0x600   : > { %5893 = vmatprep.mubr.msk.bf16.mxu1 %vm1436_vm0, %v1835_v48 }
 0x601   : > { %v1816_v24 = vpop.f32.mrf.mxu1  ;;  %5894 = vmatmul.mubr.msk.bf16.gmra.mxu1 %vm1436_vm0, %v1836_v3 }
 0x603   : > { %v5796_v47 = vpop.f32.mrf.mxu1 }
 0x604   : > { %v1838_v5 = vpack.c.bf16 %v5796_v47, %v5795_v45 }
 0x605   : > { %v1819_v37 = vpop.f32.mrf.mxu1 }
 0x606   : > { %v1837_v44 = vpack.c.bf16 %v1819_v37, %v1816_v24 }
 0x607   : > { %v5815_v23 = vpop.f32.mrf.mxu1 }
 0x608   : > { %v1982_v20 = vadd.f32 %v5815_v23, %v7370_v14  ;;  %5897 = vmatprep.mubr.msk.bf16.mxu1 %vm1436_vm0, %v1837_v44  ;;  %v2209_v44 = vpop.permute.xlu1 %2208 }
 0x609   : > { %v1973_v7 = vpop.f32.mrf.mxu1  ;;  %5898 = vmatmul.mubr.msk.bf16.gmra.mxu1 %vm1436_vm0, %v1838_v5 }
 0x60a   : > { %2040 = vmax.xlane.f32.xlu0 %v1982_v20  ;;  %v1974_v60 = vadd.f32 %v7370_v14, %v1973_v7 }
 0x60b   : > { %v5816_v61 = vpop.f32.mrf.mxu1 }
 0x60c   : > { %v1985_v63 = vadd.f32 %v5816_v61, %v7370_v14 }
 0x60d   : > { %v1976_v1 = vpop.f32.mrf.mxu1 }
 0x60e   : > { %2036 = vmax.xlane.f32.xlu0 %v1974_v60  ;;  %v1977_v49 = vadd.f32 %v7370_v14, %v1976_v1 }
 0x60f   : > { %v5819_v30 = vpop.f32.mrf.mxu1 }
 0x610   : > { %2038 = vmax.xlane.f32.xlu1 %v1977_v49  ;;  %v7605_v10 = vadd.f32 %v5819_v30, %v7370_v14 }
 0x611   : > { %v1989_v39 = vpop.f32.mrf.mxu1 }
 0x612   : > { %2042 = vmax.xlane.f32.xlu0 %v1985_v63  ;;  %v1990_v26 = vadd.f32 %v7370_v14, %v1989_v39 }
 0x613   : > { %v5820_v18 = vpop.f32.mrf.mxu1 }
 0x614   : > { %v7577_v42 = vadd.f32 %v5820_v18, %v7370_v14 }
 0x615   : > { %v1992_v16 = vpop.f32.mrf.mxu1 }
 0x616   : > { %2050 = vmax.xlane.f32.xlu1 %v7577_v42  ;;  %v7581_v2 = vadd.f32 %v7370_v14, %v1992_v16 }
 0x617   : > { %v5823_v38 = vpop.f32.mrf.mxu1 }
 0x618   : > { %v7610_v48 = vadd.f32 %v5823_v38, %v7370_v14 }
 0x619   : > { %v2005_v28 = vpop.f32.mrf.mxu1 }
 0x61a   : > { %2046 = vmax.xlane.f32.xlu1 %v7581_v2  ;;  %v7614_v3 = vadd.f32 %v7370_v14, %v2005_v28 }
 0x61b   : > { %v5824_v34 = vpop.f32.mrf.mxu1 }
 0x61c   : > { %v7585_v6 = vadd.f32 %v5824_v34, %v7370_v14 }
 0x61d   : > { %v2008_v25 = vpop.f32.mrf.mxu1 }
 0x61e   : > { %2058 = vmax.xlane.f32.xlu1 %v7585_v6  ;;  %v7589_v12 = vadd.f32 %v7370_v14, %v2008_v25 }
 0x61f   : > { %v5827_v21 = vpop.f32.mrf.mxu1 }
 0x620   : > { %v7618_v45 = vadd.f32 %v5827_v21, %v7370_v14 }
 0x621   : > { %v2021_v59 = vpop.f32.mrf.mxu1 }
 0x622   : > { %2054 = vmax.xlane.f32.xlu1 %v7589_v12  ;;  %v7622_v24 = vadd.f32 %v7370_v14, %v2021_v59 }
 0x623   : > { %v5828_v52 = vpop.f32.mrf.mxu1 }
 0x624   : > { %v7593_v54 = vadd.f32 %v5828_v52, %v7370_v14 }
 0x625   : > { %v2024_v15 = vpop.f32.mrf.mxu1 }
 0x626   : > { %2066 = vmax.xlane.f32.xlu1 %v7593_v54  ;;  %v7599_v57 = vadd.f32 %v7370_v14, %v2024_v15 }
 0x628   : > { %2210 = vrot.lane.b32.xlu0 %v7202_v11, %s6701_s3 }
 0x62a   : > { %2062 = vmax.xlane.f32.xlu1 %v7599_v57 }
 0x63b   : > { %2200 = vrot.lane.b32.xlu1 %v7256_v46, %s6701_s3 }
 0x647   : > { %2048 = vmax.xlane.f32.xlu0 %v7605_v10 }
 0x64b   : > { %2044 = vmax.xlane.f32.xlu0 %v1990_v26 }
 0x64f   : > { %2056 = vmax.xlane.f32.xlu0 %v7610_v48 }
 0x653   : > { %2052 = vmax.xlane.f32.xlu0 %v7614_v3 }
 0x657   : > { %2064 = vmax.xlane.f32.xlu0 %v7618_v45 }
 0x65b   : > { %2060 = vmax.xlane.f32.xlu0 %v7622_v24 }
 0x671   : > { %2206 = vrot.lane.b32.xlu0 %v7212_v40, %s6701_s3 }
 0x675   : > { %2204 = vrot.lane.b32.xlu0 %v7229_v51, %s6701_s3 }
 0x679   : > { %2202 = vrot.lane.b32.xlu0 %v7238_v41, %s6701_s3 }
 0x67d   : > { %2198 = vrot.lane.b32.xlu0 %v7269_v4, %s6701_s3 }
 0x693   : > { %v2041_v47 = vpop.xlane.xlu0 %2040 }
 0x694   : > { %v2070_v37 = vsub.f32 %v1982_v20, %v2041_v47 }
 0x696   : > { %v2088_v5 = vmul.f32 1.442695, %v2070_v37 }
 0x697   : > { %v2037_v14 = vpop.xlane.xlu0 %2036 }
 0x698   : > { %6323 = vpow2.f32 %v2088_v5  ;;  %v2068_v23 = vsub.f32 %v1974_v60, %v2037_v14 }
 0x699   : > { %v2039_v7 = vpop.xlane.xlu1 %2038 }
 0x69a   : > { %v2084_v61 = vmul.f32 1.442695, %v2068_v23  ;;  %v2069_v30 = vsub.f32 %v1977_v49, %v2039_v7 }
 0x69b   : > { %v2043_v1 = vpop.xlane.xlu0 %2042 }
 0x69c   : > { %6325 = vpow2.f32 %v2084_v61  ;;  %v2071_v39 = vsub.f32 %v1985_v63, %v2043_v1  ;;  %v2086_v38 = vmul.f32 1.442695, %v2069_v30 }
 0x69e   : > { %v2090_v18 = vmul.f32 1.442695, %v2071_v39 }
 0x69f   : > { %v2211_v16 = vpop.permute.xlu0 %2210  ;;  %v2051_v63 = vpop.xlane.xlu1 %2050 }
 0x6a0   : > { %6327 = vpow2.f32 %v2090_v18  ;;  %5829 = vmatprep.subr.bf16.mxu0 %v2211_v16  ;;  %v2075_v7 = vsub.f32 %v7577_v42, %v2051_v63 }
 0x6a1   : > { %5830 = vmatpush3.bf16.msra.mxu0 %v2211_v16  ;;  %6329 = vpow2.f32 %v2086_v38 }
 0x6a2   : > { %5831 = vmatprep.subr.bf16.mxu0 %v2209_v44 }
 0x6a3   : > { %v2047_v34 = vpop.xlane.xlu1 %2046 }
 0x6a4   : > { %v2073_v59 = vsub.f32 %v7581_v2, %v2047_v34  ;;  %v2098_v2 = vmul.f32 1.442695, %v2075_v7 }
 0x6a5   : > { %v7633_v20 = vpop.eup %6323  ;;  %5832 = vmatpush3.bf16.msra.mxu0 %v2209_v44 }
 0x6a6   : > { %2120 = vadd.xlane.f32.xlu1 %v7633_v20  ;;  %v2094_v47 = vmul.f32 1.442695, %v2073_v59 }
 0x6a7   : > { %v2059_v25 = vpop.xlane.xlu1 %2058 }
 0x6a8   : > { %6331 = vpow2.f32 %v2094_v47  ;;  %v2079_v30 = vsub.f32 %v7585_v6, %v2059_v25 }
 0x6a9   : > { %v7636_v60 = vpop.eup %6325 }
 0x6aa   : > { %2116 = vadd.xlane.f32.xlu1 %v7636_v60  ;;  %v2106_v38 = vmul.f32 1.442695, %v2079_v30 }
 0x6ab   : > { %v2055_v21 = vpop.xlane.xlu1 %2054 }
 0x6ac   : > { %v2077_v37 = vsub.f32 %v7589_v12, %v2055_v21 }
 0x6ad   : > { %v7639_v28 = vpop.eup %6327 }
 0x6ae   : > { %2122 = vadd.xlane.f32.xlu1 %v7639_v28  ;;  %v7642_v49 = vpop.eup %6329  ;;  %v2102_v61 = vmul.f32 1.442695, %v2077_v37 }
 0x6af   : > { %v2067_v15 = vpop.xlane.xlu1 %2066 }
 0x6b0   : > { %v2083_v42 = vsub.f32 %v7593_v54, %v2067_v15 }
 0x6b2   : > { %2118 = vadd.xlane.f32.xlu1 %v7642_v49  ;;  %v2114_v25 = vmul.f32 1.442695, %v2083_v42 }
 0x6b3   : > { %v2063_v39 = vpop.xlane.xlu1 %2062 }
 0x6b4   : > { %v2081_v16 = vsub.f32 %v7599_v57, %v2063_v39 }
 0x6b5   : > { %v7656_v59 = vpop.eup %6331 }
 0x6c3   : > { %2196 = vrot.lane.b32.xlu1 %v7279_v29, %s6701_s3 }
 0x6d0   : > { %v2049_v52 = vpop.xlane.xlu0 %2048 }
 0x6d1   : > { %v2074_v5 = vsub.f32 %v7605_v10, %v2049_v52 }
 0x6d3   : > { %v2096_v18 = vmul.f32 1.442695, %v2074_v5 }
 0x6d4   : > { %v2045_v44 = vpop.xlane.xlu0 %2044 }
 0x6d5   : > { %v2072_v14 = vsub.f32 %v1990_v26, %v2045_v44  ;;  %v2110_v26 = vmul.f32 1.442695, %v2081_v16 }
 0x6d7   : > { %v2092_v23 = vmul.f32 1.442695, %v2072_v14 }
 0x6d8   : > { %v2057_v1 = vpop.xlane.xlu0 %2056 }
 0x6d9   : > { %6333 = vpow2.f32 %v2092_v23  ;;  %v2078_v6 = vsub.f32 %v7610_v48, %v2057_v1 }
 0x6da   : > { %6335 = vpow2.f32 %v2102_v61  ;;  %v2201_v61 = vpop.permute.xlu1 %2200 }
 0x6db   : > { %6337 = vpow2.f32 %v2096_v18  ;;  %v2104_v57 = vmul.f32 1.442695, %v2078_v6 }
 0x6dc   : > { %v2053_v12 = vpop.xlane.xlu0 %2052  ;;  %6339 = vpow2.f32 %v2098_v2 }
 0x6dd   : > { %v2076_v10 = vsub.f32 %v7614_v3, %v2053_v12  ;;  %6341 = vpow2.f32 %v2106_v38 }
 0x6de   : > { %6343 = vpow2.f32 %v2110_v26 }
 0x6df   : > { %v2100_v34 = vmul.f32 1.442695, %v2076_v10 }
 0x6e0   : > { %v2065_v63 = vpop.xlane.xlu0 %2064 }
 0x6e1   : > { %6345 = vpow2.f32 %v2100_v34  ;;  %v2082_v48 = vsub.f32 %v7618_v45, %v2065_v63 }
 0x6e2   : > { %6347 = vpow2.f32 %v2114_v25 }
 0x6e3   : > { %6349 = vpow2.f32 %v2104_v57  ;;  %v2112_v5 = vmul.f32 1.442695, %v2082_v48 }
 0x6e4   : > { %v2061_v21 = vpop.xlane.xlu0 %2060 }
 0x6e5   : > { %v2080_v52 = vsub.f32 %v7622_v24, %v2061_v21 }
 0x6e6   : > { %v7659_v47 = vpop.eup %6333 }
 0x6e7   : > { %2126 = vadd.xlane.f32.xlu1 %v7656_v59  ;;  %2124 = vadd.xlane.f32.xlu0 %v7659_v47  ;;  %v7663_v3 = vpop.eup %6335  ;;  %v2108_v15 = vmul.f32 1.442695, %v2080_v52 }
 0x6e8   : > { %v2207_v54 = vpop.permute.xlu0 %2206  ;;  %v7666_v37 = vpop.eup %6337 }
 0x6e9   : > { %5833 = vmatprep.subr.bf16.mxu0 %v2207_v54  ;;  %v7670_v44 = vpop.eup %6339  ;;  %6351 = vpow2.f32 %v2108_v15 }
 0x6ea   : > { %5834 = vmatpush3.bf16.msra.mxu0 %v2207_v54  ;;  %v7672_v14 = vpop.eup %6341  ;;  %6353 = vpow2.f32 %v2112_v5 }
 0x6eb   : > { %2134 = vadd.xlane.f32.xlu1 %v7663_v3  ;;  %2128 = vadd.xlane.f32.xlu0 %v7666_v37  ;;  %v7676_v23 = vpop.eup %6343 }
 0x6ec   : > { %v2205_v24 = vpop.permute.xlu0 %2204 }
 0x6ed   : > { %5835 = vmatprep.subr.bf16.mxu0 %v2205_v24 }
 0x6ee   : > { %5836 = vmatpush3.bf16.msra.mxu0 %v2205_v24  ;;  %v7678_v7 = vpop.eup %6345 }
 0x6ef   : > { %2138 = vadd.xlane.f32.xlu1 %v7672_v14  ;;  %2130 = vadd.xlane.f32.xlu0 %v7670_v44  ;;  %v7682_v1 = vpop.eup %6347 }
 0x6f0   : > { %v2203_v45 = vpop.permute.xlu0 %2202  ;;  %v7684_v30 = vpop.eup %6349 }
 0x6f1   : > { %5837 = vmatprep.subr.bf16.mxu0 %v2203_v45 }
 0x6f2   : > { %5838 = vmatpush3.bf16.msra.mxu0 %v2203_v45 }
 0x6f3   : > { %2142 = vadd.xlane.f32.xlu1 %v7676_v23  ;;  %2132 = vadd.xlane.f32.xlu0 %v7678_v7 }
 0x6f4   : > { %5839 = vmatprep.subr.bf16.mxu0 %v2201_v61  ;;  %v2199_v39 = vpop.permute.xlu0 %2198 }
 0x6f6   : > { %5840 = vmatpush3.bf16.msra.mxu0 %v2201_v61  ;;  %v7688_v18 = vpop.eup %6351 }
 0x6f7   : > { %2146 = vadd.xlane.f32.xlu1 %v7682_v1  ;;  %2136 = vadd.xlane.f32.xlu0 %v7684_v30  ;;  %v7691_v2 = vpop.eup %6353 }
 0x6f8   : > { %5841 = vmatprep.subr.bf16.mxu0 %v2199_v39 }
 0x6fa   : > { %5842 = vmatpush3.bf16.msra.mxu0 %v2199_v39 }
 0x6fb   : > { %2140 = vadd.xlane.f32.xlu0 %v7688_v18 }
 0x6ff   : > { %2144 = vadd.xlane.f32.xlu0 %v7691_v2 }
 0x708   : > { %2623 = vrot.lane.b32.xlu1 %v7232_v0, %s6702_s18 }
 0x70c   : > { %2621 = vrot.lane.b32.xlu1 %v7285_v32, %s6702_s18 }
 0x710   : > { %2619 = vrot.lane.b32.xlu1 %v7297_v35, %s6702_s18 }
 0x714   : > { %2615 = vrot.lane.b32.xlu1 %v7317_v55, %s6702_s18 }
 0x715   : > { %2625 = vrot.lane.b32.xlu0 %v7258_v13, %s6702_s18 }
 0x718   : > { %2611 = vrot.lane.b32.xlu1 %v7337_v50, %s6702_s18 }
 0x719   : > { %2617 = vrot.lane.b32.xlu0 %v7307_v43, %s6702_s18 }
 0x71c   : > { %2597 = vrot.lane.b32.xlu1 %v7147_v56, %s6702_s18 }
 0x71d   : > { %2613 = vrot.lane.b32.xlu0 %v7327_v53, %s6702_s18 }
 0x720   : > { %2601 = vrot.lane.b32.xlu1 %v7175_v36, %s6702_s18 }
 0x721   : > { %2595 = vrot.lane.b32.xlu0 %v7137_v27, %s6702_s18 }
 0x724   : > { %2605 = vrot.lane.b32.xlu1 %v7199_v19, %s6702_s18 }
 0x725   : > { %2599 = vrot.lane.b32.xlu0 %v7163_v33, %s6702_s18 }
 0x728   : > { %2609 = vrot.lane.b32.xlu1 %v7250_v17, %s6702_s18 }
 0x729   : > { %2603 = vrot.lane.b32.xlu0 %v7184_v62, %s6702_s18 }
 0x72c   : > { %3234 = vrot.lane.b32.xlu1 %v7232_v0, %s6703_s21 }
 0x72d   : > { %2607 = vrot.lane.b32.xlu0 %v7226_v58, %s6702_s18 }
 0x72f   : > { %v2121_v16 = vpop.xlane.xlu1 %2120 }
 0x730   : > { %3230 = vrot.lane.b32.xlu1 %v7297_v35, %s6703_s21 }
 0x731   : > { %3236 = vrot.lane.b32.xlu0 %v7258_v13, %s6703_s21  ;;  %v6213_v13 = vld [vmem:[%s6849_s28 + $0x18] sm:$0xff]  }
 0x733   : > { %v2117_v12 = vpop.xlane.xlu1 %2116 }
 0x734   : > { %3226 = vrot.lane.b32.xlu1 %v7317_v55, %s6703_s21 }
 0x735   : > { %3232 = vrot.lane.b32.xlu0 %v7285_v32, %s6703_s21 }
 0x737   : > { %v2123_v38 = vpop.xlane.xlu1 %2122 }
 0x738   : > { %3222 = vrot.lane.b32.xlu1 %v7337_v50, %s6703_s21  ;;  %6355 = vrcp.f32 %v2123_v38  ;;  %v6214_v50 = vld [vmem:[%s6849_s28 + $0x10] sm:$0xff]  }
 0x739   : > { %3228 = vrot.lane.b32.xlu0 %v7307_v43, %s6703_s21  ;;  %6357 = vrcp.f32 %v2117_v12 }
 0x73a   : > { %6359 = vrcp.f32 %v2121_v16 }
 0x73b   : > { %v2119_v0 = vpop.xlane.xlu1 %2118 }
 0x73c   : > { %6361 = vrcp.f32 %v2119_v0  ;;  %3208 = vrot.lane.b32.xlu1 %v7147_v56, %s6703_s21 }
 0x73d   : > { %3224 = vrot.lane.b32.xlu0 %v7327_v53, %s6703_s21 }
 0x73f   : > { %v2197_v32 = vpop.permute.xlu1 %2196 }
 0x740   : > { %3212 = vrot.lane.b32.xlu1 %v7175_v36, %s6703_s21  ;;  %5843 = vmatprep.subr.bf16.mxu0 %v2197_v32 }
 0x741   : > { %3206 = vrot.lane.b32.xlu0 %v7137_v27, %s6703_s21  ;;  %5844 = vmatpush3.bf16.msra.mxu0 %v2197_v32 }
 0x742   : > { %5861 = vmatprep.subr.bf16.mxu0 %v6213_v13 }
 0x744   : > { %3216 = vrot.lane.b32.xlu1 %v7199_v19, %s6703_s21 }
 0x745   : > { %3210 = vrot.lane.b32.xlu0 %v7163_v33, %s6703_s21  ;;  %v6356_v56 = vpop.eup %6355 }
 0x746   : > { %v6358_v35 = vpop.eup %6357  ;;  %v2167_v27 = vmul.f32 %v6356_v56, %v7639_v28 }
 0x747   : > { %v6360_v43 = vpop.eup %6359  ;;  %v2164_v55 = vmul.f32 %v6358_v35, %v7636_v60 }
 0x748   : > { %3220 = vrot.lane.b32.xlu1 %v7250_v17, %s6703_s21  ;;  %v2166_v53 = vmul.f32 %v6360_v43, %v7633_v20 }
 0x749   : > { %v6362_v36 = vpop.eup %6361  ;;  %3214 = vrot.lane.b32.xlu0 %v7184_v62, %s6703_s21 }
 0x74a   : > { %v2165_v19 = vmul.f32 %v6362_v36, %v7642_v49  ;;  %v2181_v17 = vpack.c.bf16 %v2167_v27, %v2166_v53 }
 0x74c   : > { %2936 = vrot.lane.b32.xlu1 %v7207_v31, %s6702_s18  ;;  %v2180_v33 = vpack.c.bf16 %v2165_v19, %v2164_v55 }
 0x74d   : > { %3218 = vrot.lane.b32.xlu0 %v7226_v58, %s6703_s21 }
 0x74e   : > { %5845 = vmatprep.mubr.bf16.mxu0 %v2180_v33 }
 0x74f   : > { %5846 = vmatmul.mubr.bf16.vlgmr.msra.gmra.mxu0 %v2181_v17 }
 0x750   : > { %5862 = vmatpush3.bf16.msra.mxu0 %v6213_v13 }
 0x751   : > { %2938 = vrot.lane.b32.xlu0 %v7202_v11, %s6702_s18  ;;  %5863 = vmatprep.subr.bf16.mxu0 %v6214_v50 }
 0x754   : > { %5864 = vmatpush3.bf16.msra.mxu0 %v6214_v50 }
 0x755   : > { %2934 = vrot.lane.b32.xlu0 %v7212_v40, %s6702_s18 }
 0x770   : > { %v2127_v62 = vpop.xlane.xlu1 %2126  ;;  %v2125_v20 = vpop.xlane.xlu0 %2124 }
 0x771   : > { %6363 = vrcp.f32 %v2127_v62 }
 0x772   : > { %6365 = vrcp.f32 %v2125_v20 }
 0x774   : > { %v2135_v60 = vpop.xlane.xlu1 %2134  ;;  %v2129_v28 = vpop.xlane.xlu0 %2128 }
 0x775   : > { %6367 = vrcp.f32 %v2129_v28 }
 0x778   : > { %v2139_v58 = vpop.xlane.xlu1 %2138  ;;  %v2131_v49 = vpop.xlane.xlu0 %2130 }
 0x779   : > { %6369 = vrcp.f32 %v2131_v49 }
 0x77a   : > { %6371 = vrcp.f32 %v2135_v60 }
 0x77c   : > { %v2143_v10 = vpop.xlane.xlu1 %2142  ;;  %v2133_v42 = vpop.xlane.xlu0 %2132 }
 0x77d   : > { %6373 = vrcp.f32 %v2133_v42 }
 0x77e   : > { %v6364_v26 = vpop.eup %6363  ;;  %6375 = vrcp.f32 %v2139_v58 }
 0x77f   : > { %v6366_v63 = vpop.eup %6365  ;;  %v2169_v6 = vmul.f32 %v6364_v26, %v7656_v59 }
 0x780   : > { %v2147_v34 = vpop.xlane.xlu1 %2146  ;;  %v2137_v25 = vpop.xlane.xlu0 %2136  ;;  %v2168_v21 = vmul.f32 %v6366_v63, %v7659_v47 }
 0x781   : > { %6377 = vrcp.f32 %v2137_v25 }
 0x782   : > { %v2182_v57 = vpack.c.bf16 %v2169_v6, %v2168_v21  ;;  %6379 = vrcp.f32 %v2143_v10  ;;  %v6368_v48 = vpop.eup %6367 }
 0x783   : > { %v2170_v59 = vmul.f32 %v6368_v48, %v7666_v37 }
 0x784   : > { %5849 = vmatprep.mubr.bf16.mxu0 %v2182_v57  ;;  %v7772_v52 = vpop.permute.xlu1 %2623  ;;  %v2141_v54 = vpop.xlane.xlu0 %2140 }
 0x785   : > { %6381 = vrcp.f32 %v2141_v54 }
 0x786   : > { %v6370_v15 = vpop.eup %6369  ;;  %6383 = vrcp.f32 %v2147_v34 }
 0x787   : > { %v2171_v45 = vmul.f32 %v6370_v15, %v7670_v44  ;;  %v6372_v61 = vpop.eup %6371 }
 0x788   : > { %v7774_v24 = vpop.permute.xlu1 %2621  ;;  %v2145_v5 = vpop.xlane.xlu0 %2144  ;;  %v2173_v0 = vmul.f32 %v6372_v61, %v7663_v3 }
 0x789   : > { %6385 = vrcp.f32 %v2145_v5  ;;  %v2183_v47 = vpack.c.bf16 %v2171_v45, %v2170_v59 }
 0x78a   : > { %v6374_v39 = vpop.eup %6373 }
 0x78b   : > { %5850 = vmatmul.mubr.bf16.gmra.mxu0 %v2183_v47  ;;  %v2172_v38 = vmul.f32 %v6374_v39, %v7678_v7  ;;  %v6376_v13 = vpop.eup %6375 }
 0x78c   : > { %v7778_v16 = vpop.permute.xlu1 %2619  ;;  %v7780_v12 = vpop.permute.xlu0 %2625  ;;  %v2175_v36 = vmul.f32 %v6376_v13, %v7672_v14 }
 0x78d   : > { %6085 = vmatprep.subr.msk.bf16.mxu0 %vm1436_vm0, %v7780_v12  ;;  %v2184_v37 = vpack.c.bf16 %v2173_v0, %v2172_v38 }
 0x78e   : > { %v6378_v32 = vpop.eup %6377 }
 0x78f   : > { %v6380_v44 = vpop.eup %6379  ;;  %5853 = vmatprep.mubr.bf16.mxu0 %v2184_v37  ;;  %v2174_v43 = vmul.f32 %v6378_v32, %v7684_v30 }
 0x790   : > { %v7786_v56 = vpop.permute.xlu1 %2615  ;;  %v7788_v35 = vpop.permute.xlu0 %2617  ;;  %v2177_v55 = vmul.f32 %v6380_v44, %v7676_v23 }
 0x791   : > { %v2185_v7 = vpack.c.bf16 %v2175_v36, %v2174_v43  ;;  %v2673_v43 = vsel %vm1436_vm0, %v7780_v12, 0  ;;  %v2670_v36 = vsel %vm1436_vm0, %v7772_v52, 0  ;;  %v2664_v12 = vsel %vm1436_vm0, %v7778_v16, 0 }
 0x792   : > { %v6382_v27 = vpop.eup %6381 }
 0x793   : > { %v2176_v3 = vmul.f32 %v6382_v27, %v7688_v18  ;;  %v6384_v19 = vpop.eup %6383  ;;  %5854 = vmatmul.mubr.bf16.gmra.mxu0 %v2185_v7  ;;  %v2667_v27 = vsel %vm1436_vm0, %v7774_v24, 0 }
 0x794   : > { %v7794_v53 = vpop.permute.xlu1 %2611  ;;  %v7796_v33 = vpop.permute.xlu0 %2613  ;;  %v2179_v30 = vmul.f32 %v6384_v19, %v7682_v1 }
 0x795   : > { %v2186_v17 = vpack.c.bf16 %v2177_v55, %v2176_v3  ;;  %v2652_v55 = vsel %vm1436_vm0, %v7794_v53, 0 }
 0x796   : > { %v6386_v50 = vpop.eup %6385 }
 0x797   : > { %5857 = vmatprep.mubr.bf16.mxu0 %v2186_v17  ;;  %v2178_v62 = vmul.f32 %v6386_v50, %v7691_v2 }
 0x798   : > { %v7800_v14 = vpop.permute.xlu1 %2597  ;;  %v7802_v20 = vpop.permute.xlu0 %2595 }
 0x799   : > { %v2187_v18 = vpack.c.bf16 %v2179_v30, %v2178_v62 }
 0x79b   : > { %5858 = vmatmul.mubr.bf16.gmra.mxu0 %v2187_v18 }
 0x79c   : > { %v7804_v23 = vpop.permute.xlu1 %2601  ;;  %v7806_v60 = vpop.permute.xlu0 %2599 }
 0x7a0   : > { %v7808_v28 = vpop.permute.xlu1 %2605  ;;  %v7810_v58 = vpop.permute.xlu0 %2603 }
 0x7a4   : > { %v7812_v49 = vpop.permute.xlu1 %2609  ;;  %v7814_v10 = vpop.permute.xlu0 %2607 }
 0x7a8   : > { %v7816_v2 = vpop.permute.xlu1 %3234  ;;  %v7818_v1 = vpop.permute.xlu0 %3236 }
 0x7ac   : > { %v7820_v42 = vpop.permute.xlu1 %3230  ;;  %v7822_v26 = vpop.permute.xlu0 %3232 }
 0x7b0   : > { %v7824_v63 = vpop.permute.xlu1 %3226  ;;  %v7826_v6 = vpop.permute.xlu0 %3228 }
 0x7b4   : > { %v7828_v34 = vpop.permute.xlu1 %3222  ;;  %v7830_v25 = vpop.permute.xlu0 %3224 }
 0x7b8   : > { %v7832_v21 = vpop.permute.xlu1 %3208  ;;  %v7834_v57 = vpop.permute.xlu0 %3206 }
 0x7bc   : > { %v7836_v54 = vpop.permute.xlu1 %3212  ;;  %v7838_v48 = vpop.permute.xlu0 %3210 }
 0x7c0   : > { %v7840_v15 = vpop.permute.xlu1 %3216  ;;  %v7842_v5 = vpop.permute.xlu0 %3214 }
 0x7c4   : > { %v7844_v59 = vpop.permute.xlu1 %3220  ;;  %v7846_v45 = vpop.permute.xlu0 %3218 }
 0x7c8   : > { %v2939_v61 = vpop.permute.xlu0 %2938  ;;  %v2937_v47 = vpop.permute.xlu1 %2936 }
 0x7c9   : > { %5933 = vmatprep.subr.bf16.mxu1 %v2939_v61 }
 0x7ca   : > { %5934 = vmatpush3.bf16.msra.mxu1 %v2939_v61 }
 0x7cb   : > { %5935 = vmatprep.subr.bf16.mxu1 %v2937_v47 }
 0x7cc   : > { %v2935_v39 = vpop.permute.xlu0 %2934 }
 0x7ce   : > { %5936 = vmatpush3.bf16.msra.mxu1 %v2937_v47 }
 0x7cf   : > { %5937 = vmatprep.subr.bf16.mxu1 %v2935_v39 }
 0x7d2   : > { %5938 = vmatpush3.bf16.msra.mxu1 %v2935_v39 }
 0x80f   : > { %v5847_v38 = vpop.f32.mrf.mxu0 }
 0x811   : > { %v2254_v0 = vpop.f32.mrf.mxu0 }
 0x813   : > { %v5848_v13 = vpop.f32.mrf.mxu0 }
 0x814   : > { %v2318_v44 = vpack.c.bf16 %v5848_v13, %v5847_v38 }
 0x815   : > { %v2257_v37 = vpop.f32.mrf.mxu0 }
 0x816   : > { %v2317_v32 = vpack.c.bf16 %v2257_v37, %v2254_v0  ;;  %v3284_v37 = vsel %vm1436_vm0, %v7818_v1, 0 }
 0x818   : > { %5865 = vmatprep.mubr.msk.bf16.mxu0 %vm1436_vm0, %v2317_v32  ;;  %v3281_v32 = vsel %vm1436_vm0, %v7816_v2, 0 }
 0x819   : > { %5866 = vmatmul.mubr.msk.bf16.vlgmr.msra.gmra.mxu0 %vm1436_vm0, %v2318_v44 }
 0x81a   : > { %5902 = vmatpush3.bf16.xpose.msra.mxu0 %v2673_v43 }
 0x81b   : > { %6086 = vmatprep.subr.msk.bf16.mxu0 %vm1436_vm0, %v7772_v52  ;;  %v2661_v52 = vsel %vm1436_vm0, %v7788_v35, 0 }
 0x822   : > { %5904 = vmatpush3.bf16.xpose.msra.mxu0 %v2670_v36 }
 0x823   : > { %6087 = vmatprep.subr.msk.bf16.mxu0 %vm1436_vm0, %v7774_v24  ;;  %v2658_v24 = vsel %vm1436_vm0, %v7786_v56, 0 }
 0x82a   : > { %5906 = vmatpush3.bf16.xpose.msra.mxu0 %v2667_v27 }
 0x82b   : > { %6088 = vmatprep.subr.msk.bf16.mxu0 %vm1436_vm0, %v7778_v16  ;;  %v2655_v16 = vsel %vm1436_vm0, %v7796_v33, 0 }
 0x832   : > { %5908 = vmatpush3.bf16.xpose.msra.mxu0 %v2664_v12 }
 0x833   : > { %6089 = vmatprep.subr.msk.bf16.mxu0 %vm1436_vm0, %v7788_v35 }
 0x83a   : > { %5910 = vmatpush3.bf16.xpose.msra.mxu0 %v2661_v52 }
 0x83b   : > { %6090 = vmatprep.subr.msk.bf16.mxu0 %vm1436_vm0, %v7786_v56 }
 0x842   : > { %5912 = vmatpush3.bf16.xpose.msra.mxu0 %v2658_v24 }
 0x843   : > { %6091 = vmatprep.subr.msk.bf16.mxu0 %vm1436_vm0, %v7796_v33 }
 0x84a   : > { %5914 = vmatpush3.bf16.xpose.msra.mxu0 %v2655_v16 }
 0x84b   : > { %6092 = vmatprep.subr.msk.bf16.mxu0 %vm1436_vm0, %v7794_v53  ;;  %v5851_v7 = vpop.f32.mrf.mxu0 }
 0x84d   : > { %v2270_v35 = vpop.f32.mrf.mxu0 }
 0x84f   : > { %v5852_v3 = vpop.f32.mrf.mxu0 }
 0x850   : > { %v2320_v17 = vpack.c.bf16 %v5852_v3, %v5851_v7 }
 0x851   : > { %v2273_v19 = vpop.f32.mrf.mxu0 }
 0x852   : > { %5916 = vmatpush3.bf16.xpose.msra.mxu0 %v2652_v55  ;;  %v2319_v56 = vpack.c.bf16 %v2273_v19, %v2270_v35 }
 0x853   : > { %6093 = vmatprep.subr.msk.bf16.mxu0 %vm1436_vm0, %v7818_v1  ;;  %v5855_v50 = vpop.f32.mrf.mxu0 }
 0x854   : > { %5869 = vmatprep.mubr.msk.bf16.mxu0 %vm1436_vm0, %v2319_v56 }
 0x855   : > { %v2286_v33 = vpop.f32.mrf.mxu0  ;;  %5870 = vmatmul.mubr.msk.bf16.gmra.mxu0 %vm1436_vm0, %v2320_v17 }
 0x857   : > { %v5856_v62 = vpop.f32.mrf.mxu0 }
 0x858   : > { %v2322_v61 = vpack.c.bf16 %v5856_v62, %v5855_v50 }
 0x859   : > { %v2289_v30 = vpop.f32.mrf.mxu0 }
 0x85a   : > { %v2321_v18 = vpack.c.bf16 %v2289_v30, %v2286_v33 }
 0x85b   : > { %v5859_v47 = vpop.f32.mrf.mxu0 }
 0x85c   : > { %5873 = vmatprep.mubr.msk.bf16.mxu0 %vm1436_vm0, %v2321_v18 }
 0x85d   : > { %v2302_v53 = vpop.f32.mrf.mxu0  ;;  %5874 = vmatmul.mubr.msk.bf16.gmra.mxu0 %vm1436_vm0, %v2322_v61 }
 0x85f   : > { %v5860_v39 = vpop.f32.mrf.mxu0 }
 0x860   : > { %v2324_v13 = vpack.c.bf16 %v5860_v39, %v5859_v47 }
 0x861   : > { %v2305_v38 = vpop.f32.mrf.mxu0 }
 0x862   : > { %v2323_v0 = vpack.c.bf16 %v2305_v38, %v2302_v53 }
 0x864   : > { %5877 = vmatprep.mubr.msk.bf16.mxu0 %vm1436_vm0, %v2323_v0 }
 0x865   : > { %5878 = vmatmul.mubr.msk.bf16.gmra.mxu0 %vm1436_vm0, %v2324_v13 }
 0x866   : > { %5917 = vmatprep.mubr.msk.bf16.mxu0 %vm1436_vm0, %v7802_v20  ;;  %v3275_v20 = vsel %vm1436_vm0, %v7820_v42, 0 }
 0x86d   : > { %5918 = vmatmul.mubr.msk.bf16.vlgmr.msra.gmra.mxu0 %vm1436_vm0, %v7800_v14  ;;  %v3278_v14 = vsel %vm1436_vm0, %v7822_v26, 0 }
 0x86e   : > { %5986 = vmatpush3.bf16.xpose.msra.mxu0 %v3284_v37  ;;  %5921 = vmatprep.mubr.msk.bf16.mxu0 %vm1436_vm0, %v7806_v60  ;;  %v3269_v60 = vsel %vm1436_vm0, %v7824_v63, 0 }
 0x86f   : > { %6094 = vmatprep.subr.msk.bf16.mxu0 %vm1436_vm0, %v7816_v2 }
 0x875   : > { %5922 = vmatmul.mubr.msk.bf16.gmra.mxu0 %vm1436_vm0, %v7804_v23  ;;  %v3272_v23 = vsel %vm1436_vm0, %v7826_v6, 0 }
 0x876   : > { %5988 = vmatpush3.bf16.xpose.msra.mxu0 %v3281_v32  ;;  %5925 = vmatprep.mubr.msk.bf16.mxu0 %vm1436_vm0, %v7810_v58  ;;  %v3263_v58 = vsel %vm1436_vm0, %v7828_v34, 0 }
 0x877   : > { %6095 = vmatprep.subr.msk.bf16.mxu0 %vm1436_vm0, %v7822_v26 }
 0x87d   : > { %5926 = vmatmul.mubr.msk.bf16.gmra.mxu0 %vm1436_vm0, %v7808_v28  ;;  %v3266_v28 = vsel %vm1436_vm0, %v7830_v25, 0 }
 0x87e   : > { %5990 = vmatpush3.bf16.xpose.msra.mxu0 %v3278_v14  ;;  %5929 = vmatprep.mubr.msk.bf16.mxu0 %vm1436_vm0, %v7814_v10 }
 0x87f   : > { %6096 = vmatprep.subr.msk.bf16.mxu0 %vm1436_vm0, %v7820_v42 }
 0x885   : > { %5930 = vmatmul.mubr.msk.bf16.gmra.mxu0 %vm1436_vm0, %v7812_v49 }
 0x886   : > { %5992 = vmatpush3.bf16.xpose.msra.mxu0 %v3275_v20  ;;  %6001 = vmatprep.mubr.msk.bf16.mxu0 %vm1436_vm0, %v7834_v57 }
 0x887   : > { %6097 = vmatprep.subr.msk.bf16.mxu0 %vm1436_vm0, %v7826_v6 }
 0x88e   : > { %5994 = vmatpush3.bf16.xpose.msra.mxu0 %v3272_v23 }
 0x88f   : > { %6098 = vmatprep.subr.msk.bf16.mxu0 %vm1436_vm0, %v7824_v63 }
 0x896   : > { %5996 = vmatpush3.bf16.xpose.msra.mxu0 %v3269_v60 }
 0x897   : > { %6099 = vmatprep.subr.msk.bf16.mxu0 %vm1436_vm0, %v7830_v25 }
 0x89e   : > { %5998 = vmatpush3.bf16.xpose.msra.mxu0 %v3266_v28 }
 0x89f   : > { %6100 = vmatprep.subr.msk.bf16.mxu0 %vm1436_vm0, %v7828_v34 }
 0x8a6   : > { %6000 = vmatpush3.bf16.xpose.msra.mxu0 %v3263_v58 }
 0x8ad   : > { %6002 = vmatmul.mubr.msk.bf16.vlgmr.msra.gmra.mxu0 %vm1436_vm0, %v7832_v21 }
 0x8ae   : > { %6005 = vmatprep.mubr.msk.bf16.mxu0 %vm1436_vm0, %v7838_v48 }
 0x8b5   : > { %6006 = vmatmul.mubr.msk.bf16.gmra.mxu0 %vm1436_vm0, %v7836_v54 }
 0x8b6   : > { %6009 = vmatprep.mubr.msk.bf16.mxu0 %vm1436_vm0, %v7842_v5 }
 0x8bd   : > { %6010 = vmatmul.mubr.msk.bf16.gmra.mxu0 %vm1436_vm0, %v7840_v15 }
 0x8be   : > { %6013 = vmatprep.mubr.msk.bf16.mxu0 %vm1436_vm0, %v7846_v45  ;;  %v7984_v45 = vld [vmem:[%s7367_s24] ss:$0 sm:$0xff] }
 0x8c5   : > { %6014 = vmatmul.mubr.msk.bf16.gmra.mxu0 %vm1436_vm0, %v7844_v59 }
 0x8c6   : > { %4227 = vmatprep.mubr.bf16.mxu0 %v9276_v22 }
 0x8d9   : > { %v7951_v49 = vpop.f32.mrf.mxu0 }
 0x8db   : > { %v7953_v10 = vpop.f32.mrf.mxu0 }
 0x8dd   : > { %v7955_v2 = vpop.f32.mrf.mxu0 }
 0x8df   : > { %v7957_v1 = vpop.f32.mrf.mxu0 }
 0x915   : > { %v7959_v42 = vpop.f32.mrf.mxu0 }
 0x917   : > { %v7961_v26 = vpop.f32.mrf.mxu0 }
 0x919   : > { %v7963_v63 = vpop.f32.mrf.mxu0 }
 0x91b   : > { %v7965_v6 = vpop.f32.mrf.mxu0 }
 0x91d   : > { %v7967_v34 = vpop.f32.mrf.mxu0 }
 0x91f   : > { %v7969_v25 = vpop.f32.mrf.mxu0 }
 0x921   : > { %v7971_v21 = vpop.f32.mrf.mxu0 }
 0x923   : > { %v7973_v57 = vpop.f32.mrf.mxu0 }
 0x924   : > { %9314 = vst [vmem:[#allocation10_spill] sm:$0xff] %v7973_v57 }
 0x925   : > { %v7975_v54 = vpop.f32.mrf.mxu0 }
 0x926   : > { %9315 = vst [vmem:[#allocation11_spill] sm:$0xff] %v7975_v54 }
 0x927   : > { %v7977_v48 = vpop.f32.mrf.mxu0 }
 0x928   : > { %9316 = vst [vmem:[#allocation12_spill] sm:$0xff] %v7977_v48 }
 0x929   : > { %v7979_v15 = vpop.f32.mrf.mxu0 }
 0x92a   : > { %9317 = vst [vmem:[#allocation13_spill] sm:$0xff] %v7979_v15 }
 0x92b   : > { %v7981_v5 = vpop.f32.mrf.mxu0 }
 0x92c   : > { %9318 = vst [vmem:[#allocation14_spill] sm:$0xff] %v7981_v5 }
 0x92d   : > { %v5919_v59 = vpop.f32.mrf.mxu0 }
 0x92e   : > { %v2718_v44 = vadd.f32 %v7984_v45, %v5919_v59 }
 0x92f   : > { %v2709_v43 = vpop.f32.mrf.mxu0 }
 0x930   : > { %2776 = vmax.xlane.f32.xlu0 %v2718_v44  ;;  %v2710_v27 = vadd.f32 %v7984_v45, %v2709_v43 }
 0x931   : > { %v5920_v36 = vpop.f32.mrf.mxu0 }
 0x932   : > { %v2721_v16 = vadd.f32 %v7984_v45, %v5920_v36 }
 0x933   : > { %v2712_v12 = vpop.f32.mrf.mxu0 }
 0x934   : > { %v2713_v52 = vadd.f32 %v7984_v45, %v2712_v12  ;;  %2772 = vmax.xlane.f32.xlu0 %v2710_v27 }
 0x935   : > { %v5923_v24 = vpop.f32.mrf.mxu0 }
 0x936   : > { %2774 = vmax.xlane.f32.xlu1 %v2713_v52  ;;  %v2734_v55 = vadd.f32 %v7984_v45, %v5923_v24 }
 0x937   : > { %v2725_v7 = vpop.f32.mrf.mxu0 }
 0x938   : > { %v2726_v35 = vadd.f32 %v7984_v45, %v2725_v7  ;;  %2778 = vmax.xlane.f32.xlu0 %v2721_v16 }
 0x939   : > { %v5924_v3 = vpop.f32.mrf.mxu0 }
 0x93a   : > { %2780 = vmax.xlane.f32.xlu1 %v2726_v35  ;;  %v7993_v56 = vadd.f32 %v7984_v45, %v5924_v3 }
 0x93b   : > { %v2728_v19 = vpop.f32.mrf.mxu0 }
 0x93c   : > { %2784 = vmax.xlane.f32.xlu0 %v2734_v55  ;;  %v2729_v50 = vadd.f32 %v7984_v45, %v2728_v19 }
 0x93d   : > { %v5927_v17 = vpop.f32.mrf.mxu0 }
 0x93e   : > { %2786 = vmax.xlane.f32.xlu1 %v7993_v56  ;;  %v7998_v30 = vadd.f32 %v7984_v45, %v5927_v17 }
 0x93f   : > { %v2741_v33 = vpop.f32.mrf.mxu0 }
 0x940   : > { %2782 = vmax.xlane.f32.xlu0 %v2729_v50  ;;  %v8006_v53 = vadd.f32 %v7984_v45, %v2741_v33 }
 0x941   : > { %v5928_v62 = vpop.f32.mrf.mxu0 }
 0x942   : > { %v8001_v18 = vadd.f32 %v7984_v45, %v5928_v62 }
 0x943   : > { %v2744_v61 = vpop.f32.mrf.mxu0 }
 0x944   : > { %2792 = vmax.xlane.f32.xlu0 %v7998_v30  ;;  %2794 = vmax.xlane.f32.xlu1 %v8001_v18  ;;  %v8009_v39 = vadd.f32 %v7984_v45, %v2744_v61 }
 0x945   : > { %v5931_v47 = vpop.f32.mrf.mxu0 }
 0x946   : > { %v8014_v13 = vadd.f32 %v7984_v45, %v5931_v47 }
 0x947   : > { %v2757_v38 = vpop.f32.mrf.mxu0 }
 0x948   : > { %2790 = vmax.xlane.f32.xlu1 %v8009_v39  ;;  %2788 = vmax.xlane.f32.xlu0 %v8006_v53  ;;  %v8017_v37 = vadd.f32 %v7984_v45, %v2757_v38 }
 0x949   : > { %v5932_v0 = vpop.f32.mrf.mxu0 }
 0x94a   : > { %v8022_v14 = vadd.f32 %v7984_v45, %v5932_v0 }
 0x94b   : > { %v2760_v32 = vpop.f32.mrf.mxu0 }
 0x94c   : > { %2800 = vmax.xlane.f32.xlu0 %v8014_v13  ;;  %2796 = vmax.xlane.f32.xlu1 %v8017_v37  ;;  %v8025_v20 = vadd.f32 %v7984_v45, %v2760_v32 }
 0x950   : > { %2798 = vmax.xlane.f32.xlu0 %v8025_v20  ;;  %2802 = vmax.xlane.f32.xlu1 %v8022_v14 }
 0x961   : > { %2930 = vrot.lane.b32.xlu1 %v7238_v41, %s6702_s18 }
 0x965   : > { %2928 = vrot.lane.b32.xlu1 %v7256_v46, %s6702_s18 }
 0x966   : > { %2932 = vrot.lane.b32.xlu0 %v7229_v51, %s6702_s18 }
 0x9b9   : > { %v2777_v23 = vpop.xlane.xlu0 %2776 }
 0x9ba   : > { %v2806_v60 = vsub.f32 %v2718_v44, %v2777_v23 }
 0x9bc   : > { %v2824_v28 = vmul.f32 1.442695, %v2806_v60 }
 0x9bd   : > { %v2773_v58 = vpop.xlane.xlu0 %2772 }
 0x9be   : > { %6387 = vpow2.f32 %v2824_v28  ;;  %v2804_v59 = vsub.f32 %v2710_v27, %v2773_v58 }
 0x9bf   : > { %v2775_v43 = vpop.xlane.xlu1 %2774 }
 0x9c0   : > { %v2820_v36 = vmul.f32 1.442695, %v2804_v59  ;;  %v2805_v12 = vsub.f32 %v2713_v52, %v2775_v43 }
 0x9c1   : > { %v2779_v24 = vpop.xlane.xlu0 %2778 }
 0x9c2   : > { %6389 = vpow2.f32 %v2820_v36  ;;  %v2807_v7 = vsub.f32 %v2721_v16, %v2779_v24  ;;  %v2822_v17 = vmul.f32 1.442695, %v2805_v12 }
 0x9c3   : > { %v2781_v3 = vpop.xlane.xlu1 %2780 }
 0x9c4   : > { %v2826_v19 = vmul.f32 1.442695, %v2807_v7  ;;  %v2808_v33 = vsub.f32 %v2726_v35, %v2781_v3 }
 0x9c5   : > { %v2785_v62 = vpop.xlane.xlu0 %2784 }
 0x9c6   : > { %6391 = vpow2.f32 %v2826_v19  ;;  %v2810_v61 = vsub.f32 %v2734_v55, %v2785_v62  ;;  %v2828_v44 = vmul.f32 1.442695, %v2808_v33 }
 0x9c7   : > { %v2787_v47 = vpop.xlane.xlu1 %2786  ;;  %6393 = vpow2.f32 %v2822_v17 }
 0x9c8   : > { %v2832_v38 = vmul.f32 1.442695, %v2810_v61  ;;  %v2811_v27 = vsub.f32 %v7993_v56, %v2787_v47 }
 0x9c9   : > { %v2783_v0 = vpop.xlane.xlu0 %2782 }
 0x9ca   : > { %6395 = vpow2.f32 %v2832_v38  ;;  %v2809_v32 = vsub.f32 %v2729_v50, %v2783_v0  ;;  %v2834_v60 = vmul.f32 1.442695, %v2811_v27 }
 0x9cb   : > { %v8036_v52 = vpop.eup %6387  ;;  %6397 = vpow2.f32 %v2828_v44 }
 0x9cc   : > { %v2830_v23 = vmul.f32 1.442695, %v2809_v32  ;;  %2856 = vadd.xlane.f32.xlu1 %v8036_v52 }
 0x9cd   : > { %v2795_v16 = vpop.xlane.xlu1 %2794  ;;  %v2793_v35 = vpop.xlane.xlu0 %2792 }
 0x9ce   : > { %6399 = vpow2.f32 %v2830_v23  ;;  %v2814_v55 = vsub.f32 %v7998_v30, %v2793_v35  ;;  %v2815_v56 = vsub.f32 %v8001_v18, %v2795_v16 }
 0x9cf   : > { %v8040_v28 = vpop.eup %6389  ;;  %6401 = vpow2.f32 %v2834_v60 }
 0x9d0   : > { %2852 = vadd.xlane.f32.xlu1 %v8040_v28  ;;  %v2840_v50 = vmul.f32 1.442695, %v2814_v55  ;;  %v2842_v3 = vmul.f32 1.442695, %v2815_v56 }
 0x9d1   : > { %v2791_v58 = vpop.xlane.xlu1 %2790  ;;  %v2789_v59 = vpop.xlane.xlu0 %2788 }
 0x9d2   : > { %v2812_v43 = vsub.f32 %v8006_v53, %v2789_v59  ;;  %6403 = vpow2.f32 %v2840_v50  ;;  %v2813_v19 = vsub.f32 %v8009_v39, %v2791_v58  ;;  %v6003_v58 = vpop.f32.mrf.mxu0 }
 0x9d3   : > { %v8045_v36 = vpop.eup %6391 }
 0x9d4   : > { %v2836_v12 = vmul.f32 1.442695, %v2812_v43  ;;  %2858 = vadd.xlane.f32.xlu1 %v8045_v36  ;;  %v8048_v30 = vpop.eup %6393  ;;  %v2838_v38 = vmul.f32 1.442695, %v2813_v19  ;;  %v3320_v59 = vpop.f32.mrf.mxu0 }
 0x9d5   : > { %v2797_v24 = vpop.xlane.xlu1 %2796  ;;  %v2801_v7 = vpop.xlane.xlu0 %2800 }
 0x9d6   : > { %v2818_v17 = vsub.f32 %v8014_v13, %v2801_v7  ;;  %6405 = vpow2.f32 %v2836_v12  ;;  %v2816_v18 = vsub.f32 %v8017_v37, %v2797_v24  ;;  %v6004_v56 = vpop.f32.mrf.mxu0 }
 0x9d7   : > { %v8052_v33 = vpop.eup %6395  ;;  %6407 = vpow2.f32 %v2842_v3 }
 0x9d8   : > { %v2848_v53 = vmul.f32 1.442695, %v2818_v17  ;;  %2854 = vadd.xlane.f32.xlu1 %v8048_v30  ;;  %2864 = vadd.xlane.f32.xlu0 %v8052_v33  ;;  %v8057_v47 = vpop.eup %6397  ;;  %v2844_v39 = vmul.f32 1.442695, %v2816_v18  ;;  %v3323_v50 = vpop.f32.mrf.mxu0 }
 0x9d9   : > { %v2803_v62 = vpop.xlane.xlu1 %2802  ;;  %v2799_v61 = vpop.xlane.xlu0 %2798 }
 0x9da   : > { %6409 = vpow2.f32 %v2848_v53  ;;  %v6007_v43 = vpop.f32.mrf.mxu0  ;;  %v2817_v7 = vsub.f32 %v8025_v20, %v2799_v61  ;;  %v2819_v19 = vsub.f32 %v8022_v14, %v2803_v62  ;;  %v8105_v62 = vadd.f32 %v7984_v45, %v3320_v59 }
 0x9db   : > { %v8059_v44 = vpop.eup %6399  ;;  %6411 = vpow2.f32 %v2838_v38  ;;  %v8109_v61 = vadd.f32 %v7984_v45, %v3323_v50  ;;  %v8127_v50 = vadd.f32 %v7984_v45, %v6007_v43 }
 0x9dc   : > { %2860 = vadd.xlane.f32.xlu0 %v8057_v47  ;;  %2862 = vadd.xlane.f32.xlu1 %v8059_v44  ;;  %v8063_v0 = vpop.eup %6401  ;;  %6413 = vpow2.f32 %v2844_v39  ;;  %v3336_v12 = vpop.f32.mrf.mxu0  ;;  %v2846_v17 = vmul.f32 1.442695, %v2817_v7  ;;  %v2850_v53 = vmul.f32 1.442695, %v2819_v19 }
 0x9dd   : > { %v2931_v13 = vpop.permute.xlu1 %2930  ;;  %v2933_v37 = vpop.permute.xlu0 %2932 }
 0x9de   : > { %5939 = vmatprep.subr.bf16.mxu1 %v2933_v37  ;;  %v6008_v24 = vpop.f32.mrf.mxu0  ;;  %6415 = vpow2.f32 %v2846_v17 }
 0x9df   : > { %5940 = vmatpush3.bf16.msra.mxu1 %v2933_v37  ;;  %v8066_v27 = vpop.eup %6403  ;;  %6417 = vpow2.f32 %v2850_v53 }
 0x9e0   : > { %2866 = vadd.xlane.f32.xlu0 %v8063_v0  ;;  %5941 = vmatprep.subr.bf16.mxu1 %v2931_v13  ;;  %v3339_v3 = vpop.f32.mrf.mxu0 }
 0x9e1   : > { %v2929_v32 = vpop.permute.xlu1 %2928  ;;  %v8121_v59 = vadd.f32 %v7984_v45, %v3339_v3 }
 0x9e2   : > { %v6011_v18 = vpop.f32.mrf.mxu0 }
 0x9e3   : > { %5942 = vmatpush3.bf16.msra.mxu1 %v2931_v13  ;;  %v8068_v23 = vpop.eup %6405 }
 0x9e4   : > { %2872 = vadd.xlane.f32.xlu0 %v8066_v27  ;;  %5943 = vmatprep.subr.bf16.mxu1 %v2929_v32  ;;  %v8072_v16 = vpop.eup %6407  ;;  %v3352_v38 = vpop.f32.mrf.mxu0 }
 0x9e5   : > { %2868 = vadd.xlane.f32.xlu1 %v8068_v23 }
 0x9e6   : > { %v6012_v39 = vpop.f32.mrf.mxu0 }
 0x9e7   : > { %5944 = vmatpush3.bf16.msra.mxu1 %v2929_v32  ;;  %v8074_v35 = vpop.eup %6409  ;;  %v8093_v32 = vadd.f32 %v7984_v45, %v3336_v12  ;;  %v8113_v12 = vadd.f32 %v7984_v45, %v6003_v58  ;;  %v8133_v58 = vadd.f32 %v7984_v45, %v6008_v24 }
 0x9e8   : > { %2874 = vadd.xlane.f32.xlu0 %v8072_v16  ;;  %v8078_v60 = vpop.eup %6411  ;;  %v3355_v13 = vpop.f32.mrf.mxu0 }
 0x9e9   : > { %2880 = vadd.xlane.f32.xlu1 %v8074_v35  ;;  %v8080_v55 = vpop.eup %6413 }
 0x9ea   : > { %v6015_v9 = vpop.f32.mrf.mxu0 }
 0x9eb   : > { %v8090_v37 = vpop.eup %6415  ;;  %v8100_v14 = vadd.f32 %v7984_v45, %v6015_v9  ;;  %v8117_v9 = vadd.f32 %v7984_v45, %v6004_v56  ;;  %v8149_v56 = vadd.f32 %v7984_v45, %v6011_v18 }
 0x9ec   : > { %2870 = vadd.xlane.f32.xlu0 %v8078_v60  ;;  %v8097_v20 = vpop.eup %6417  ;;  %v3368_v43 = vpop.f32.mrf.mxu0 }
 0x9ed   : > { %2876 = vadd.xlane.f32.xlu1 %v8080_v55 }
 0x9ee   : > { %v6016_v24 = vpop.f32.mrf.mxu0 }
 0x9ef   : > { %v8165_v18 = vadd.f32 %v7984_v45, %v6016_v24 }
 0x9f0   : > { %v3371_v7 = vpop.f32.mrf.mxu0 }
 0x9f1   : > { %v8161_v19 = vadd.f32 %v7984_v45, %v3371_v7 }
 0x9fe   : > { %2924 = vrot.lane.b32.xlu1 %v7279_v29, %s6702_s18 }
 0xa02   : > { %2926 = vrot.lane.b32.xlu0 %v7269_v4, %s6702_s18 }
 0xa21   : > { %2878 = vadd.xlane.f32.xlu0 %v8090_v37 }
 0xa22   : > { %3391 = vmax.xlane.f32.xlu1 %v8093_v32 }
 0xa25   : > { %2882 = vadd.xlane.f32.xlu0 %v8097_v20 }
 0xa26   : > { %3411 = vmax.xlane.f32.xlu1 %v8100_v14 }
 0xa29   : > { %3383 = vmax.xlane.f32.xlu0 %v8105_v62 }
 0xa2d   : > { %3385 = vmax.xlane.f32.xlu0 %v8109_v61 }
 0xa31   : > { %3387 = vmax.xlane.f32.xlu0 %v8113_v12 }
 0xa35   : > { %3389 = vmax.xlane.f32.xlu0 %v8117_v9 }
 0xa37   : > { %3549 = vrot.lane.b32.xlu1 %v7202_v11, %s6703_s21  ;;  %v8139_v11 = vadd.f32 %v7984_v45, %v3352_v38 }
 0xa39   : > { %3393 = vmax.xlane.f32.xlu0 %v8121_v59 }
 0xa3b   : > { %3547 = vrot.lane.b32.xlu1 %v7207_v31, %s6703_s21  ;;  %v8145_v31 = vadd.f32 %v7984_v45, %v3355_v13 }
 0xa3d   : > { %3395 = vmax.xlane.f32.xlu0 %v8127_v50 }
 0xa3f   : > { %3543 = vrot.lane.b32.xlu1 %v7229_v51, %s6703_s21  ;;  %v8153_v51 = vadd.f32 %v7984_v45, %v6012_v39 }
 0xa41   : > { %3397 = vmax.xlane.f32.xlu0 %v8133_v58 }
 0xa43   : > { %3541 = vrot.lane.b32.xlu1 %v7238_v41, %s6703_s21  ;;  %v8157_v41 = vadd.f32 %v7984_v45, %v3368_v43 }
 0xa45   : > { %3399 = vmax.xlane.f32.xlu0 %v8139_v11 }
 0xa49   : > { %3401 = vmax.xlane.f32.xlu0 %v8145_v31 }
 0xa4d   : > { %3403 = vmax.xlane.f32.xlu0 %v8149_v56 }
 0xa51   : > { %3405 = vmax.xlane.f32.xlu0 %v8153_v51 }
 0xa55   : > { %v2857_v3 = vpop.xlane.xlu1 %2856  ;;  %3407 = vmax.xlane.f32.xlu0 %v8157_v41 }
 0xa59   : > { %v2853_v17 = vpop.xlane.xlu1 %2852  ;;  %3409 = vmax.xlane.f32.xlu0 %v8161_v19 }
 0xa5a   : > { %6419 = vrcp.f32 %v2853_v17 }
 0xa5d   : > { %v2859_v53 = vpop.xlane.xlu1 %2858  ;;  %3413 = vmax.xlane.f32.xlu0 %v8165_v18 }
 0xa61   : > { %v2855_v38 = vpop.xlane.xlu1 %2854  ;;  %v2865_v39 = vpop.xlane.xlu0 %2864 }
 0xa62   : > { %6421 = vrcp.f32 %v2855_v38 }
 0xa63   : > { %6423 = vrcp.f32 %v2859_v53 }
 0xa65   : > { %v2861_v13 = vpop.xlane.xlu0 %2860  ;;  %v2863_v43 = vpop.xlane.xlu1 %2862 }
 0xa66   : > { %6425 = vrcp.f32 %v2863_v43 }
 0xa67   : > { %v6420_v7 = vpop.eup %6419  ;;  %6427 = vrcp.f32 %v2861_v13 }
 0xa68   : > { %6429 = vrcp.f32 %v2857_v3  ;;  %v2900_v45 = vmul.f32 %v6420_v7, %v8040_v28 }
 0xa69   : > { %v2867_v22 = vpop.xlane.xlu0 %2866 }
 0xa6a   : > { %6431 = vrcp.f32 %v2867_v22 }
 0xa6b   : > { %6433 = vrcp.f32 %v2865_v39 }
 0xa6d   : > { %v2873_v8 = vpop.xlane.xlu0 %2872 }
 0xa6e   : > { %v2869_v5 = vpop.xlane.xlu1 %2868 }
 0xa6f   : > { %v6422_v15 = vpop.eup %6421 }
 0xa70   : > { %v2901_v24 = vmul.f32 %v6422_v15, %v8048_v30  ;;  %v6424_v3 = vpop.eup %6423 }
 0xa71   : > { %v2875_v48 = vpop.xlane.xlu0 %2874  ;;  %v2903_v22 = vmul.f32 %v6424_v3, %v8045_v36 }
 0xa72   : > { %v2881_v17 = vpop.xlane.xlu1 %2880  ;;  %v2916_v54 = vpack.c.bf16 %v2901_v24, %v2900_v45  ;;  %v6216_v45 = vld [vmem:[%s6849_s28 + $0x20] sm:$0xff]  }
 0xa73   : > { %3545 = vrot.lane.b32.xlu0 %v7212_v40, %s6703_s21  ;;  %v6426_v13 = vpop.eup %6425  ;;  %v6215_v40 = vld [vmem:[%s6849_s28 + $0x28] sm:$0xff]  }
 0xa74   : > { %5949 = vmatprep.mubr.bf16.mxu1 %v2916_v54  ;;  %v6428_v28 = vpop.eup %6427  ;;  %v2905_v39 = vmul.f32 %v6426_v13, %v8059_v44 }
 0xa75   : > { %v2871_v53 = vpop.xlane.xlu0 %2870  ;;  %v6430_v15 = vpop.eup %6429  ;;  %v2904_v54 = vmul.f32 %v6428_v28, %v8057_v47 }
 0xa76   : > { %v2877_v38 = vpop.xlane.xlu1 %2876  ;;  %6435 = vrcp.f32 %v2871_v53 }
 0xa77   : > { %6437 = vrcp.f32 %v2869_v5  ;;  %v2902_v5 = vmul.f32 %v6430_v15, %v8036_v52  ;;  %v6432_v24 = vpop.eup %6431  ;;  %v2918_v53 = vpack.c.bf16 %v2905_v39, %v2904_v54 }
 0xa78   : > { %6439 = vrcp.f32 %v2875_v48  ;;  %v6434_v57 = vpop.eup %6433  ;;  %v2907_v3 = vmul.f32 %v6432_v24, %v8063_v0 }
 0xa79   : > { %v2927_v43 = vpop.permute.xlu0 %2926  ;;  %6441 = vrcp.f32 %v2873_v8  ;;  %v2917_v7 = vpack.c.bf16 %v2903_v22, %v2902_v5  ;;  %v2906_v8 = vmul.f32 %v6434_v57, %v8052_v33 }
 0xa7a   : > { %5945 = vmatprep.subr.bf16.mxu1 %v2927_v43  ;;  %v2925_v30 = vpop.permute.xlu1 %2924  ;;  %6443 = vrcp.f32 %v2877_v38 }
 0xa7b   : > { %5946 = vmatpush3.bf16.msra.mxu1 %v2927_v43  ;;  %v2919_v44 = vpack.c.bf16 %v2907_v3, %v2906_v8 }
 0xa7c   : > { %5947 = vmatprep.subr.bf16.mxu1 %v2925_v30 }
 0xa7f   : > { %5948 = vmatpush3.bf16.msra.mxu1 %v2925_v30 }
 0xa80   : > { %5965 = vmatprep.subr.bf16.mxu1 %v6215_v40 }
 0xa82   : > { %5950 = vmatmul.mubr.bf16.vlgmr.msra.gmra.mxu1 %v2917_v7 }
 0xa83   : > { %v6436_v48 = vpop.eup %6435  ;;  %5953 = vmatprep.mubr.bf16.mxu1 %v2918_v53  ;;  %5966 = vmatpush3.bf16.msra.mxu1 %v6215_v40 }
 0xa84   : > { %v6438_v36 = vpop.eup %6437  ;;  %5967 = vmatprep.subr.bf16.mxu1 %v6216_v45  ;;  %v2909_v47 = vmul.f32 %v6436_v48, %v8078_v60 }
 0xa85   : > { %v2908_v52 = vmul.f32 %v6438_v36, %v8068_v23  ;;  %v6440_v13 = vpop.eup %6439 }
 0xa86   : > { %v6442_v28 = vpop.eup %6441  ;;  %v2911_v15 = vmul.f32 %v6440_v13, %v8072_v16 }
 0xa87   : > { %5968 = vmatpush3.bf16.msra.mxu1 %v6216_v45  ;;  %v2920_v43 = vpack.c.bf16 %v2909_v47, %v2908_v52  ;;  %v2910_v30 = vmul.f32 %v6442_v28, %v8066_v27  ;;  %v6444_v54 = vpop.eup %6443 }
 0xa88   : > { %v2912_v27 = vmul.f32 %v6444_v54, %v8080_v55 }
 0xa89   : > { %v2921_v22 = vpack.c.bf16 %v2911_v15, %v2910_v30 }
 0xa8a   : > { %5954 = vmatmul.mubr.bf16.gmra.mxu1 %v2919_v44 }
 0xa8b   : > { %5957 = vmatprep.mubr.bf16.mxu1 %v2920_v43 }
 0xa92   : > { %5958 = vmatmul.mubr.bf16.gmra.mxu1 %v2921_v22 }
 0xaaa   : > { %v2879_v0 = vpop.xlane.xlu0 %2878 }
 0xaab   : > { %v3392_v60 = vpop.xlane.xlu1 %3391  ;;  %6445 = vrcp.f32 %v2879_v0 }
 0xaac   : > { %6447 = vrcp.f32 %v2881_v17  ;;  %v3419_v44 = vsub.f32 %v8093_v32, %v3392_v60 }
 0xaae   : > { %v2883_v57 = vpop.xlane.xlu0 %2882  ;;  %v3439_v15 = vmul.f32 1.442695, %v3419_v44 }
 0xaaf   : > { %v8184_v33 = vpop.xlane.xlu1 %3411  ;;  %6449 = vrcp.f32 %v2883_v57 }
 0xab2   : > { %v3384_v23 = vpop.xlane.xlu0 %3383 }
 0xab3   : > { %v8186_v40 = vpop.permute.xlu1 %3549  ;;  %v3415_v17 = vsub.f32 %v8105_v62, %v3384_v23 }
 0xab4   : > { %6017 = vmatprep.subr.bf16.mxu1 %v8186_v40 }
 0xab5   : > { %v3431_v8 = vmul.f32 1.442695, %v3415_v17 }
 0xab6   : > { %v3386_v16 = vpop.xlane.xlu0 %3385 }
 0xab7   : > { %v3416_v52 = vsub.f32 %v8109_v61, %v3386_v16 }
 0xab8   : > { %v6446_v39 = vpop.eup %6445 }
 0xab9   : > { %v2913_v38 = vmul.f32 %v6446_v39, %v8090_v37  ;;  %v6448_v5 = vpop.eup %6447  ;;  %v3433_v13 = vmul.f32 1.442695, %v3416_v52 }
 0xaba   : > { %v3388_v7 = vpop.xlane.xlu0 %3387  ;;  %v2914_v36 = vmul.f32 %v6448_v5, %v8074_v35 }
 0xabb   : > { %v3417_v45 = vsub.f32 %v8113_v12, %v3388_v7  ;;  %v2922_v24 = vpack.c.bf16 %v2913_v38, %v2912_v27 }
 0xabc   : > { %v6450_v53 = vpop.eup %6449 }
 0xabd   : > { %v3435_v48 = vmul.f32 1.442695, %v3417_v45  ;;  %5961 = vmatprep.mubr.bf16.mxu1 %v2922_v24  ;;  %v2915_v3 = vmul.f32 %v6450_v53, %v8097_v20 }
 0xabe   : > { %v3390_v47 = vpop.xlane.xlu0 %3389 }
 0xabf   : > { %6451 = vpow2.f32 %v3435_v48  ;;  %v3418_v55 = vsub.f32 %v8117_v9, %v3390_v47  ;;  %v2923_v37 = vpack.c.bf16 %v2915_v3, %v2914_v36  ;;  %v8236_v36 = vpop.f32.mrf.mxu1 }
 0xac0   : > { %6453 = vpow2.f32 %v3431_v8 }
 0xac1   : > { %5962 = vmatmul.mubr.bf16.gmra.mxu1 %v2923_v37  ;;  %v3437_v12 = vmul.f32 1.442695, %v3418_v55  ;;  %v8241_v47 = vpop.f32.mrf.mxu1 }
 0xac2   : > { %v3394_v62 = vpop.xlane.xlu0 %3393 }
 0xac3   : > { %6455 = vpow2.f32 %v3437_v12  ;;  %v3420_v35 = vsub.f32 %v8121_v59, %v3394_v62 }
 0xac4   : > { %6457 = vpow2.f32 %v3433_v13 }
 0xac5   : > { %v3441_v30 = vmul.f32 1.442695, %v3420_v35 }
 0xac6   : > { %v3396_v43 = vpop.xlane.xlu0 %3395 }
 0xac7   : > { %v3421_v20 = vsub.f32 %v8127_v50, %v3396_v43 }
 0xac9   : > { %v3443_v28 = vmul.f32 1.442695, %v3421_v20 }
 0xaca   : > { %v3398_v9 = vpop.xlane.xlu0 %3397 }
 0xacb   : > { %6459 = vpow2.f32 %v3443_v28  ;;  %v3422_v61 = vsub.f32 %v8133_v58, %v3398_v9 }
 0xacc   : > { %v8201_v22 = vpop.eup %6451  ;;  %6461 = vpow2.f32 %v3439_v15 }
 0xacd   : > { %3467 = vadd.xlane.f32.xlu0 %v8201_v22  ;;  %6463 = vpow2.f32 %v3441_v30  ;;  %v3445_v32 = vmul.f32 1.442695, %v3422_v61  ;;  %v8204_v0 = vpop.eup %6453 }
 0xace   : > { %v3400_v54 = vpop.xlane.xlu0 %3399 }
 0xacf   : > { %6465 = vpow2.f32 %v3445_v32  ;;  %v3423_v38 = vsub.f32 %v8139_v11, %v3400_v54 }
 0xad0   : > { %v8207_v59 = vpop.eup %6455 }
 0xad1   : > { %3463 = vadd.xlane.f32.xlu0 %v8204_v0  ;;  %v8210_v50 = vpop.eup %6457  ;;  %v3447_v7 = vmul.f32 1.442695, %v3423_v38 }
 0xad2   : > { %v3402_v16 = vpop.xlane.xlu0 %3401 }
 0xad3   : > { %v3424_v45 = vsub.f32 %v8145_v31, %v3402_v16  ;;  %6467 = vpow2.f32 %v3447_v7 }
 0xad5   : > { %3469 = vadd.xlane.f32.xlu0 %v8207_v59  ;;  %v3449_v48 = vmul.f32 1.442695, %v3424_v45 }
 0xad6   : > { %v3404_v39 = vpop.xlane.xlu0 %3403 }
 0xad7   : > { %v3425_v17 = vsub.f32 %v8149_v56, %v3404_v39  ;;  %v3429_v56 = vsub.f32 %v8100_v14, %v8184_v33 }
 0xad8   : > { %v8212_v60 = vpop.eup %6459 }
 0xad9   : > { %3465 = vadd.xlane.f32.xlu0 %v8210_v50  ;;  %3475 = vadd.xlane.f32.xlu1 %v8212_v60  ;;  %v8216_v58 = vpop.eup %6461  ;;  %v3451_v53 = vmul.f32 1.442695, %v3425_v17  ;;  %v3459_v55 = vmul.f32 1.442695, %v3429_v56 }
 0xada   : > { %v8218_v57 = vpop.eup %6463  ;;  %v3406_v27 = vpop.xlane.xlu0 %3405 }
 0xadb   : > { %6469 = vpow2.f32 %v3451_v53 }
 0xadc   : > { %v8222_v23 = vpop.eup %6465  ;;  %6471 = vpow2.f32 %v3449_v48 }
 0xadd   : > { %3473 = vadd.xlane.f32.xlu0 %v8218_v57  ;;  %3471 = vadd.xlane.f32.xlu1 %v8216_v58 }
 0xade   : > { %v3408_v5 = vpop.xlane.xlu0 %3407 }
 0xae0   : > { %v8246_v52 = vpop.eup %6467 }
 0xae1   : > { %3477 = vadd.xlane.f32.xlu1 %v8222_v23 }
 0xae2   : > { %v3410_v24 = vpop.xlane.xlu0 %3409 }
 0xae3   : > { %v3428_v11 = vsub.f32 %v8161_v19, %v3410_v24 }
 0xae5   : > { %v3457_v8 = vmul.f32 1.442695, %v3428_v11 }
 0xae6   : > { %v3414_v3 = vpop.xlane.xlu0 %3413 }
 0xae8   : > { %v8251_v19 = vpop.eup %6469 }
 0xaf2   : > { %3537 = vrot.lane.b32.xlu1 %v7269_v4, %s6703_s21  ;;  %v3426_v4 = vsub.f32 %v8153_v51, %v3406_v27  ;;  %v3430_v51 = vsub.f32 %v8165_v18, %v3414_v3  ;;  %v8256_v18 = vpop.eup %6471 }
 0xaf3   : > { %3539 = vrot.lane.b32.xlu0 %v7256_v46, %s6703_s21  ;;  %v3427_v46 = vsub.f32 %v8157_v41, %v3408_v5  ;;  %v8244_v41 = vpop.f32.mrf.mxu1 }
 0xaf4   : > { %v3461_v37 = vmul.f32 1.442695, %v3430_v51 }
 0xaf5   : > { %v3455_v31 = vmul.f32 1.442695, %v3427_v46  ;;  %v8249_v14 = vpop.f32.mrf.mxu1 }
 0xaf6   : > { %3535 = vrot.lane.b32.xlu1 %v7279_v29, %s6703_s21  ;;  %v3453_v29 = vmul.f32 1.442695, %v3426_v4  ;;  %v3548_v4 = vpop.permute.xlu1 %3547 }
 0xaf7   : > { %v8253_v33 = vpop.f32.mrf.mxu1 }
 0xaf8   : > { %6473 = vpow2.f32 %v3453_v29  ;;  %v3546_v29 = vpop.permute.xlu0 %3545 }
 0xaf9   : > { %6475 = vpow2.f32 %v3455_v31  ;;  %v8260_v12 = vpop.f32.mrf.mxu1 }
 0xafa   : > { %6477 = vpow2.f32 %v3457_v8  ;;  %v3544_v31 = vpop.permute.xlu1 %3543 }
 0xafb   : > { %6479 = vpow2.f32 %v3459_v55  ;;  %v8268_v43 = vpop.f32.mrf.mxu1 }
 0xafc   : > { %6481 = vpow2.f32 %v3461_v37 }
 0xafd   : > { %v8276_v28 = vpop.f32.mrf.mxu1 }
 0xafe   : > { %v3542_v37 = vpop.permute.xlu1 %3541 }
 0xaff   : > { %v8280_v15 = vpop.f32.mrf.mxu1 }
 0xb01   : > { %v8282_v9 = vpop.f32.mrf.mxu1 }
 0xb03   : > { %v8284_v30 = vpop.f32.mrf.mxu1 }
 0xb05   : > { %v8258_v62 = vpop.eup %6473  ;;  %v8286_v61 = vpop.f32.mrf.mxu1 }
 0xb06   : > { %v8264_v44 = vpop.eup %6475 }
 0xb07   : > { %v8266_v13 = vpop.eup %6477  ;;  %v8288_v32 = vpop.f32.mrf.mxu1 }
 0xb08   : > { %v8272_v35 = vpop.eup %6479 }
 0xb09   : > { %v8274_v20 = vpop.eup %6481  ;;  %v8290_v54 = vpop.f32.mrf.mxu1 }
 0xb0b   : > { %v8292_v16 = vpop.f32.mrf.mxu1 }
 0xb0d   : > { %v8294_v39 = vpop.f32.mrf.mxu1 }
 0xb12   : > { %3479 = vadd.xlane.f32.xlu0 %v8246_v52 }
 0xb16   : > { %3483 = vadd.xlane.f32.xlu0 %v8251_v19 }
 0xb1a   : > { %3481 = vadd.xlane.f32.xlu1 %v8256_v18  ;;  %3485 = vadd.xlane.f32.xlu0 %v8258_v62 }
 0xb1e   : > { %3487 = vadd.xlane.f32.xlu1 %v8264_v44  ;;  %3489 = vadd.xlane.f32.xlu0 %v8266_v13 }
 0xb22   : > { %3491 = vadd.xlane.f32.xlu1 %v8272_v35  ;;  %3493 = vadd.xlane.f32.xlu0 %v8274_v20 }
 0xb42   : > { %v5951_v27 = vpop.f32.mrf.mxu1 }
 0xb44   : > { %v2982_v38 = vpop.f32.mrf.mxu1 }
 0xb46   : > { %v5952_v5 = vpop.f32.mrf.mxu1 }
 0xb47   : > { %v3046_v45 = vpack.c.bf16 %v5952_v5, %v5951_v27 }
 0xb48   : > { %v2985_v7 = vpop.f32.mrf.mxu1 }
 0xb49   : > { %v3045_v17 = vpack.c.bf16 %v2985_v7, %v2982_v38 }
 0xb4a   : > { %v5955_v24 = vpop.f32.mrf.mxu1 }
 0xb4b   : > { %5969 = vmatprep.mubr.msk.bf16.mxu1 %vm1436_vm0, %v3045_v17 }
 0xb4c   : > { %v2998_v53 = vpop.f32.mrf.mxu1  ;;  %5970 = vmatmul.mubr.msk.bf16.vlgmr.msra.gmra.mxu1 %vm1436_vm0, %v3046_v45 }
 0xb4d   : > { %6018 = vmatpush3.bf16.msra.mxu1 %v8186_v40 }
 0xb4e   : > { %6019 = vmatprep.subr.bf16.mxu1 %v3548_v4  ;;  %v5956_v48 = vpop.f32.mrf.mxu1 }
 0xb4f   : > { %v3048_v3 = vpack.c.bf16 %v5956_v48, %v5955_v24 }
 0xb50   : > { %v3001_v46 = vpop.f32.mrf.mxu1 }
 0xb51   : > { %v3047_v11 = vpack.c.bf16 %v3001_v46, %v2998_v53  ;;  %6020 = vmatpush3.bf16.msra.mxu1 %v3548_v4 }
 0xb52   : > { %6021 = vmatprep.subr.bf16.mxu1 %v3546_v29  ;;  %v5959_v56 = vpop.f32.mrf.mxu1 }
 0xb53   : > { %5973 = vmatprep.mubr.msk.bf16.mxu1 %vm1436_vm0, %v3047_v11 }
 0xb54   : > { %v3014_v8 = vpop.f32.mrf.mxu1  ;;  %5974 = vmatmul.mubr.msk.bf16.gmra.mxu1 %vm1436_vm0, %v3048_v3 }
 0xb55   : > { %6022 = vmatpush3.bf16.msra.mxu1 %v3546_v29 }
 0xb56   : > { %6023 = vmatprep.subr.bf16.mxu1 %v3544_v31  ;;  %v5960_v51 = vpop.f32.mrf.mxu1  ;;  %v3468_v55 = vpop.xlane.xlu0 %3467 }
 0xb57   : > { %v3050_v38 = vpack.c.bf16 %v5960_v51, %v5959_v56 }
 0xb58   : > { %v3017_v40 = vpop.f32.mrf.mxu1 }
 0xb59   : > { %v3049_v27 = vpack.c.bf16 %v3017_v40, %v3014_v8  ;;  %6024 = vmatpush3.bf16.msra.mxu1 %v3544_v31 }
 0xb5a   : > { %6025 = vmatprep.subr.bf16.mxu1 %v3542_v37  ;;  %v3464_v5 = vpop.xlane.xlu0 %3463 }
 0xb5b   : > { %5977 = vmatprep.mubr.msk.bf16.mxu1 %vm1436_vm0, %v3049_v27 }
 0xb5c   : > { %5978 = vmatmul.mubr.msk.bf16.gmra.mxu1 %vm1436_vm0, %v3050_v38 }
 0xb5d   : > { %6026 = vmatpush3.bf16.msra.mxu1 %v3542_v37 }
 0xb5e   : > { %v3470_v7 = vpop.xlane.xlu0 %3469 }
 0xb62   : > { %v3476_v17 = vpop.xlane.xlu1 %3475  ;;  %v3466_v45 = vpop.xlane.xlu0 %3465 }
 0xb63   : > { %6483 = vrcp.f32 %v3466_v45 }
 0xb64   : > { %6485 = vrcp.f32 %v3464_v5 }
 0xb65   : > { %6487 = vrcp.f32 %v3470_v7 }
 0xb66   : > { %v3472_v24 = vpop.xlane.xlu1 %3471  ;;  %v3474_v53 = vpop.xlane.xlu0 %3473 }
 0xb67   : > { %6489 = vrcp.f32 %v3472_v24 }
 0xb68   : > { %6491 = vrcp.f32 %v3474_v53 }
 0xb69   : > { %6493 = vrcp.f32 %v3468_v55 }
 0xb6a   : > { %v3478_v4 = vpop.xlane.xlu1 %3477  ;;  %v3540_v48 = vpop.permute.xlu0 %3539 }
 0xb6b   : > { %6027 = vmatprep.subr.bf16.mxu1 %v3540_v48  ;;  %6495 = vrcp.f32 %v3478_v4 }
 0xb6c   : > { %6028 = vmatpush3.bf16.msra.mxu1 %v3540_v48  ;;  %6497 = vrcp.f32 %v3476_v17 }
 0xb6e   : > { %v3538_v46 = vpop.permute.xlu1 %3537 }
 0xb6f   : > { %6029 = vmatprep.subr.bf16.mxu1 %v3538_v46 }
 0xb70   : > { %6030 = vmatpush3.bf16.msra.mxu1 %v3538_v46  ;;  %v6484_v3 = vpop.eup %6483 }
 0xb71   : > { %v6486_v31 = vpop.eup %6485  ;;  %v3512_v51 = vmul.f32 %v6484_v3, %v8210_v50 }
 0xb72   : > { %v3536_v29 = vpop.permute.xlu1 %3535  ;;  %v3511_v27 = vmul.f32 %v6486_v31, %v8204_v0  ;;  %v6488_v38 = vpop.eup %6487 }
 0xb73   : > { %6031 = vmatprep.subr.bf16.mxu1 %v3536_v29  ;;  %v3514_v53 = vmul.f32 %v6488_v38, %v8207_v59 }
 0xb74   : > { %6032 = vmatpush3.bf16.msra.mxu1 %v3536_v29  ;;  %v6490_v5 = vpop.eup %6489  ;;  %v3527_v7 = vpack.c.bf16 %v3512_v51, %v3511_v27 }
 0xb75   : > { %v6492_v55 = vpop.eup %6491  ;;  %v3515_v50 = vmul.f32 %v6490_v5, %v8216_v58 }
 0xb76   : > { %v6494_v24 = vpop.eup %6493  ;;  %v3516_v17 = vmul.f32 %v6492_v55, %v8218_v57 }
 0xb77   : > { %v3513_v4 = vmul.f32 %v6494_v24, %v8201_v22  ;;  %v6217_v22 = vld [vmem:[%s6849_s28 + $0x38] sm:$0xff]  }
 0xb78   : > { %v6496_v48 = vpop.eup %6495  ;;  %v3529_v46 = vpack.c.bf16 %v3516_v17, %v3515_v50  ;;  %6049 = vmatprep.subr.bf16.mxu1 %v6217_v22 }
 0xb79   : > { %v3528_v0 = vpack.c.bf16 %v3514_v53, %v3513_v4  ;;  %v6498_v29 = vpop.eup %6497 }
 0xb7a   : > { %v3517_v3 = vmul.f32 %v6498_v29, %v8212_v60  ;;  %v6218_v29 = vld [vmem:[%s6849_s28 + $0x30] sm:$0xff]  }
 0xb81   : > { %v5963_v11 = vpop.f32.mrf.mxu1 }
 0xb83   : > { %v3030_v56 = vpop.f32.mrf.mxu1 }
 0xb85   : > { %v5964_v8 = vpop.f32.mrf.mxu1 }
 0xb86   : > { %v3052_v45 = vpack.c.bf16 %v5964_v8, %v5963_v11  ;;  %v3518_v11 = vmul.f32 %v6496_v48, %v8222_v23 }
 0xb87   : > { %v3033_v40 = vpop.f32.mrf.mxu1 }
 0xb88   : > { %v3051_v37 = vpack.c.bf16 %v3033_v40, %v3030_v56  ;;  %v3530_v56 = vpack.c.bf16 %v3518_v11, %v3517_v3  ;;  %v2541_v11 = vadd.f32 %v8236_v36, %v7951_v49  ;;  %v2557_v49 = vadd.f32 %v8253_v33, %v7959_v42 }
 0xb89   : > { %v2573_v33 = vadd.f32 %v8280_v15, %v7967_v34 }
 0xb8a   : > { %5981 = vmatprep.mubr.msk.bf16.mxu1 %vm1436_vm0, %v3051_v37 }
 0xb8b   : > { %5982 = vmatmul.mubr.msk.bf16.gmra.mxu1 %vm1436_vm0, %v3052_v45 }
 0xb8c   : > { %6033 = vmatprep.mubr.bf16.mxu1 %v3527_v7 }
 0xb93   : > { %6034 = vmatmul.mubr.bf16.vlgmr.msra.gmra.mxu1 %v3528_v0 }
 0xb94   : > { %6037 = vmatprep.mubr.bf16.mxu1 %v3529_v46  ;;  %6050 = vmatpush3.bf16.msra.mxu1 %v6217_v22 }
 0xb95   : > { %6051 = vmatprep.subr.bf16.mxu1 %v6218_v29 }
 0xb98   : > { %6052 = vmatpush3.bf16.msra.mxu1 %v6218_v29 }
 0xb9b   : > { %6038 = vmatmul.mubr.bf16.gmra.mxu1 %v3530_v56  ;;  %v3480_v59 = vpop.xlane.xlu0 %3479 }
 0xb9c   : > { %6499 = vrcp.f32 %v3480_v59 }
 0xb9f   : > { %v3484_v31 = vpop.xlane.xlu0 %3483 }
 0xba0   : > { %6501 = vrcp.f32 %v3484_v31  ;;  %v2536_v31 = vadd.f32 %v8249_v14, %v7957_v1  ;;  %v2552_v14 = vadd.f32 %v8276_v28, %v7965_v6  ;;  %v9319_v28 = vld [vmem:[#allocation10_spill] sm:$0xff] }
 0xba3   : > { %v3482_v58 = vpop.xlane.xlu1 %3481  ;;  %v3486_v57 = vpop.xlane.xlu0 %3485 }
 0xba4   : > { %6503 = vrcp.f32 %v3482_v58 }
 0xba5   : > { %6505 = vrcp.f32 %v3486_v57 }
 0xba7   : > { %v3488_v8 = vpop.xlane.xlu1 %3487  ;;  %v3490_v51 = vpop.xlane.xlu0 %3489 }
 0xba8   : > { %6507 = vrcp.f32 %v3488_v8 }
 0xba9   : > { %6509 = vrcp.f32 %v3490_v51  ;;  %v6500_v60 = vpop.eup %6499 }
 0xbaa   : > { %v3519_v45 = vmul.f32 %v6500_v60, %v8246_v52 }
 0xbab   : > { %v3492_v23 = vpop.xlane.xlu1 %3491  ;;  %v3494_v40 = vpop.xlane.xlu0 %3493 }
 0xbac   : > { %6511 = vrcp.f32 %v3492_v23 }
 0xbad   : > { %6513 = vrcp.f32 %v3494_v40  ;;  %v6502_v37 = vpop.eup %6501 }
 0xbae   : > { %v3521_v7 = vmul.f32 %v6502_v37, %v8251_v19  ;;  %v2568_v37 = vadd.f32 %v8286_v61, %v9319_v28 }
 0xbb1   : > { %v6504_v27 = vpop.eup %6503 }
 0xbb2   : > { %v6506_v38 = vpop.eup %6505  ;;  %v3520_v5 = vmul.f32 %v6504_v27, %v8256_v18 }
 0xbb3   : > { %v3522_v55 = vmul.f32 %v6506_v38, %v8258_v62  ;;  %v9320_v38 = vld [vmem:[#allocation11_spill] sm:$0xff] }
 0xbb4   : > { %v3531_v24 = vpack.c.bf16 %v3520_v5, %v3519_v45  ;;  %v9321_v45 = vld [vmem:[#allocation12_spill] sm:$0xff] }
 0xbb5   : > { %v6508_v53 = vpop.eup %6507  ;;  %v3532_v50 = vpack.c.bf16 %v3522_v55, %v3521_v7  ;;  %v2581_v5 = vadd.f32 %v8290_v54, %v9321_v45 }
 0xbb6   : > { %v6510_v17 = vpop.eup %6509  ;;  %6041 = vmatprep.mubr.bf16.mxu1 %v3531_v24  ;;  %v3523_v4 = vmul.f32 %v6508_v53, %v8264_v44  ;;  %v9323_v53 = vld [vmem:[#allocation14_spill] sm:$0xff] }
 0xbb7   : > { %6042 = vmatmul.mubr.bf16.gmra.mxu1 %v3532_v50  ;;  %v3524_v0 = vmul.f32 %v6510_v17, %v8266_v13  ;;  %v2533_v13 = vadd.f32 %v8241_v47, %v7953_v10  ;;  %v2549_v47 = vadd.f32 %v8260_v12, %v7961_v26  ;;  %v2565_v12 = vadd.f32 %v8282_v9, %v7969_v25 }
 0xbb8   : > { %v2589_v25 = vadd.f32 %v8288_v32, %v9320_v38  ;;  %v2584_v50 = vadd.f32 %v8294_v39, %v9323_v53 }
 0xbb9   : > { %v6512_v48 = vpop.eup %6511  ;;  %v3533_v46 = vpack.c.bf16 %v3524_v0, %v3523_v4 }
 0xbba   : > { %v6514_v52 = vpop.eup %6513  ;;  %v3525_v18 = vmul.f32 %v6512_v48, %v8272_v35  ;;  %v2544_v35 = vadd.f32 %v8244_v41, %v7955_v2  ;;  %v2560_v41 = vadd.f32 %v8268_v43, %v7963_v63  ;;  %v2576_v43 = vadd.f32 %v8284_v30, %v7971_v21  ;;  %v9322_v30 = vld [vmem:[#allocation13_spill] sm:$0xff] }
 0xbbb   : > { %6045 = vmatprep.mubr.bf16.mxu1 %v3533_v46  ;;  %v3526_v19 = vmul.f32 %v6514_v52, %v8274_v20  ;;  %v2592_v55 = vadd.f32 %v8292_v16, %v9322_v30 }
 0xbbd   : > { %v3534_v62 = vpack.c.bf16 %v3526_v19, %v3525_v18 }
 0xbbf   : > { %6046 = vmatmul.mubr.bf16.gmra.mxu1 %v3534_v62 }
 0xc0c   : > { %v5971_v44 = vpop.f32.mrf.mxu1 }
 0xc0d   : > { %v8327_v3 = vadd.f32 %v5971_v44, %v2541_v11 }
 0xc0e   : > { %v3127_v56 = vpop.f32.mrf.mxu1 }
 0xc0f   : > { %v8331_v59 = vadd.f32 %v3127_v56, %v2533_v13 }
 0xc10   : > { %v5972_v20 = vpop.f32.mrf.mxu1 }
 0xc11   : > { %v8335_v58 = vadd.f32 %v5972_v20, %v2544_v35 }
 0xc12   : > { %v3130_v57 = vpop.f32.mrf.mxu1 }
 0xc13   : > { %v8339_v36 = vadd.f32 %v3130_v57, %v2536_v31 }
 0xc14   : > { %v5975_v10 = vpop.f32.mrf.mxu1 }
 0xc15   : > { %v8343_v22 = vadd.f32 %v5975_v10, %v2557_v49 }
 0xc16   : > { %v3143_v2 = vpop.f32.mrf.mxu1 }
 0xc17   : > { %v8347_v8 = vadd.f32 %v3143_v2, %v2549_v47 }
 0xc18   : > { %v5976_v1 = vpop.f32.mrf.mxu1 }
 0xc19   : > { %v8351_v51 = vadd.f32 %v5976_v1, %v2560_v41 }
 0xc1a   : > { %v3146_v42 = vpop.f32.mrf.mxu1 }
 0xc1b   : > { %v8355_v23 = vadd.f32 %v3146_v42, %v2552_v14 }
 0xc1c   : > { %v5979_v26 = vpop.f32.mrf.mxu1 }
 0xc1d   : > { %v8359_v40 = vadd.f32 %v5979_v26, %v2573_v33  ;;  %v8402_v26 = vld [vmem:[%s9324_s0] ss:$0 sm:$0xff] }
 0xc1e   : > { %v3159_v63 = vpop.f32.mrf.mxu1 }
 0xc1f   : > { %v8363_v60 = vadd.f32 %v3159_v63, %v2565_v12 }
 0xc20   : > { %v5980_v6 = vpop.f32.mrf.mxu1 }
 0xc21   : > { %v8367_v27 = vadd.f32 %v5980_v6, %v2576_v43 }
 0xc22   : > { %v3162_v34 = vpop.f32.mrf.mxu1 }
 0xc23   : > { %v8369_v15 = vadd.f32 %v3162_v34, %v2568_v37  ;;  %v6644_v37 = vld [vmem:[%s6895_s11] sm:$0xff] }
 0xc4b   : > { %v5983_v9 = vpop.f32.mrf.mxu1 }
 0xc4c   : > { %v8375_v7 = vadd.f32 %v5983_v9, %v2589_v25 }
 0xc4d   : > { %v3175_v21 = vpop.f32.mrf.mxu1 }
 0xc4e   : > { %v8379_v24 = vadd.f32 %v3175_v21, %v2581_v5  ;;  %v6645_v5 = vld [vmem:[%s6895_s11 + $0x10] sm:$0xff] }
 0xc4f   : > { %v5984_v61 = vpop.f32.mrf.mxu1 }
 0xc50   : > { %v8383_v17 = vadd.f32 %v5984_v61, %v2592_v55 }
 0xc51   : > { %v3178_v4 = vpop.f32.mrf.mxu1 }
 0xc52   : > { %v8385_v32 = vadd.f32 %v3178_v4, %v2584_v50 }
 0xc53   : > { %v6035_v0 = vpop.f32.mrf.mxu1 }
 0xc55   : > { %v3593_v48 = vpop.f32.mrf.mxu1 }
 0xc57   : > { %v6036_v54 = vpop.f32.mrf.mxu1 }
 0xc58   : > { %v3657_v18 = vpack.c.bf16 %v6036_v54, %v6035_v0 }
 0xc59   : > { %v3596_v46 = vpop.f32.mrf.mxu1 }
 0xc5a   : > { %v3656_v52 = vpack.c.bf16 %v3596_v46, %v3593_v48  ;;  %v6648_v48 = vld [vmem:[%s6895_s11 + $0x20] sm:$0xff] }
 0xc5b   : > { %v6039_v19 = vpop.f32.mrf.mxu1 }
 0xc5c   : > { %6053 = vmatprep.mubr.msk.bf16.mxu1 %vm1436_vm0, %v3656_v52 }
 0xc5d   : > { %v3609_v16 = vpop.f32.mrf.mxu1  ;;  %6054 = vmatmul.mubr.msk.bf16.vlgmr.msra.gmra.mxu1 %vm1436_vm0, %v3657_v18  ;;  %v6649_v18 = vld [vmem:[%s6895_s11 + $0x30] sm:$0xff] }
 0xc5f   : > { %v6040_v62 = vpop.f32.mrf.mxu1 }
 0xc60   : > { %v3659_v11 = vpack.c.bf16 %v6040_v62, %v6039_v19 }
 0xc61   : > { %v3612_v29 = vpop.f32.mrf.mxu1 }
 0xc62   : > { %v3658_v39 = vpack.c.bf16 %v3612_v29, %v3609_v16  ;;  %v6650_v16 = vld [vmem:[%s6895_s11 + $0x28] sm:$0xff] }
 0xc64   : > { %6057 = vmatprep.mubr.msk.bf16.mxu1 %vm1436_vm0, %v3658_v39 }
 0xc65   : > { %6058 = vmatmul.mubr.msk.bf16.gmra.mxu1 %vm1436_vm0, %v3659_v11 }
 0xc77   : > { %v6043_v44 = vpop.f32.mrf.mxu1 }
 0xc79   : > { %v3625_v13 = vpop.f32.mrf.mxu1 }
 0xc7b   : > { %v6044_v56 = vpop.f32.mrf.mxu1 }
 0xc7c   : > { %v3661_v31 = vpack.c.bf16 %v6044_v56, %v6043_v44 }
 0xc7d   : > { %v3628_v35 = vpop.f32.mrf.mxu1 }
 0xc7e   : > { %v3660_v20 = vpack.c.bf16 %v3628_v35, %v3625_v13 }
 0xc7f   : > { %v6047_v57 = vpop.f32.mrf.mxu1 }
 0xc80   : > { %6061 = vmatprep.mubr.msk.bf16.mxu1 %vm1436_vm0, %v3660_v20 }
 0xc81   : > { %v3641_v49 = vpop.f32.mrf.mxu1  ;;  %6062 = vmatmul.mubr.msk.bf16.gmra.mxu1 %vm1436_vm0, %v3661_v31 }
 0xc83   : > { %v6048_v10 = vpop.f32.mrf.mxu1 }
 0xc84   : > { %v3663_v41 = vpack.c.bf16 %v6048_v10, %v6047_v57 }
 0xc85   : > { %v3644_v47 = vpop.f32.mrf.mxu1 }
 0xc86   : > { %v3662_v2 = vpack.c.bf16 %v3644_v47, %v3641_v49  ;;  %v6652_v49 = vld [vmem:[%s6895_s11 + $0x40] sm:$0xff] }
 0xc88   : > { %6065 = vmatprep.mubr.msk.bf16.mxu1 %vm1436_vm0, %v3662_v2 }
 0xc89   : > { %6066 = vmatmul.mubr.msk.bf16.gmra.mxu1 %vm1436_vm0, %v3663_v41 }
 0xd1d   : > { %v6055_v1 = vpop.f32.mrf.mxu1 }
 0xd1e   : > { %v3803_v42 = vadd.f32 %v6055_v1, %v8327_v3  ;;  %v6653_v1 = vld [vmem:[%s6895_s11 + $0x50] sm:$0xff] }
 0xd1f   : > { %v3738_v14 = vpop.f32.mrf.mxu1 }
 0xd20   : > { %v3801_v33 = vadd.f32 %v3738_v14, %v8331_v59  ;;  %v3826_v28 = vadd.f32 %v8402_v26, %v3803_v42 }
 0xd21   : > { %v6056_v12 = vpop.f32.mrf.mxu1 }
 0xd22   : > { %v3824_v63 = vadd.f32 %v8402_v26, %v3801_v33  ;;  %v3804_v43 = vadd.f32 %v6056_v12, %v8335_v58  ;;  %v8417_v21 = vadd.f32 %v6645_v5, %v3826_v28  ;;  %v6219_v5 = vld [vmem:[%s6867_s5 + $0x70] ss:$8 sps:$4 sm:$0xff]  }
 0xd23   : > { %v3741_v6 = vpop.f32.mrf.mxu1 }
 0xd24   : > { %v3802_v3 = vadd.f32 %v3741_v6, %v8339_v36  ;;  %v8409_v59 = vadd.f32 %v6644_v37, %v3824_v63  ;;  %v3827_v25 = vadd.f32 %v8402_v26, %v3804_v43  ;;  %v6646_v36 = vld [vmem:[%s6895_s11 + $0x8] sm:$0xff] }
 0xd25   : > { %v6059_v34 = vpop.f32.mrf.mxu1 }
 0xd26   : > { %v3825_v38 = vadd.f32 %v8402_v26, %v3802_v3  ;;  %3858 = vadd.xlane.f32.xlu1 %v8409_v59  ;;  %v3807_v45 = vadd.f32 %v6059_v34, %v8343_v22  ;;  %v6647_v22 = vld [vmem:[%s6895_s11 + $0x18] sm:$0xff]  ;;  %v6656_v3 = vld [vmem:[%s6895_s11 + $0x60] sm:$0xff] }
 0xd27   : > { %v3754_v9 = vpop.f32.mrf.mxu1  ;;  %v8426_v50 = vadd.f32 %v6647_v22, %v3827_v25  ;;  %v6657_v25 = vld [vmem:[%s6895_s11 + $0x70] sm:$0xff] }
 0xd28   : > { %v3805_v58 = vadd.f32 %v3754_v9, %v8347_v8  ;;  %v8420_v30 = vadd.f32 %v6646_v36, %v3825_v38  ;;  %v3830_v8 = vadd.f32 %v8402_v26, %v3807_v45  ;;  %v6658_v45 = vld [vmem:[%s6895_s11 + $0x68] sm:$0xff]  ;;  %v6221_v36 = vld [vmem:[%s6867_s5 + $0x74] ss:$8 sps:$4 sm:$0xff]  }
 0xd29   : > { %v6060_v55 = vpop.f32.mrf.mxu1  ;;  %4195 = vmatprep.subr.bf16.mxu0 %v6221_v36 }
 0xd2a   : > { %v3828_v61 = vadd.f32 %v8402_v26, %v3805_v58  ;;  %3862 = vadd.xlane.f32.xlu1 %v8417_v21  ;;  %3860 = vadd.xlane.f32.xlu0 %v8420_v30  ;;  %v3808_v4 = vadd.f32 %v6060_v55, %v8351_v51  ;;  %v8439_v19 = vadd.f32 %v6649_v18, %v3830_v8  ;;  %v6651_v51 = vld [vmem:[%s6895_s11 + $0x38] sm:$0xff] }
 0xd2b   : > { %v3757_v53 = vpop.f32.mrf.mxu1  ;;  %4196 = vmatpush1.bf16.msra.mxu0 %v6219_v5 }
 0xd2c   : > { %v3806_v0 = vadd.f32 %v3757_v53, %v8355_v23  ;;  %v8432_v54 = vadd.f32 %v6648_v48, %v3828_v61  ;;  %v3831_v52 = vadd.f32 %v8402_v26, %v3808_v4 }
 0xd2e   : > { %v3829_v46 = vadd.f32 %v8402_v26, %v3806_v0  ;;  %3864 = vadd.xlane.f32.xlu0 %v8426_v50  ;;  %3866 = vadd.xlane.f32.xlu1 %v8432_v54  ;;  %v8447_v23 = vadd.f32 %v6651_v51, %v3831_v52 }
 0xd30   : > { %v8442_v62 = vadd.f32 %v6650_v16, %v3829_v46 }
 0xd32   : > { %3870 = vadd.xlane.f32.xlu1 %v8439_v19  ;;  %3868 = vadd.xlane.f32.xlu0 %v8442_v62 }
 0xd36   : > { %3872 = vadd.xlane.f32.xlu0 %v8447_v23 }
 0xd41   : > { %v6063_v29 = vpop.f32.mrf.mxu1 }
 0xd42   : > { %v3811_v11 = vadd.f32 %v6063_v29, %v8359_v40 }
 0xd43   : > { %v3770_v39 = vpop.f32.mrf.mxu1 }
 0xd44   : > { %v3809_v44 = vadd.f32 %v3770_v39, %v8363_v60  ;;  %v3834_v31 = vadd.f32 %v8402_v26, %v3811_v11 }
 0xd45   : > { %v6064_v13 = vpop.f32.mrf.mxu1 }
 0xd46   : > { %v3832_v56 = vadd.f32 %v8402_v26, %v3809_v44  ;;  %v3812_v35 = vadd.f32 %v6064_v13, %v8367_v27  ;;  %v8465_v14 = vadd.f32 %v6653_v1, %v3834_v31  ;;  %v6231_v1 = vld [vmem:[%s6867_s5 + $0x30] ss:$8 sps:$4 sm:$0xff]  }
 0xd47   : > { %v3773_v20 = vpop.f32.mrf.mxu1 }
 0xd48   : > { %v3810_v57 = vadd.f32 %v3773_v20, %v8369_v15  ;;  %v8457_v10 = vadd.f32 %v6652_v49, %v3832_v56  ;;  %v3835_v60 = vadd.f32 %v8402_v26, %v3812_v35  ;;  %v6654_v15 = vld [vmem:[%s6895_s11 + $0x48] sm:$0xff] }
 0xd49   : > { %v6067_v47 = vpop.f32.mrf.mxu1 }
 0xd4a   : > { %v3833_v40 = vadd.f32 %v8402_v26, %v3810_v57  ;;  %3874 = vadd.xlane.f32.xlu1 %v8457_v10  ;;  %v3815_v41 = vadd.f32 %v6067_v47, %v8375_v7  ;;  %v6655_v7 = vld [vmem:[%s6895_s11 + $0x58] sm:$0xff]  ;;  %v6224_v47 = vld [vmem:[%s6867_s5 + $0x64] ss:$8 sps:$4 sm:$0xff]  }
 0xd4b   : > { %v3786_v2 = vpop.f32.mrf.mxu1  ;;  %v8474_v43 = vadd.f32 %v6655_v7, %v3835_v60  ;;  %4197 = vmatprep.subr.bf16.mxu0 %v6224_v47  ;;  %v6227_v60 = vld [vmem:[%s6867_s5 + $0x54] ss:$8 sps:$4 sm:$0xff]  }
 0xd4c   : > { %v3813_v27 = vadd.f32 %v3786_v2, %v8379_v24  ;;  %v8468_v42 = vadd.f32 %v6654_v15, %v3833_v40  ;;  %v3838_v24 = vadd.f32 %v8402_v26, %v3815_v41  ;;  %v6225_v2 = vld [vmem:[%s6867_s5 + $0x50] ss:$8 sps:$4 sm:$0xff]   ;;  %v6228_v41 = vld [vmem:[%s6867_s5 + $0x40] ss:$8 sps:$4 sm:$0xff]   ;;  %v6236_v15 = vld [vmem:[%s6867_s5 + $0x24] ss:$8 sps:$4 sm:$0xff]  }
 0xd4d   : > { %v6068_v33 = vpop.f32.mrf.mxu1  ;;  %v6239_v7 = vld [vmem:[%s6867_s5 + $0x14] ss:$8 sps:$4 sm:$0xff]  }
 0xd4e   : > { %v3836_v12 = vadd.f32 %v8402_v26, %v3813_v27  ;;  %3878 = vadd.xlane.f32.xlu1 %v8465_v14  ;;  %3876 = vadd.xlane.f32.xlu0 %v8468_v42  ;;  %v3816_v6 = vadd.f32 %v6068_v33, %v8383_v17  ;;  %v8487_v9 = vadd.f32 %v6657_v25, %v3838_v24  ;;  %v6233_v27 = vld [vmem:[%s6867_s5 + $0x34] ss:$8 sps:$4 sm:$0xff]   ;;  %v6234_v33 = vld [vmem:[%s6867_s5 + $0x20] ss:$8 sps:$4 sm:$0xff]  }
 0xd4f   : > { %v3789_v63 = vpop.f32.mrf.mxu1 }
 0xd50   : > { %v3814_v28 = vadd.f32 %v3789_v63, %v8385_v32  ;;  %v8480_v37 = vadd.f32 %v6656_v3, %v3836_v12  ;;  %v3839_v38 = vadd.f32 %v8402_v26, %v3816_v6  ;;  %v6659_v32 = vld [vmem:[%s6895_s11 + $0x78] sm:$0xff] }
 0xd51   : > { %v6237_v6 = vld [vmem:[%s6867_s5 + $0x10] ss:$8 sps:$4 sm:$0xff]  }
 0xd52   : > { %v3837_v34 = vadd.f32 %v8402_v26, %v3814_v28  ;;  %3880 = vadd.xlane.f32.xlu0 %v8474_v43  ;;  %3882 = vadd.xlane.f32.xlu1 %v8480_v37  ;;  %v8495_v58 = vadd.f32 %v6659_v32, %v3839_v38  ;;  %v6242_v32 = vld [vmem:[%s6867_s5 + $0x4] ss:$8 sps:$4 sm:$0xff]  }
 0xd54   : > { %v8490_v17 = vadd.f32 %v6658_v45, %v3837_v34  ;;  %v6240_v45 = vld [vmem:[%s6867_s5] ss:$8 sps:$4 sm:$0xff]  }
 0xd56   : > { %3886 = vadd.xlane.f32.xlu1 %v8487_v9  ;;  %3884 = vadd.xlane.f32.xlu0 %v8490_v17 }
 0xd5a   : > { %3888 = vadd.xlane.f32.xlu0 %v8495_v58 }
 0xdaf   : > { %v3859_v26 = vpop.xlane.xlu1 %3858 }
 0xdb0   : > { %v3891_v55 = vmul.f32 0.0078125, %v3859_v26 }
 0xdb2   : > { %v8501_v61 = vsub.f32 %v8409_v59, %v3891_v55 }
 0xdb3   : > { %v3863_v53 = vpop.xlane.xlu1 %3862  ;;  %v3861_v22 = vpop.xlane.xlu0 %3860 }
 0xdb4   : > { %v3893_v8 = vmul.f32 0.0078125, %v3863_v53  ;;  %v3892_v4 = vmul.f32 0.0078125, %v3861_v22  ;;  %v3923_v0 = vmul.f32 %v8501_v61, %v8501_v61 }
 0xdb6   : > { %v8506_v48 = vsub.f32 %v8417_v21, %v3893_v8  ;;  %v8509_v46 = vsub.f32 %v8420_v30, %v3892_v4  ;;  %3939 = vadd.xlane.f32.xlu1 %v3923_v0 }
 0xdb7   : > { %v3865_v52 = vpop.xlane.xlu0 %3864  ;;  %v3867_v18 = vpop.xlane.xlu1 %3866 }
 0xdb8   : > { %v3894_v16 = vmul.f32 0.0078125, %v3865_v52  ;;  %v3895_v51 = vmul.f32 0.0078125, %v3867_v18  ;;  %v3925_v59 = vmul.f32 %v8506_v48, %v8506_v48  ;;  %v3924_v29 = vmul.f32 %v8509_v46, %v8509_v46 }
 0xdba   : > { %v8516_v39 = vsub.f32 %v8426_v50, %v3894_v16  ;;  %v8519_v21 = vsub.f32 %v8432_v54, %v3895_v51  ;;  %3943 = vadd.xlane.f32.xlu1 %v3925_v59  ;;  %3941 = vadd.xlane.f32.xlu0 %v3924_v29 }
 0xdbb   : > { %v3871_v30 = vpop.xlane.xlu1 %3870  ;;  %v3869_v11 = vpop.xlane.xlu0 %3868 }
 0xdbc   : > { %v3897_v44 = vmul.f32 0.0078125, %v3871_v30  ;;  %v3896_v13 = vmul.f32 0.0078125, %v3869_v11  ;;  %v3927_v56 = vmul.f32 %v8519_v21, %v8519_v21  ;;  %v3926_v35 = vmul.f32 %v8516_v39, %v8516_v39 }
 0xdbe   : > { %v8526_v50 = vsub.f32 %v8439_v19, %v3897_v44  ;;  %v8529_v54 = vsub.f32 %v8442_v62, %v3896_v13  ;;  %3947 = vadd.xlane.f32.xlu1 %v3927_v56  ;;  %3945 = vadd.xlane.f32.xlu0 %v3926_v35  ;;  %v6222_v62 = vld [vmem:[%s6867_s5 + $0x60] ss:$8 sps:$4 sm:$0xff]  }
 0xdbf   : > { %v3873_v20 = vpop.xlane.xlu0 %3872  ;;  %4198 = vmatpush1.bf16.msra.mxu0 %v6222_v62 }
 0xdc0   : > { %v3898_v31 = vmul.f32 0.0078125, %v3873_v20  ;;  %v3929_v57 = vmul.f32 %v8526_v50, %v8526_v50  ;;  %v3928_v49 = vmul.f32 %v8529_v54, %v8529_v54  ;;  %4199 = vmatprep.subr.bf16.mxu0 %v6227_v60 }
 0xdc2   : > { %v8537_v19 = vsub.f32 %v8447_v23, %v3898_v31  ;;  %3951 = vadd.xlane.f32.xlu1 %v3929_v57  ;;  %3949 = vadd.xlane.f32.xlu0 %v3928_v49  ;;  %v6230_v23 = vld [vmem:[%s6867_s5 + $0x44] ss:$8 sps:$4 sm:$0xff]  }
 0xdc3   : > { %4200 = vmatpush1.bf16.msra.mxu0 %v6225_v2 }
 0xdc4   : > { %v3930_v40 = vmul.f32 %v8537_v19, %v8537_v19  ;;  %4201 = vmatprep.subr.bf16.mxu0 %v6230_v23 }
 0xdc6   : > { %3953 = vadd.xlane.f32.xlu0 %v3930_v40 }
 0xdc7   : > { %4202 = vmatpush1.bf16.msra.mxu0 %v6228_v41 }
 0xdc8   : > { %4203 = vmatprep.subr.bf16.mxu0 %v6233_v27 }
 0xdcb   : > { %4204 = vmatpush1.bf16.msra.mxu0 %v6231_v1 }
 0xdcc   : > { %4205 = vmatprep.subr.bf16.mxu0 %v6236_v15 }
 0xdcf   : > { %4206 = vmatpush1.bf16.msra.mxu0 %v6234_v33 }
 0xdd0   : > { %4207 = vmatprep.subr.bf16.mxu0 %v6239_v7 }
 0xdd3   : > { %v3875_v12 = vpop.xlane.xlu1 %3874  ;;  %4208 = vmatpush1.bf16.msra.mxu0 %v6237_v6 }
 0xdd4   : > { %v3899_v63 = vmul.f32 0.0078125, %v3875_v12  ;;  %4209 = vmatprep.subr.bf16.mxu0 %v6242_v32 }
 0xdd6   : > { %v8552_v24 = vsub.f32 %v8457_v10, %v3899_v63 }
 0xdd7   : > { %v3879_v28 = vpop.xlane.xlu1 %3878  ;;  %v3877_v3 = vpop.xlane.xlu0 %3876  ;;  %4210 = vmatpush1.bf16.msra.mxu0 %v6240_v45 }
 0xdd8   : > { %v3901_v34 = vmul.f32 0.0078125, %v3879_v28  ;;  %v3900_v38 = vmul.f32 0.0078125, %v3877_v3  ;;  %v3931_v25 = vmul.f32 %v8552_v24, %v8552_v24  ;;  %v8600_v28 = vld [vmem:[%s9325_s4] ss:$0 sm:$0xff] }
 0xdda   : > { %v8560_v5 = vsub.f32 %v8465_v14, %v3901_v34  ;;  %v8563_v36 = vsub.f32 %v8468_v42, %v3900_v38  ;;  %3955 = vadd.xlane.f32.xlu1 %v3931_v25 }
 0xddb   : > { %v3881_v10 = vpop.xlane.xlu0 %3880  ;;  %v3883_v26 = vpop.xlane.xlu1 %3882 }
 0xddc   : > { %v3902_v55 = vmul.f32 0.0078125, %v3881_v10  ;;  %v3903_v53 = vmul.f32 0.0078125, %v3883_v26  ;;  %v3933_v22 = vmul.f32 %v8560_v5, %v8560_v5  ;;  %v3932_v8 = vmul.f32 %v8563_v36, %v8563_v36 }
 0xdde   : > { %v8570_v4 = vsub.f32 %v8474_v43, %v3902_v55  ;;  %v8573_v14 = vsub.f32 %v8480_v37, %v3903_v53  ;;  %3959 = vadd.xlane.f32.xlu1 %v3933_v22  ;;  %3957 = vadd.xlane.f32.xlu0 %v3932_v8 }
 0xddf   : > { %v3887_v42 = vpop.xlane.xlu1 %3886  ;;  %v3885_v0 = vpop.xlane.xlu0 %3884 }
 0xde0   : > { %v3905_v52 = vmul.f32 0.0078125, %v3887_v42  ;;  %v3904_v18 = vmul.f32 0.0078125, %v3885_v0  ;;  %v3935_v16 = vmul.f32 %v8573_v14, %v8573_v14  ;;  %v3934_v51 = vmul.f32 %v8570_v4, %v8570_v4 }
 0xde2   : > { %v8580_v59 = vsub.f32 %v8487_v9, %v3905_v52  ;;  %v8583_v43 = vsub.f32 %v8490_v17, %v3904_v18  ;;  %3963 = vadd.xlane.f32.xlu1 %v3935_v16  ;;  %3961 = vadd.xlane.f32.xlu0 %v3934_v51  ;;  %v9328_v16 = vmov 0  }
 0xde3   : > { %v3889_v37 = vpop.xlane.xlu0 %3888 }
 0xde4   : > { %v3906_v29 = vmul.f32 0.0078125, %v3889_v37  ;;  %v3937_v30 = vmul.f32 %v8580_v59, %v8580_v59  ;;  %v3936_v11 = vmul.f32 %v8583_v43, %v8583_v43 }
 0xde6   : > { %v8590_v44 = vsub.f32 %v8495_v58, %v3906_v29  ;;  %3967 = vadd.xlane.f32.xlu1 %v3937_v30  ;;  %3965 = vadd.xlane.f32.xlu0 %v3936_v11 }
 0xde8   : > { %v3938_v9 = vmul.f32 %v8590_v44, %v8590_v44 }
 0xdea   : > { %3969 = vadd.xlane.f32.xlu0 %v3938_v9 }
 0xe3f   : > { %v3940_v17 = vpop.xlane.xlu1 %3939 }
 0xe40   : > { %v3971_v13 = vmul.f32 0.0078125, %v3940_v17 }
 0xe42   : > { %v3987_v56 = vadd.f32 1e-12, %v3971_v13 }
 0xe43   : > { %v3944_v35 = vpop.xlane.xlu1 %3943  ;;  %v3942_v20 = vpop.xlane.xlu0 %3941 }
 0xe44   : > { %6515 = vrsqrt.f32 %v3987_v56  ;;  %v3973_v31 = vmul.f32 0.0078125, %v3944_v35  ;;  %v3972_v57 = vmul.f32 0.0078125, %v3942_v20 }
 0xe46   : > { %v3988_v49 = vadd.f32 1e-12, %v3972_v57  ;;  %v3989_v47 = vadd.f32 1e-12, %v3973_v31 }
 0xe47   : > { %v3946_v62 = vpop.xlane.xlu0 %3945  ;;  %v3948_v40 = vpop.xlane.xlu1 %3947 }
 0xe48   : > { %v3974_v58 = vmul.f32 0.0078125, %v3946_v62  ;;  %6517 = vrsqrt.f32 %v3988_v49  ;;  %v3975_v2 = vmul.f32 0.0078125, %v3948_v40 }
 0xe49   : > { %6519 = vrsqrt.f32 %v3989_v47 }
 0xe4a   : > { %v3990_v60 = vadd.f32 1e-12, %v3974_v58  ;;  %v3991_v1 = vadd.f32 1e-12, %v3975_v2 }
 0xe4b   : > { %v3950_v23 = vpop.xlane.xlu0 %3949  ;;  %v3952_v15 = vpop.xlane.xlu1 %3951 }
 0xe4c   : > { %v3976_v41 = vmul.f32 0.0078125, %v3950_v23  ;;  %6521 = vrsqrt.f32 %v3990_v60  ;;  %v3977_v7 = vmul.f32 0.0078125, %v3952_v15 }
 0xe4e   : > { %v3992_v27 = vadd.f32 1e-12, %v3976_v41  ;;  %v3993_v38 = vadd.f32 1e-12, %v3977_v7 }
 0xe4f   : > { %v3954_v33 = vpop.xlane.xlu0 %3953 }
 0xe50   : > { %6523 = vrsqrt.f32 %v3992_v27  ;;  %v3978_v63 = vmul.f32 0.0078125, %v3954_v33 }
 0xe51   : > { %v6516_v12 = vpop.eup %6515  ;;  %6525 = vrsqrt.f32 %v3991_v1 }
 0xe52   : > { %v4019_v6 = vmul.f32 %v6516_v12, %v8501_v61  ;;  %v3994_v3 = vadd.f32 1e-12, %v3978_v63  ;;  %v8609_v61 = vld [vmem:[%s9327_s17] ss:$0 sm:$0xff] }
 0xe54   : > { %v4041_v25 = vmul.f32 %v8600_v28, %v4019_v6  ;;  %6527 = vrsqrt.f32 %v3994_v3 }
 0xe55   : > { %v6518_v34 = vpop.eup %6517  ;;  %6529 = vrsqrt.f32 %v3993_v38 }
 0xe56   : > { %v4020_v45 = vmul.f32 %v6518_v34, %v8509_v46  ;;  %v6520_v32 = vpop.eup %6519  ;;  %v8613_v55 = vadd.f32 %v8609_v61, %v4041_v25 }
 0xe57   : > { %v4021_v46 = vmul.f32 %v6520_v32, %v8506_v48 }
 0xe58   : > { %v4042_v10 = vmul.f32 %v8600_v28, %v4020_v45 }
 0xe59   : > { %v6522_v26 = vpop.eup %6521  ;;  %v4043_v52 = vmul.f32 %v8600_v28, %v4021_v46 }
 0xe5a   : > { %v8616_v53 = vadd.f32 %v8609_v61, %v4042_v10  ;;  %v4022_v22 = vmul.f32 %v6522_v26, %v8516_v39 }
 0xe5b   : > { %v8630_v39 = vadd.f32 %v8609_v61, %v4043_v52 }
 0xe5c   : > { %v4079_v8 = vpack.c.bf16 %v8616_v53, %v8613_v55  ;;  %v4044_v42 = vmul.f32 %v8600_v28, %v4022_v22 }
 0xe5d   : > { %v6524_v0 = vpop.eup %6523 }
 0xe5e   : > { %4228 = vmatmul.mubr.bf16.vlgmr.msra.gmra.mxu0 %v4079_v8  ;;  %v6526_v18 = vpop.eup %6525  ;;  %v8626_v51 = vadd.f32 %v8609_v61, %v4044_v42  ;;  %v4024_v37 = vmul.f32 %v6524_v0, %v8529_v54 }
 0xe5f   : > { %4237 = vmatprep.mubr.bf16.mxu0 %v9328_v16  ;;  %v4023_v29 = vmul.f32 %v6526_v18, %v8519_v21 }
 0xe60   : > { %v4080_v11 = vpack.c.bf16 %v8626_v51, %v8630_v39  ;;  %v4046_v9 = vmul.f32 %v8600_v28, %v4024_v37 }
 0xe61   : > { %v6528_v17 = vpop.eup %6527  ;;  %v4045_v54 = vmul.f32 %v8600_v28, %v4023_v29 }
 0xe62   : > { %v6530_v56 = vpop.eup %6529  ;;  %v8639_v21 = vadd.f32 %v8609_v61, %v4046_v9  ;;  %v4026_v49 = vmul.f32 %v6528_v17, %v8537_v19 }
 0xe63   : > { %v3956_v48 = vpop.xlane.xlu1 %3955  ;;  %v8643_v58 = vadd.f32 %v8609_v61, %v4045_v54  ;;  %v4025_v60 = vmul.f32 %v6530_v56, %v8526_v50 }
 0xe64   : > { %v3979_v30 = vmul.f32 0.0078125, %v3956_v48  ;;  %v4048_v27 = vmul.f32 %v8600_v28, %v4026_v49 }
 0xe65   : > { %v4081_v41 = vpack.c.bf16 %v8639_v21, %v8643_v58  ;;  %v4047_v33 = vmul.f32 %v8600_v28, %v4025_v60 }
 0xe66   : > { %v3995_v13 = vadd.f32 1e-12, %v3979_v30  ;;  %4238 = vmatmul.mubr.bf16.gmra.mxu0 %v4080_v11  ;;  %v8652_v50 = vadd.f32 %v8609_v61, %v4048_v27  ;;  %v6247_v27 = vld [vmem:[%s6878_s19 + $0x68] sm:$0xff]  }
 0xe67   : > { %v3960_v35 = vpop.xlane.xlu1 %3959  ;;  %v3958_v20 = vpop.xlane.xlu0 %3957  ;;  %4247 = vmatprep.mubr.bf16.mxu0 %v9328_v16  ;;  %v8655_v34 = vadd.f32 %v8609_v61, %v4047_v33  ;;  %v6252_v33 = vld [vmem:[%s6878_s19 + $0x18] sm:$0xff]  }
 0xe68   : > { %6531 = vrsqrt.f32 %v3995_v13  ;;  %v3981_v31 = vmul.f32 0.0078125, %v3960_v35  ;;  %v3980_v57 = vmul.f32 0.0078125, %v3958_v20 }
 0xe69   : > { %v4082_v45 = vpack.c.bf16 %v8652_v50, %v8655_v34 }
 0xe6a   : > { %v3996_v47 = vadd.f32 1e-12, %v3980_v57  ;;  %v3997_v62 = vadd.f32 1e-12, %v3981_v31 }
 0xe6b   : > { %v3962_v40 = vpop.xlane.xlu0 %3961  ;;  %v3964_v2 = vpop.xlane.xlu1 %3963 }
 0xe6c   : > { %v3982_v23 = vmul.f32 0.0078125, %v3962_v40  ;;  %6533 = vrsqrt.f32 %v3996_v47  ;;  %v3983_v15 = vmul.f32 0.0078125, %v3964_v2 }
 0xe6d   : > { %6535 = vrsqrt.f32 %v3997_v62 }
 0xe6e   : > { %v3998_v1 = vadd.f32 1e-12, %v3982_v23  ;;  %4248 = vmatmul.mubr.bf16.gmra.mxu0 %v4081_v41  ;;  %v3999_v7 = vadd.f32 1e-12, %v3983_v15  ;;  %v6243_v23 = vld [vmem:[%s6878_s19 + $0x78] sm:$0xff]   ;;  %v6250_v15 = vld [vmem:[%s6878_s19 + $0x20] sm:$0xff]  }
 0xe6f   : > { %v3966_v19 = vpop.xlane.xlu0 %3965  ;;  %4257 = vmatprep.mubr.bf16.mxu0 %v9328_v16  ;;  %v3968_v6 = vpop.xlane.xlu1 %3967  ;;  %v6244_v41 = vld [vmem:[%s6878_s19 + $0x38] sm:$0xff]   ;;  %5637 = vmatprep.subr.bf16.mxu1 %v6243_v23 }
 0xe70   : > { %v3984_v12 = vmul.f32 0.0078125, %v3966_v19  ;;  %6537 = vrsqrt.f32 %v3998_v1  ;;  %v3985_v32 = vmul.f32 0.0078125, %v3968_v6  ;;  %5638 = vmatpush3.bf16.msra.mxu1 %v6244_v41  ;;  %v6249_v1 = vld [vmem:[%s6878_s19 + $0x60] sm:$0xff]   ;;  %v6251_v19 = vld [vmem:[%s6878_s19 + $0x58] sm:$0xff]   ;;  %v6256_v6 = vld [vmem:[%s6878_s19 + $0x8] sm:$0xff]  }
 0xe72   : > { %v4000_v63 = vadd.f32 1e-12, %v3984_v12  ;;  %v4001_v22 = vadd.f32 1e-12, %v3985_v32  ;;  %v6253_v12 = vld [vmem:[%s6878_s19 + $0x50] sm:$0xff]  }
 0xe73   : > { %v3970_v3 = vpop.xlane.xlu0 %3969 }
 0xe74   : > { %6539 = vrsqrt.f32 %v4000_v63  ;;  %v3986_v25 = vmul.f32 0.0078125, %v3970_v3  ;;  %v6254_v63 = vld [vmem:[%s6878_s19 + $0x10] sm:$0xff]   ;;  %v6257_v3 = vld [vmem:[%s6878_s19 + $0x40] sm:$0xff]  }
 0xe75   : > { %v6532_v38 = vpop.eup %6531  ;;  %6541 = vrsqrt.f32 %v3999_v7  ;;  %v6255_v7 = vld [vmem:[%s6878_s19 + $0x48] sm:$0xff]  }
 0xe76   : > { %4258 = vmatmul.mubr.bf16.gmra.mxu0 %v4082_v45  ;;  %v4027_v10 = vmul.f32 %v6532_v38, %v8552_v24  ;;  %v4002_v26 = vadd.f32 1e-12, %v3986_v25  ;;  %v6258_v38 = vld [vmem:[%s6878_s19] sm:$0xff]  }
 0xe77   : > { %4267 = vmatprep.mubr.bf16.mxu0 %v9328_v16  ;;  %v4103_v25 = vld [vmem:[%s6873_s15] sm:$0x3] }
 0xe78   : > { %v4049_v42 = vmul.f32 %v8600_v28, %v4027_v10  ;;  %6543 = vrsqrt.f32 %v4002_v26  ;;  %v9329_v45 = vld [vmem:[#allocation9_spill] sm:$0xff] }
 0xe79   : > { %v6534_v46 = vpop.eup %6533  ;;  %6545 = vrsqrt.f32 %v4001_v22  ;;  %v9330_v32 = vsub.s32 0, %v9329_v45  ;;  %v9331_v26 = vsub.s32 1, %v9329_v45 }
 0xe7a   : > { %v4028_v8 = vmul.f32 %v6534_v46, %v8563_v36  ;;  %v6536_v0 = vpop.eup %6535  ;;  %v8665_v37 = vadd.f32 %v8609_v61, %v4049_v42 }
 0xe7b   : > { %v4029_v48 = vmul.f32 %v6536_v0, %v8560_v5  ;;  %v8730_v10 = vrot.slane %v4103_v25, %v9330_v32  ;;  %v8734_v46 = vrot.slane %v4103_v25, %v9331_v26 }
 0xe7c   : > { %v4050_v52 = vmul.f32 %v8600_v28, %v4028_v8 }
 0xe7d   : > { %v6538_v18 = vpop.eup %6537  ;;  %v4051_v9 = vmul.f32 %v8600_v28, %v4029_v48 }
 0xe7e   : > { %v8668_v24 = vadd.f32 %v8609_v61, %v4050_v52  ;;  %v4030_v29 = vmul.f32 %v6538_v18, %v8570_v4 }
 0xe7f   : > { %v8682_v5 = vadd.f32 %v8609_v61, %v4051_v9 }
 0xe80   : > { %v4083_v36 = vpack.c.bf16 %v8668_v24, %v8665_v37  ;;  %v4052_v30 = vmul.f32 %v8600_v28, %v4030_v29 }
 0xe81   : > { %v6540_v11 = vpop.eup %6539 }
 0xe82   : > { %4268 = vmatmul.mubr.bf16.gmra.mxu0 %v4083_v36  ;;  %v6542_v17 = vpop.eup %6541  ;;  %v8678_v13 = vadd.f32 %v8609_v61, %v4052_v30  ;;  %v4032_v56 = vmul.f32 %v6540_v11, %v8583_v43 }
 0xe83   : > { %4277 = vmatprep.mubr.bf16.mxu0 %v9328_v16  ;;  %v4031_v4 = vmul.f32 %v6542_v17, %v8573_v14 }
 0xe84   : > { %v4084_v35 = vpack.c.bf16 %v8678_v13, %v8682_v5  ;;  %v4054_v20 = vmul.f32 %v8600_v28, %v4032_v56 }
 0xe85   : > { %v6544_v54 = vpop.eup %6543  ;;  %v4053_v57 = vmul.f32 %v8600_v28, %v4031_v4 }
 0xe86   : > { %v6546_v31 = vpop.eup %6545  ;;  %v8691_v43 = vadd.f32 %v8609_v61, %v4054_v20  ;;  %v4034_v49 = vmul.f32 %v6544_v54, %v8590_v44 }
 0xe87   : > { %v8695_v14 = vadd.f32 %v8609_v61, %v4053_v57  ;;  %v4033_v47 = vmul.f32 %v6546_v31, %v8580_v59 }
 0xe88   : > { %v4056_v40 = vmul.f32 %v8600_v28, %v4034_v49 }
 0xe89   : > { %v4085_v62 = vpack.c.bf16 %v8691_v43, %v8695_v14  ;;  %v4055_v60 = vmul.f32 %v8600_v28, %v4033_v47  ;;  %v6245_v28 = vld [vmem:[%s6878_s19 + $0x70] sm:$0xff]  }
 0xe8a   : > { %4278 = vmatmul.mubr.bf16.gmra.mxu0 %v4084_v35  ;;  %v8704_v44 = vadd.f32 %v8609_v61, %v4056_v40  ;;  %5639 = vmatprep.subr.bf16.mxu1 %v6245_v28 }
 0xe8b   : > { %4287 = vmatprep.mubr.bf16.mxu0 %v9328_v16  ;;  %v8707_v2 = vadd.f32 %v8609_v61, %v4055_v60  ;;  %v6248_v61 = vld [vmem:[%s6878_s19 + $0x28] sm:$0xff]  }
 0xe8d   : > { %v4086_v59 = vpack.c.bf16 %v8704_v44, %v8707_v2 }
 0xe92   : > { %4288 = vmatmul.mubr.bf16.gmra.mxu0 %v4085_v62 }
 0xe93   : > { %4297 = vmatprep.mubr.bf16.mxu0 %v9328_v16  ;;  %v6246_v16 = vld [vmem:[%s6878_s19 + $0x30] sm:$0xff]  }
 0xe94   : > { %5640 = vmatpush3.bf16.msra.mxu1 %v6246_v16 }
 0xe95   : > { %5641 = vmatprep.subr.bf16.mxu1 %v6247_v27 }
 0xe98   : > { %5642 = vmatpush3.bf16.msra.mxu1 %v6248_v61 }
 0xe99   : > { %5643 = vmatprep.subr.bf16.mxu1 %v6249_v1 }
 0xe9a   : > { %4298 = vmatmul.mubr.bf16.gmra.mxu0 %v4086_v59 }
 0xe9c   : > { %5644 = vmatpush3.bf16.msra.mxu1 %v6250_v15 }
 0xe9d   : > { %5645 = vmatprep.subr.bf16.mxu1 %v6251_v19 }
 0xea0   : > { %5646 = vmatpush3.bf16.msra.mxu1 %v6252_v33 }
 0xea1   : > { %5647 = vmatprep.subr.bf16.mxu1 %v6253_v12 }
 0xea4   : > { %5648 = vmatpush3.bf16.msra.mxu1 %v6254_v63 }
 0xea5   : > { %5649 = vmatprep.subr.bf16.mxu1 %v6255_v7 }
 0xea8   : > { %5650 = vmatpush3.bf16.msra.mxu1 %v6256_v6 }
 0xea9   : > { %5651 = vmatprep.subr.bf16.mxu1 %v6257_v3 }
 0xeac   : > { %5652 = vmatpush3.bf16.msra.mxu1 %v6258_v38 }
 0xf1e   : > { %v4229_v22 = vpop.f32.mrf.mxu0 }
 0xf1f   : > { %v8737_v8 = vadd.f32 %v4229_v22, %v8730_v10 }
 0xf20   : > { %v4231_v42 = vpop.f32.mrf.mxu0 }
 0xf21   : > { %v4340_v0 = vmul.f32 0.044715, %v8737_v8  ;;  %v8741_v52 = vadd.f32 %v4231_v42, %v8734_v46 }
 0xf22   : > { %v4233_v18 = vpop.f32.mrf.mxu0 }
 0xf23   : > { %v4372_v48 = vmul.f32 %v4340_v0, %v8737_v8  ;;  %v4341_v29 = vmul.f32 0.044715, %v8741_v52  ;;  %v8746_v36 = vadd.f32 %v4233_v18, %v8730_v10 }
 0xf24   : > { %v4235_v30 = vpop.f32.mrf.mxu0 }
 0xf25   : > { %v4404_v11 = vmul.f32 %v4372_v48, %v8737_v8  ;;  %v4373_v9 = vmul.f32 %v4341_v29, %v8741_v52  ;;  %v4342_v17 = vmul.f32 0.044715, %v8746_v36  ;;  %v8752_v56 = vadd.f32 %v4235_v30, %v8734_v46 }
 0xf26   : > { %v4239_v4 = vpop.f32.mrf.mxu0 }
 0xf27   : > { %v4436_v35 = vadd.f32 %v4404_v11, %v8737_v8  ;;  %v4405_v20 = vmul.f32 %v4373_v9, %v8741_v52  ;;  %v4374_v54 = vmul.f32 %v4342_v17, %v8746_v36  ;;  %v8758_v31 = vadd.f32 %v4239_v4, %v8730_v10 }
 0xf28   : > { %v4343_v57 = vmul.f32 0.044715, %v8752_v56  ;;  %v4241_v49 = vpop.f32.mrf.mxu0 }
 0xf29   : > { %v4468_v47 = vmul.f32 0.7978846, %v4436_v35  ;;  %v4406_v62 = vmul.f32 %v4374_v54, %v8746_v36  ;;  %v4344_v40 = vmul.f32 0.044715, %v8758_v31  ;;  %v8764_v60 = vadd.f32 %v4241_v49, %v8734_v46 }
 0xf2a   : > { %v4375_v59 = vmul.f32 %v4343_v57, %v8752_v56  ;;  %v4243_v23 = vpop.f32.mrf.mxu0  ;;  %v4437_v41 = vadd.f32 %v4405_v20, %v8741_v52 }
 0xf2b   : > { %v4438_v28 = vadd.f32 %v4406_v62, %v8746_v36  ;;  %v4376_v16 = vmul.f32 %v4344_v40, %v8758_v31  ;;  %v4345_v27 = vmul.f32 0.044715, %v8764_v60  ;;  %6547 = vtanh.f32 %v4468_v47 }
 0xf2c   : > { %v4407_v61 = vmul.f32 %v4375_v59, %v8752_v56  ;;  %v8773_v1 = vadd.f32 %v4243_v23, %v8730_v10  ;;  %v4245_v15 = vpop.f32.mrf.mxu0  ;;  %v4469_v19 = vmul.f32 0.7978846, %v4437_v41 }
 0xf2d   : > { %v4470_v33 = vmul.f32 0.7978846, %v4438_v28  ;;  %v4408_v12 = vmul.f32 %v4376_v16, %v8758_v31  ;;  %v4377_v63 = vmul.f32 %v4345_v27, %v8764_v60  ;;  %v8778_v7 = vadd.f32 %v4245_v15, %v8734_v46 }
 0xf2e   : > { %v4346_v6 = vmul.f32 0.044715, %v8773_v1  ;;  %v4249_v3 = vpop.f32.mrf.mxu0  ;;  %v4439_v38 = vadd.f32 %v4407_v61, %v8752_v56  ;;  %6549 = vtanh.f32 %v4469_v19 }
 0xf2f   : > { %6551 = vtanh.f32 %v4470_v33  ;;  %v4440_v25 = vadd.f32 %v4408_v12, %v8758_v31  ;;  %v4409_v45 = vmul.f32 %v4377_v63, %v8764_v60  ;;  %v4347_v32 = vmul.f32 0.044715, %v8778_v7 }
 0xf30   : > { %v4378_v26 = vmul.f32 %v4346_v6, %v8773_v1  ;;  %v8787_v22 = vadd.f32 %v4249_v3, %v8730_v10  ;;  %v4251_v42 = vpop.f32.mrf.mxu0  ;;  %v4471_v0 = vmul.f32 0.7978846, %v4439_v38 }
 0xf31   : > { %v4379_v18 = vmul.f32 %v4347_v32, %v8778_v7  ;;  %v8791_v48 = vadd.f32 %v4251_v42, %v8734_v46  ;;  %v4441_v29 = vadd.f32 %v4409_v45, %v8764_v60  ;;  %v4472_v17 = vmul.f32 0.7978846, %v4440_v25 }
 0xf32   : > { %v4410_v30 = vmul.f32 %v4378_v26, %v8773_v1  ;;  %v4348_v11 = vmul.f32 0.044715, %v8787_v22  ;;  %v4253_v9 = vpop.f32.mrf.mxu0  ;;  %6553 = vtanh.f32 %v4471_v0  ;;  %v4308_v45 = vmul.f32 0.5, %v8737_v8 }
 0xf33   : > { %v4411_v4 = vmul.f32 %v4379_v18, %v8778_v7  ;;  %v4349_v35 = vmul.f32 0.044715, %v8791_v48  ;;  %v8799_v20 = vadd.f32 %v4253_v9, %v8730_v10  ;;  %v4473_v47 = vmul.f32 0.7978846, %v4441_v29 }
 0xf34   : > { %v4442_v54 = vadd.f32 %v4410_v30, %v8773_v1  ;;  %v4380_v57 = vmul.f32 %v4348_v11, %v8787_v22  ;;  %v4255_v49 = vpop.f32.mrf.mxu0  ;;  %v4309_v42 = vmul.f32 0.5, %v8741_v52  ;;  %v4310_v18 = vmul.f32 0.5, %v8746_v36 }
 0xf35   : > { %v4381_v62 = vmul.f32 %v4349_v35, %v8791_v48  ;;  %v4350_v40 = vmul.f32 0.044715, %v8799_v20  ;;  %v8806_v59 = vadd.f32 %v4255_v49, %v8734_v46  ;;  %v4443_v23 = vadd.f32 %v4411_v4, %v8778_v7 }
 0xf36   : > { %v4474_v41 = vmul.f32 0.7978846, %v4442_v54  ;;  %v4412_v28 = vmul.f32 %v4380_v57, %v8787_v22  ;;  %v4259_v16 = vpop.f32.mrf.mxu0  ;;  %6555 = vtanh.f32 %v4473_v47 }
 0xf37   : > { %6557 = vtanh.f32 %v4472_v17  ;;  %v4382_v27 = vmul.f32 %v4350_v40, %v8799_v20  ;;  %v4351_v61 = vmul.f32 0.044715, %v8806_v59  ;;  %v8813_v15 = vadd.f32 %v4259_v16, %v8730_v10 }
 0xf38   : > { %6559 = vtanh.f32 %v4474_v41  ;;  %v4444_v19 = vadd.f32 %v4412_v28, %v8787_v22  ;;  %v4413_v33 = vmul.f32 %v4381_v62, %v8791_v48  ;;  %v4261_v12 = vpop.f32.mrf.mxu0  ;;  %v4475_v63 = vmul.f32 0.7978846, %v4443_v23  ;;  %v6548_v6 = vpop.eup %6547 }
 0xf39   : > { %v4414_v3 = vmul.f32 %v4382_v27, %v8799_v20  ;;  %v4383_v38 = vmul.f32 %v4351_v61, %v8806_v59  ;;  %v4352_v25 = vmul.f32 0.044715, %v8813_v15  ;;  %v8822_v32 = vadd.f32 %v4261_v12, %v8734_v46 }
 0xf3a   : > { %v4263_v26 = vpop.f32.mrf.mxu0  ;;  %6561 = vtanh.f32 %v4475_v63  ;;  %v4476_v17 = vmul.f32 0.7978846, %v4444_v19  ;;  %v4445_v52 = vadd.f32 %v4413_v33, %v8791_v48  ;;  %v4311_v40 = vmul.f32 0.5, %v8752_v56 }
 0xf3b   : > { %v6550_v0 = vpop.eup %6549  ;;  %v4446_v29 = vadd.f32 %v4414_v3, %v8799_v20  ;;  %v4415_v30 = vmul.f32 %v4383_v38, %v8806_v59  ;;  %v4384_v11 = vmul.f32 %v4352_v25, %v8813_v15  ;;  %v4353_v8 = vmul.f32 0.044715, %v8822_v32 }
 0xf3c   : > { %v6552_v9 = vpop.eup %6551  ;;  %v8831_v4 = vadd.f32 %v4263_v26, %v8730_v10  ;;  %v4265_v35 = vpop.f32.mrf.mxu0  ;;  %v4533_v49 = vadd.f32 1.0, %v6550_v0  ;;  %v4532_v28 = vadd.f32 1.0, %v6548_v6  ;;  %v4477_v33 = vmul.f32 0.7978846, %v4445_v52 }
 0xf3d   : > { %v4534_v54 = vadd.f32 1.0, %v6552_v9  ;;  %v4478_v57 = vmul.f32 0.7978846, %v4446_v29  ;;  %v8835_v36 = vadd.f32 %v4265_v35, %v8734_v46  ;;  %v4385_v47 = vmul.f32 %v4353_v8, %v8822_v32 }
 0xf3e   : > { %v4354_v62 = vmul.f32 0.044715, %v8831_v4  ;;  %v4447_v23 = vadd.f32 %v4415_v30, %v8806_v59  ;;  %v4416_v16 = vmul.f32 %v4384_v11, %v8813_v15  ;;  %v4565_v56 = vmul.f32 %v4533_v49, %v4309_v42 }
 0xf3f   : > { %v6554_v41 = vpop.eup %6553  ;;  %6563 = vtanh.f32 %v4478_v57  ;;  %v4355_v27 = vmul.f32 0.044715, %v8835_v36  ;;  %v4566_v12 = vmul.f32 %v4534_v54, %v4310_v18  ;;  %v4417_v63 = vmul.f32 %v4385_v47, %v8822_v32 }
 0xf40   : > { %6565 = vtanh.f32 %v4476_v17  ;;  %v4386_v61 = vmul.f32 %v4354_v62, %v8831_v4  ;;  %v4535_v19 = vadd.f32 1.0, %v6554_v41  ;;  %v4479_v26 = vmul.f32 0.7978846, %v4447_v23 }
 0xf41   : > { %v4387_v3 = vmul.f32 %v4355_v27, %v8835_v36  ;;  %6567 = vtanh.f32 %v4477_v33  ;;  %v4564_v29 = vmul.f32 %v4532_v28, %v4308_v45  ;;  %v4448_v30 = vadd.f32 %v4416_v16, %v8813_v15 }
 0xf42   : > { %v4418_v38 = vmul.f32 %v4386_v61, %v8831_v4  ;;  %v4269_v25 = vpop.f32.mrf.mxu0  ;;  %v4567_v6 = vmul.f32 %v4535_v19, %v4311_v40  ;;  %6569 = vtanh.f32 %v4479_v26  ;;  %v4312_v57 = vmul.f32 0.5, %v8758_v31 }
 0xf43   : > { %v6556_v0 = vpop.eup %6555  ;;  %v4419_v11 = vmul.f32 %v4387_v3, %v8835_v36  ;;  %v8850_v9 = vadd.f32 %v4269_v25, %v8730_v10  ;;  %v4596_v52 = vpack.c.bf16 %v4566_v12, %v4564_v29  ;;  %v4314_v45 = vmul.f32 0.5, %v8773_v1 }
 0xf44   : > { %v6558_v18 = vpop.eup %6557  ;;  %v4450_v17 = vadd.f32 %v4418_v38, %v8831_v4  ;;  %v4271_v8 = vpop.f32.mrf.mxu0  ;;  %v4597_v42 = vpack.c.bf16 %v4567_v6, %v4565_v56  ;;  %v4537_v54 = vadd.f32 1.0, %v6556_v0  ;;  %v4449_v23 = vadd.f32 %v4417_v63, %v8822_v32 }
 0xf45   : > { %v6560_v35 = vpop.eup %6559  ;;  %v4356_v47 = vmul.f32 0.044715, %v8850_v9  ;;  %v4480_v28 = vmul.f32 0.7978846, %v4448_v30  ;;  %v4536_v27 = vadd.f32 1.0, %v6558_v18  ;;  %v4451_v61 = vadd.f32 %v4419_v11, %v8835_v36 }
 0xf46   : > { %v4482_v49 = vmul.f32 0.7978846, %v4450_v17  ;;  %4779 = vmatprep.mubr.bf16.mxu1 %v4597_v42  ;;  %v4273_v62 = vpop.f32.mrf.mxu0  ;;  %v4538_v40 = vadd.f32 1.0, %v6560_v35  ;;  %v4313_v1 = vmul.f32 0.5, %v8764_v60  ;;  %v4315_v19 = vmul.f32 0.5, %v8778_v7 }
 0xf47   : > { %v6562_v41 = vpop.eup %6561  ;;  %v8858_v16 = vadd.f32 %v4273_v62, %v8730_v10  ;;  %4780 = vmatmul.mubr.bf16.vlgmr.msra.gmra.mxu1 %v4596_v52  ;;  %v4481_v12 = vmul.f32 0.7978846, %v4449_v23  ;;  %v8864_v3 = vadd.f32 %v4271_v8, %v8734_v46  ;;  %v4388_v38 = vmul.f32 %v4356_v47, %v8850_v9 }
 0xf48   : > { %v4275_v31 = vpop.f32.mrf.mxu0  ;;  %v4539_v33 = vadd.f32 1.0, %v6562_v41  ;;  %6571 = vtanh.f32 %v4482_v49  ;;  %v4570_v56 = vmul.f32 %v4538_v40, %v4314_v45  ;;  %v4569_v6 = vmul.f32 %v4537_v54, %v4313_v1 }
 0xf49   : > { %v4358_v63 = vmul.f32 0.044715, %v8858_v16  ;;  %v4483_v0 = vmul.f32 0.7978846, %v4451_v61  ;;  %6573 = vtanh.f32 %v4480_v28  ;;  %v4568_v29 = vmul.f32 %v4536_v27, %v4312_v57 }
 0xf4a   : > { %v4279_v25 = vpop.f32.mrf.mxu0  ;;  %v4571_v26 = vmul.f32 %v4539_v33, %v4315_v19  ;;  %6575 = vtanh.f32 %v4481_v12  ;;  %v4420_v42 = vmul.f32 %v4388_v38, %v8850_v9  ;;  %v4357_v35 = vmul.f32 0.044715, %v8864_v3 }
 0xf4b   : > { %v4390_v7 = vmul.f32 %v4358_v63, %v8858_v16  ;;  %v8870_v17 = vadd.f32 %v4279_v25, %v8730_v10  ;;  %v4598_v8 = vpack.c.bf16 %v4570_v56, %v4568_v29  ;;  %v8875_v52 = vadd.f32 %v4275_v31, %v8734_v46 }
 0xf4c   : > { %v6564_v60 = vpop.eup %6563  ;;  %v4281_v30 = vpop.f32.mrf.mxu0  ;;  %v4599_v11 = vpack.c.bf16 %v4571_v26, %v4569_v6  ;;  %6577 = vtanh.f32 %v4483_v0  ;;  %v4317_v40 = vmul.f32 0.5, %v8791_v48  ;;  %v4319_v27 = vmul.f32 0.5, %v8806_v59 }
 0xf4d   : > { %v6566_v18 = vpop.eup %6565  ;;  %v4542_v45 = vadd.f32 1.0, %v6564_v60  ;;  %v4422_v49 = vmul.f32 %v4390_v7, %v8858_v16  ;;  %v4360_v28 = vmul.f32 0.044715, %v8870_v17  ;;  %v4318_v61 = vmul.f32 0.5, %v8799_v20 }
 0xf4e   : > { %4787 = vmatprep.mubr.bf16.mxu1 %v4599_v11  ;;  %v4283_v54 = vpop.f32.mrf.mxu0  ;;  %v6568_v57 = vpop.eup %6567  ;;  %v4540_v31 = vadd.f32 1.0, %v6566_v18  ;;  %v4452_v1 = vadd.f32 %v4420_v42, %v8850_v9  ;;  %v4389_v19 = vmul.f32 %v4357_v35, %v8864_v3  ;;  %v4359_v33 = vmul.f32 0.044715, %v8875_v52 }
 0xf4f   : > { %4788 = vmatmul.mubr.bf16.gmra.mxu1 %v4598_v8  ;;  %v8879_v47 = vadd.f32 %v4283_v54, %v8730_v10  ;;  %v4541_v23 = vadd.f32 1.0, %v6568_v57  ;;  %v6570_v41 = vpop.eup %6569  ;;  %v8889_v56 = vadd.f32 %v4281_v30, %v8734_v46  ;;  %v4316_v48 = vmul.f32 0.5, %v8787_v22 }
 0xf50   : > { %v4285_v62 = vpop.f32.mrf.mxu0  ;;  %v4543_v63 = vadd.f32 1.0, %v6570_v41  ;;  %v4574_v38 = vmul.f32 %v4542_v45, %v4318_v61  ;;  %v4454_v25 = vadd.f32 %v4422_v49, %v8858_v16  ;;  %v4392_v0 = vmul.f32 %v4360_v28, %v8870_v17 }
 0xf51   : > { %v4362_v59 = vmul.f32 0.044715, %v8879_v47  ;;  %v4573_v6 = vmul.f32 %v4541_v23, %v4317_v40  ;;  %v4572_v29 = vmul.f32 %v4540_v31, %v4316_v48  ;;  %v4321_v60 = vmul.f32 0.5, %v8822_v32 }
 0xf52   : > { %v4289_v12 = vpop.f32.mrf.mxu0  ;;  %v4575_v26 = vmul.f32 %v4543_v63, %v4319_v27  ;;  %v4323_v7 = vmul.f32 0.5, %v8835_v36  ;;  %v4484_v30 = vmul.f32 0.7978846, %v4452_v1  ;;  %v4421_v18 = vmul.f32 %v4389_v19, %v8864_v3 }
 0xf53   : > { %v4391_v22 = vmul.f32 %v4359_v33, %v8875_v52  ;;  %v8900_v35 = vadd.f32 %v4285_v62, %v8734_v46  ;;  %v8903_v54 = vadd.f32 %v4289_v12, %v8730_v10  ;;  %v4600_v32 = vpack.c.bf16 %v4574_v38, %v4572_v29 }
 0xf54   : > { %v4291_v20 = vpop.f32.mrf.mxu0  ;;  %v4601_v8 = vpack.c.bf16 %v4575_v26, %v4573_v6  ;;  %v4486_v36 = vmul.f32 0.7978846, %v4454_v25  ;;  %v4361_v49 = vmul.f32 0.044715, %v8889_v56  ;;  %v4394_v40 = vmul.f32 %v4362_v59, %v8879_v47 }
 0xf55   : > { %v6572_v11 = vpop.eup %6571  ;;  %v4320_v41 = vmul.f32 0.5, %v8813_v15  ;;  %v4424_v62 = vmul.f32 %v4392_v0, %v8870_v17  ;;  %v8913_v27 = vadd.f32 %v4291_v20, %v8734_v46  ;;  %6579 = vtanh.f32 %v4484_v30 }
 0xf56   : > { %v4293_v42 = vpop.f32.mrf.mxu0  ;;  %v6574_v45 = vpop.eup %6573  ;;  %4795 = vmatprep.mubr.bf16.mxu1 %v4601_v8  ;;  %v4546_v31 = vadd.f32 1.0, %v6572_v11  ;;  %v4423_v1 = vmul.f32 %v4391_v22, %v8875_v52  ;;  %v4322_v12 = vmul.f32 0.5, %v8831_v4  ;;  %v4363_v15 = vmul.f32 0.044715, %v8900_v35 }
 0xf57   : > { %v8906_v57 = vadd.f32 %v4293_v42, %v8730_v10  ;;  %v6576_v28 = vpop.eup %6575  ;;  %4796 = vmatmul.mubr.bf16.gmra.mxu1 %v4600_v32  ;;  %v4364_v48 = vmul.f32 0.044715, %v8903_v54  ;;  %v4544_v25 = vadd.f32 1.0, %v6574_v45  ;;  %6581 = vtanh.f32 %v4486_v36 }
 0xf58   : > { %v4295_v23 = vpop.f32.mrf.mxu0  ;;  %v4545_v33 = vadd.f32 1.0, %v6576_v28  ;;  %v4393_v59 = vmul.f32 %v4361_v49, %v8889_v56  ;;  %v4426_v20 = vmul.f32 %v4394_v40, %v8879_v47  ;;  %v4456_v0 = vadd.f32 %v4424_v62, %v8870_v17 }
 0xf59   : > { %v4366_v61 = vmul.f32 0.044715, %v8906_v57  ;;  %v6578_v63 = vpop.eup %6577  ;;  %v8921_v38 = vadd.f32 %v4295_v23, %v8734_v46  ;;  %v4365_v4 = vmul.f32 0.044715, %v8913_v27  ;;  %v4578_v11 = vmul.f32 %v4546_v31, %v4322_v12 }
 0xf5a   : > { %v4299_v19 = vpop.f32.mrf.mxu0  ;;  %v4547_v26 = vadd.f32 1.0, %v6578_v63  ;;  %v4577_v22 = vmul.f32 %v4545_v33, %v4321_v60  ;;  %v4453_v32 = vadd.f32 %v4421_v18, %v8864_v3  ;;  %v4395_v45 = vmul.f32 %v4363_v15, %v8900_v35 }
 0xf5b   : > { %v4398_v29 = vmul.f32 %v4366_v61, %v8906_v57  ;;  %v4396_v36 = vmul.f32 %v4364_v48, %v8903_v54  ;;  %v4367_v49 = vmul.f32 0.044715, %v8921_v38  ;;  %v4576_v40 = vmul.f32 %v4544_v25, %v4320_v41 }
 0xf5c   : > { %v4301_v6 = vpop.f32.mrf.mxu0  ;;  %v4579_v8 = vmul.f32 %v4547_v26, %v4323_v7  ;;  %v4458_v23 = vadd.f32 %v4426_v20, %v8879_v47  ;;  %v4455_v60 = vadd.f32 %v4423_v1, %v8875_v52  ;;  %v4397_v7 = vmul.f32 %v4365_v4, %v8913_v27 }
 0xf5d   : > { %v8929_v30 = vadd.f32 %v4301_v6, %v8734_v46  ;;  %v4602_v31 = vpack.c.bf16 %v4578_v11, %v4576_v40  ;;  %v4485_v33 = vmul.f32 0.7978846, %v4453_v32  ;;  %v4430_v12 = vmul.f32 %v4398_v29, %v8906_v57 }
 0xf5e   : > { %v4303_v42 = vpop.f32.mrf.mxu0  ;;  %v4603_v28 = vpack.c.bf16 %v4579_v8, %v4577_v22  ;;  %v8946_v41 = vadd.f32 %v4299_v19, %v8730_v10  ;;  %v4487_v15 = vmul.f32 0.7978846, %v4455_v60  ;;  %v4425_v48 = vmul.f32 %v4393_v59, %v8889_v56 }
 0xf5f   : > { %v8937_v62 = vadd.f32 %v4303_v42, %v8730_v10  ;;  %v4369_v63 = vmul.f32 0.044715, %v8929_v30  ;;  %v4427_v1 = vmul.f32 %v4395_v45, %v8900_v35  ;;  %v4399_v25 = vmul.f32 %v4367_v49, %v8921_v38 }
 0xf60   : > { %v4305_v61 = vpop.f32.mrf.mxu0  ;;  %4803 = vmatprep.mubr.bf16.mxu1 %v4603_v28  ;;  %v4490_v20 = vmul.f32 0.7978846, %v4458_v23  ;;  %6583 = vtanh.f32 %v4485_v33  ;;  %v4488_v26 = vmul.f32 0.7978846, %v4456_v0  ;;  %v4428_v10 = vmul.f32 %v4396_v36, %v8903_v54 }
 0xf61   : > { %v8942_v18 = vadd.f32 %v4305_v61, %v8734_v46  ;;  %4804 = vmatmul.mubr.bf16.gmra.mxu1 %v4602_v31  ;;  %v4370_v6 = vmul.f32 0.044715, %v8937_v62  ;;  %6585 = vtanh.f32 %v4487_v15  ;;  %v4429_v19 = vmul.f32 %v4397_v7, %v8913_v27 }
 0xf62   : > { %v4462_v4 = vadd.f32 %v4430_v12, %v8906_v57  ;;  %v4368_v59 = vmul.f32 0.044715, %v8946_v41  ;;  %v4401_v29 = vmul.f32 %v4369_v63, %v8929_v30  ;;  %v6580_v11 = vpop.eup %6579  ;;  %v4431_v22 = vmul.f32 %v4399_v25, %v8921_v38 }
 0xf63   : > { %v4371_v46 = vmul.f32 0.044715, %v8942_v18  ;;  %v4457_v42 = vadd.f32 %v4425_v48, %v8889_v56  ;;  %v4459_v0 = vadd.f32 %v4427_v1, %v8900_v35  ;;  %6587 = vtanh.f32 %v4490_v20 }
 0xf64   : > { %v4402_v32 = vmul.f32 %v4370_v6, %v8937_v62  ;;  %v6582_v45 = vpop.eup %6581  ;;  %v4460_v36 = vadd.f32 %v4428_v10, %v8903_v54  ;;  %6589 = vtanh.f32 %v4488_v26  ;;  %v4494_v23 = vmul.f32 0.7978846, %v4462_v4 }
 0xf65   : > { %v4403_v8 = vmul.f32 %v4371_v46, %v8942_v18  ;;  %v4489_v49 = vmul.f32 0.7978846, %v4457_v42  ;;  %v4491_v40 = vmul.f32 0.7978846, %v4459_v0  ;;  %v4400_v28 = vmul.f32 %v4368_v59, %v8946_v41 }
 0xf66   : > { %v4433_v61 = vmul.f32 %v4401_v29, %v8929_v30  ;;  %v4461_v7 = vadd.f32 %v4429_v19, %v8913_v27  ;;  %v4463_v31 = vadd.f32 %v4431_v22, %v8921_v38  ;;  %v4434_v33 = vmul.f32 %v4402_v32, %v8937_v62 }
 0xf67   : > { %v4435_v60 = vmul.f32 %v4403_v8, %v8942_v18  ;;  %6591 = vtanh.f32 %v4489_v49  ;;  %v4492_v12 = vmul.f32 0.7978846, %v4460_v36  ;;  %v4432_v48 = vmul.f32 %v4400_v28, %v8946_v41 }
 0xf68   : > { %6593 = vtanh.f32 %v4491_v40  ;;  %v4493_v63 = vmul.f32 0.7978846, %v4461_v7  ;;  %v4495_v15 = vmul.f32 0.7978846, %v4463_v31  ;;  %v4465_v1 = vadd.f32 %v4433_v61, %v8929_v30 }
 0xf69   : > { %6595 = vtanh.f32 %v4494_v23  ;;  %v4467_v25 = vadd.f32 %v4435_v60, %v8942_v18  ;;  %v4466_v46 = vadd.f32 %v4434_v33, %v8937_v62  ;;  %v4550_v20 = vadd.f32 1.0, %v6582_v45 }
 0xf6a   : > { %6597 = vtanh.f32 %v4493_v63  ;;  %v4497_v6 = vmul.f32 0.7978846, %v4465_v1  ;;  %v4326_v10 = vmul.f32 0.5, %v8858_v16  ;;  %v4464_v59 = vadd.f32 %v4432_v48, %v8946_v41 }
 0xf6b   : > { %6599 = vtanh.f32 %v4495_v15  ;;  %v4499_v19 = vmul.f32 0.7978846, %v4467_v25  ;;  %v4548_v22 = vadd.f32 1.0, %v6580_v11  ;;  %v4325_v8 = vmul.f32 0.5, %v8864_v3 }
 0xf6c   : > { %6601 = vtanh.f32 %v4492_v12  ;;  %v4327_v42 = vmul.f32 0.5, %v8875_v52  ;;  %v4498_v32 = vmul.f32 0.7978846, %v4466_v46  ;;  %v4324_v45 = vmul.f32 0.5, %v8850_v9 }
 0xf6d   : > { %v6584_v26 = vpop.eup %6583  ;;  %6603 = vtanh.f32 %v4497_v6  ;;  %v4582_v36 = vmul.f32 %v4550_v20, %v4326_v10  ;;  %v4496_v23 = vmul.f32 0.7978846, %v4464_v59  ;;  %v4330_v33 = vmul.f32 0.5, %v8879_v47 }
 0xf6e   : > { %v6586_v4 = vpop.eup %6585  ;;  %v4549_v29 = vadd.f32 1.0, %v6584_v26  ;;  %6605 = vtanh.f32 %v4499_v19  ;;  %v4580_v28 = vmul.f32 %v4548_v22, %v4324_v45  ;;  %v4329_v63 = vmul.f32 0.5, %v8889_v56 }
 0xf6f   : > { %v4551_v0 = vadd.f32 1.0, %v6586_v4  ;;  %6607 = vtanh.f32 %v4498_v32  ;;  %v4331_v15 = vmul.f32 0.5, %v8900_v35  ;;  %v4328_v25 = vmul.f32 0.5, %v8870_v17 }
 0xf70   : > { %v6588_v49 = vpop.eup %6587  ;;  %v4581_v40 = vmul.f32 %v4549_v29, %v4325_v8  ;;  %v4604_v11 = vpack.c.bf16 %v4582_v36, %v4580_v28  ;;  %6609 = vtanh.f32 %v4496_v23  ;;  %v4333_v59 = vmul.f32 0.5, %v8913_v27 }
 0xf71   : > { %v4583_v16 = vmul.f32 %v4551_v0, %v4327_v42  ;;  %v6590_v61 = vpop.eup %6589  ;;  %v4554_v31 = vadd.f32 1.0, %v6588_v49  ;;  %v4335_v47 = vmul.f32 0.5, %v8921_v38  ;;  %v4339_v17 = vmul.f32 0.5, %v8942_v18 }
 0xf72   : > { %v4552_v9 = vadd.f32 1.0, %v6590_v61  ;;  %v4337_v38 = vmul.f32 0.5, %v8929_v30  ;;  %v4332_v23 = vmul.f32 0.5, %v8903_v54  ;;  %v4336_v30 = vmul.f32 0.5, %v8946_v41 }
 0xf73   : > { %v4605_v60 = vpack.c.bf16 %v4583_v16, %v4581_v40  ;;  %v4586_v46 = vmul.f32 %v4554_v31, %v4330_v33  ;;  %v4334_v40 = vmul.f32 0.5, %v8906_v57 }
 0xf74   : > { %v6592_v7 = vpop.eup %6591  ;;  %v4584_v4 = vmul.f32 %v4552_v9, %v4328_v25 }
 0xf75   : > { %4811 = vmatprep.mubr.bf16.mxu1 %v4605_v60  ;;  %v4553_v3 = vadd.f32 1.0, %v6592_v7  ;;  %v6594_v52 = vpop.eup %6593 }
 0xf76   : > { %4812 = vmatmul.mubr.bf16.gmra.mxu1 %v4604_v11  ;;  %v6596_v12 = vpop.eup %6595  ;;  %v4555_v48 = vadd.f32 1.0, %v6594_v52  ;;  %v4606_v35 = vpack.c.bf16 %v4586_v46, %v4584_v4  ;;  %v4338_v52 = vmul.f32 0.5, %v8937_v62 }
 0xf77   : > { %v6598_v1 = vpop.eup %6597  ;;  %v4585_v6 = vmul.f32 %v4553_v3, %v4329_v63  ;;  %v4558_v32 = vadd.f32 1.0, %v6596_v12  ;;  %v8997_v63 = vld [vmem:[%s722_s30] ss:$0 sm:$0xff] }
 0xf78   : > { %v6600_v20 = vpop.eup %6599  ;;  %v4587_v26 = vmul.f32 %v4555_v48, %v4331_v15  ;;  %v4557_v10 = vadd.f32 1.0, %v6598_v1 }
 0xf79   : > { %v6602_v19 = vpop.eup %6601  ;;  %v4559_v29 = vadd.f32 1.0, %v6600_v20  ;;  %v4590_v28 = vmul.f32 %v4558_v32, %v4334_v40 }
 0xf7a   : > { %v6604_v22 = vpop.eup %6603  ;;  %v4607_v56 = vpack.c.bf16 %v4587_v26, %v4585_v6  ;;  %v4589_v42 = vmul.f32 %v4557_v10, %v4333_v59  ;;  %v4556_v27 = vadd.f32 1.0, %v6602_v19 }
 0xf7b   : > { %v6606_v8 = vpop.eup %6605  ;;  %v4591_v0 = vmul.f32 %v4559_v29, %v4335_v47  ;;  %v4561_v45 = vadd.f32 1.0, %v6604_v22 }
 0xf7c   : > { %4819 = vmatprep.mubr.bf16.mxu1 %v4607_v56  ;;  %v4563_v36 = vadd.f32 1.0, %v6606_v8  ;;  %v6608_v61 = vpop.eup %6607  ;;  %v4588_v7 = vmul.f32 %v4556_v27, %v4332_v23 }
 0xf7d   : > { %v4609_v49 = vpack.c.bf16 %v4591_v0, %v4589_v42  ;;  %v4593_v60 = vmul.f32 %v4561_v45, %v4337_v38  ;;  %v6610_v11 = vpop.eup %6609  ;;  %v4562_v3 = vadd.f32 1.0, %v6608_v61 }
 0xf7e   : > { %4820 = vmatmul.mubr.bf16.gmra.mxu1 %v4606_v35  ;;  %v4595_v16 = vmul.f32 %v4563_v36, %v4339_v17  ;;  %v4608_v31 = vpack.c.bf16 %v4590_v28, %v4588_v7  ;;  %v4560_v57 = vadd.f32 1.0, %v6610_v11 }
 0xf7f   : > { %4827 = vmatprep.mubr.bf16.mxu1 %v4609_v49  ;;  %v4594_v33 = vmul.f32 %v4562_v3, %v4338_v52 }
 0xf80   : > { %v4611_v18 = vpack.c.bf16 %v4595_v16, %v4593_v60  ;;  %v4592_v9 = vmul.f32 %v4560_v57, %v4336_v30 }
 0xf82   : > { %v4610_v12 = vpack.c.bf16 %v4594_v33, %v4592_v9 }
 0xf86   : > { %4828 = vmatmul.mubr.bf16.gmra.mxu1 %v4608_v31 }
 0xf87   : > { %4835 = vmatprep.mubr.bf16.mxu1 %v4611_v18 }
 0xf8e   : > { %4836 = vmatmul.mubr.bf16.gmra.mxu1 %v4610_v12 }
0x1007   : > { %v5653_v54 = vpop.f32.mrf.mxu1 }
0x1009   : > { %v5654_v15 = vpop.f32.mrf.mxu1 }
0x100a   : > { %v5655_v48 = vadd.f32 %v5654_v15, %v5653_v54 }
0x100b   : > { %v5656_v1 = vpop.f32.mrf.mxu1 }
0x100c   : > { %v4782_v62 = vadd.f32 %v5655_v48, %v8997_v63 }
0x100d   : > { %v5657_v25 = vpop.f32.mrf.mxu1 }
0x100e   : > { %v5658_v46 = vadd.f32 %v5657_v25, %v5656_v1  ;;  %v9001_v41 = vadd.f32 %v4782_v62, %v8613_v55 }
0x100f   : > { %v5659_v20 = vpop.f32.mrf.mxu1 }
0x1010   : > { %v4785_v6 = vadd.f32 %v5658_v46, %v8997_v63  ;;  %4862 = vadd.xlane.f32.xlu1 %v9001_v41 }
0x1011   : > { %v5660_v26 = vpop.f32.mrf.mxu1 }
0x1012   : > { %v5661_v10 = vadd.f32 %v5660_v26, %v5659_v20  ;;  %v9006_v19 = vadd.f32 %v4785_v6, %v8616_v53 }
0x1013   : > { %v5662_v4 = vpop.f32.mrf.mxu1 }
0x1014   : > { %v4790_v59 = vadd.f32 %v5661_v10, %v8997_v63  ;;  %4864 = vadd.xlane.f32.xlu0 %v9006_v19 }
0x1015   : > { %v5663_v47 = vpop.f32.mrf.mxu1 }
0x1016   : > { %v5664_v29 = vadd.f32 %v5663_v47, %v5662_v4  ;;  %v9011_v55 = vadd.f32 %v4790_v59, %v8630_v39 }
0x1017   : > { %v5665_v56 = vpop.f32.mrf.mxu1 }
0x1018   : > { %v4793_v22 = vadd.f32 %v5664_v29, %v8997_v63  ;;  %4866 = vadd.xlane.f32.xlu1 %v9011_v55 }
0x1019   : > { %v5666_v53 = vpop.f32.mrf.mxu1 }
0x101a   : > { %v9016_v8 = vadd.f32 %v4793_v22, %v8626_v51  ;;  %v5667_v35 = vadd.f32 %v5666_v53, %v5665_v56 }
0x101b   : > { %v5668_v42 = vpop.f32.mrf.mxu1 }
0x101c   : > { %4868 = vadd.xlane.f32.xlu0 %v9016_v8  ;;  %v4798_v0 = vadd.f32 %v5667_v35, %v8997_v63 }
0x101d   : > { %v5669_v32 = vpop.f32.mrf.mxu1 }
0x101e   : > { %v5670_v17 = vadd.f32 %v5669_v32, %v5668_v42  ;;  %v9021_v39 = vadd.f32 %v4798_v0, %v8643_v58 }
0x1020   : > { %v4801_v45 = vadd.f32 %v5670_v17, %v8997_v63  ;;  %4870 = vadd.xlane.f32.xlu1 %v9021_v39 }
0x1021   : > { %v5671_v36 = vpop.f32.mrf.mxu1 }
0x1022   : > { %v9026_v51 = vadd.f32 %v4801_v45, %v8639_v21 }
0x1023   : > { %v5672_v49 = vpop.f32.mrf.mxu1 }
0x1024   : > { %v5673_v40 = vadd.f32 %v5672_v49, %v5671_v36  ;;  %4872 = vadd.xlane.f32.xlu0 %v9026_v51 }
0x1025   : > { %v5674_v27 = vpop.f32.mrf.mxu1 }
0x1026   : > { %v4806_v38 = vadd.f32 %v5673_v40, %v8997_v63 }
0x1027   : > { %v5675_v16 = vpop.f32.mrf.mxu1 }
0x1028   : > { %v5676_v23 = vadd.f32 %v5675_v16, %v5674_v27  ;;  %v9031_v58 = vadd.f32 %v4806_v38, %v8655_v34 }
0x102a   : > { %v4809_v28 = vadd.f32 %v5676_v23, %v8997_v63  ;;  %4874 = vadd.xlane.f32.xlu1 %v9031_v58 }
0x102c   : > { %v9036_v61 = vadd.f32 %v4809_v28, %v8652_v50 }
0x102e   : > { %4876 = vadd.xlane.f32.xlu0 %v9036_v61 }
0x1036   : > { %v5677_v21 = vpop.f32.mrf.mxu1 }
0x1038   : > { %v5678_v60 = vpop.f32.mrf.mxu1 }
0x1039   : > { %v5679_v7 = vadd.f32 %v5678_v60, %v5677_v21 }
0x103a   : > { %v5680_v11 = vpop.f32.mrf.mxu1 }
0x103b   : > { %v4814_v18 = vadd.f32 %v5679_v7, %v8997_v63 }
0x103c   : > { %v5681_v31 = vpop.f32.mrf.mxu1 }
0x103d   : > { %v5682_v3 = vadd.f32 %v5681_v31, %v5680_v11  ;;  %v9041_v34 = vadd.f32 %v4814_v18, %v8665_v37 }
0x103e   : > { %v5683_v52 = vpop.f32.mrf.mxu1 }
0x103f   : > { %v4817_v57 = vadd.f32 %v5682_v3, %v8997_v63  ;;  %4878 = vadd.xlane.f32.xlu1 %v9041_v34 }
0x1040   : > { %v5684_v50 = vpop.f32.mrf.mxu1 }
0x1041   : > { %v5685_v30 = vadd.f32 %v5684_v50, %v5683_v52  ;;  %v9046_v33 = vadd.f32 %v4817_v57, %v8668_v24 }
0x1042   : > { %v5686_v9 = vpop.f32.mrf.mxu1 }
0x1043   : > { %v4822_v12 = vadd.f32 %v5685_v30, %v8997_v63  ;;  %4880 = vadd.xlane.f32.xlu0 %v9046_v33 }
0x1044   : > { %v5687_v54 = vpop.f32.mrf.mxu1 }
0x1045   : > { %v5688_v15 = vadd.f32 %v5687_v54, %v5686_v9  ;;  %v9051_v37 = vadd.f32 %v4822_v12, %v8682_v5 }
0x1046   : > { %v5689_v48 = vpop.f32.mrf.mxu1 }
0x1047   : > { %v4825_v1 = vadd.f32 %v5688_v15, %v8997_v63  ;;  %4882 = vadd.xlane.f32.xlu1 %v9051_v37 }
0x1048   : > { %v5690_v62 = vpop.f32.mrf.mxu1 }
0x1049   : > { %v5691_v25 = vadd.f32 %v5690_v62, %v5689_v48  ;;  %v9056_v24 = vadd.f32 %v4825_v1, %v8678_v13 }
0x104a   : > { %v5692_v46 = vpop.f32.mrf.mxu1 }
0x104b   : > { %v4830_v20 = vadd.f32 %v5691_v25, %v8997_v63  ;;  %4884 = vadd.xlane.f32.xlu0 %v9056_v24 }
0x104c   : > { %v5693_v6 = vpop.f32.mrf.mxu1 }
0x104d   : > { %v5694_v26 = vadd.f32 %v5693_v6, %v5692_v46  ;;  %v9061_v5 = vadd.f32 %v4830_v20, %v8695_v14 }
0x104e   : > { %v5695_v10 = vpop.f32.mrf.mxu1 }
0x104f   : > { %v4833_v4 = vadd.f32 %v5694_v26, %v8997_v63  ;;  %4886 = vadd.xlane.f32.xlu1 %v9061_v5 }
0x1050   : > { %v5696_v59 = vpop.f32.mrf.mxu1 }
0x1051   : > { %v5697_v47 = vadd.f32 %v5696_v59, %v5695_v10  ;;  %v9066_v13 = vadd.f32 %v4833_v4, %v8691_v43 }
0x1052   : > { %v5698_v29 = vpop.f32.mrf.mxu1 }
0x1053   : > { %v4838_v22 = vadd.f32 %v5697_v47, %v8997_v63  ;;  %4888 = vadd.xlane.f32.xlu0 %v9066_v13 }
0x1054   : > { %v5699_v56 = vpop.f32.mrf.mxu1 }
0x1055   : > { %v5700_v53 = vadd.f32 %v5699_v56, %v5698_v29  ;;  %v9071_v14 = vadd.f32 %v4838_v22, %v8707_v2 }
0x1057   : > { %v4841_v35 = vadd.f32 %v5700_v53, %v8997_v63  ;;  %4890 = vadd.xlane.f32.xlu1 %v9071_v14 }
0x1059   : > { %v9076_v42 = vadd.f32 %v4841_v35, %v8704_v44 }
0x105b   : > { %4892 = vadd.xlane.f32.xlu0 %v9076_v42 }
0x1099   : > { %v4863_v43 = vpop.xlane.xlu1 %4862 }
0x109a   : > { %v4894_v0 = vmul.f32 0.0078125, %v4863_v43 }
0x109c   : > { %v9080_v32 = vsub.f32 %v9001_v41, %v4894_v0 }
0x109d   : > { %v4865_v17 = vpop.xlane.xlu0 %4864 }
0x109e   : > { %v4895_v45 = vmul.f32 0.0078125, %v4865_v17  ;;  %v4926_v2 = vmul.f32 %v9080_v32, %v9080_v32 }
0x10a0   : > { %v9085_v36 = vsub.f32 %v9006_v19, %v4895_v45  ;;  %4942 = vadd.xlane.f32.xlu1 %v4926_v2 }
0x10a1   : > { %v4867_v63 = vpop.xlane.xlu1 %4866 }
0x10a2   : > { %v4896_v49 = vmul.f32 0.0078125, %v4867_v63  ;;  %v4927_v44 = vmul.f32 %v9085_v36, %v9085_v36 }
0x10a4   : > { %v9090_v40 = vsub.f32 %v9011_v55, %v4896_v49  ;;  %4944 = vadd.xlane.f32.xlu0 %v4927_v44 }
0x10a5   : > { %v4869_v41 = vpop.xlane.xlu0 %4868 }
0x10a6   : > { %v4897_v27 = vmul.f32 0.0078125, %v4869_v41  ;;  %v4928_v38 = vmul.f32 %v9090_v40, %v9090_v40 }
0x10a8   : > { %v9095_v16 = vsub.f32 %v9016_v8, %v4897_v27  ;;  %4946 = vadd.xlane.f32.xlu1 %v4928_v38 }
0x10a9   : > { %v4871_v23 = vpop.xlane.xlu1 %4870 }
0x10aa   : > { %v4929_v19 = vmul.f32 %v9095_v16, %v9095_v16  ;;  %v4898_v28 = vmul.f32 0.0078125, %v4871_v23 }
0x10ac   : > { %4948 = vadd.xlane.f32.xlu0 %v4929_v19  ;;  %v9100_v21 = vsub.f32 %v9021_v39, %v4898_v28  ;;  %v9164_v28 = vld [vmem:[%s725_s22] ss:$0 sm:$0xff] }
0x10ad   : > { %v4873_v55 = vpop.xlane.xlu0 %4872 }
0x10ae   : > { %v4899_v60 = vmul.f32 0.0078125, %v4873_v55  ;;  %v4930_v7 = vmul.f32 %v9100_v21, %v9100_v21 }
0x10b0   : > { %v9105_v11 = vsub.f32 %v9026_v51, %v4899_v60  ;;  %4950 = vadd.xlane.f32.xlu1 %v4930_v7 }
0x10b2   : > { %v4931_v8 = vmul.f32 %v9105_v11, %v9105_v11 }
0x10b3   : > { %v4875_v18 = vpop.xlane.xlu1 %4874 }
0x10b4   : > { %v4900_v31 = vmul.f32 0.0078125, %v4875_v18  ;;  %4952 = vadd.xlane.f32.xlu0 %v4931_v8  ;;  %v9172_v8 = vld [vmem:[%s728_s9] ss:$0 sm:$0xff] }
0x10b6   : > { %v9110_v3 = vsub.f32 %v9031_v58, %v4900_v31 }
0x10b7   : > { %v4877_v39 = vpop.xlane.xlu0 %4876 }
0x10b8   : > { %v4901_v52 = vmul.f32 0.0078125, %v4877_v39  ;;  %v4932_v57 = vmul.f32 %v9110_v3, %v9110_v3 }
0x10ba   : > { %v9115_v50 = vsub.f32 %v9036_v61, %v4901_v52  ;;  %4954 = vadd.xlane.f32.xlu1 %v4932_v57 }
0x10bc   : > { %v4933_v51 = vmul.f32 %v9115_v50, %v9115_v50 }
0x10be   : > { %4956 = vadd.xlane.f32.xlu0 %v4933_v51 }
0x10c8   : > { %v4879_v30 = vpop.xlane.xlu1 %4878 }
0x10c9   : > { %v4902_v9 = vmul.f32 0.0078125, %v4879_v30 }
0x10cb   : > { %v9120_v12 = vsub.f32 %v9041_v34, %v4902_v9 }
0x10cc   : > { %v4881_v58 = vpop.xlane.xlu0 %4880 }
0x10cd   : > { %v4903_v54 = vmul.f32 0.0078125, %v4881_v58  ;;  %v4934_v15 = vmul.f32 %v9120_v12, %v9120_v12 }
0x10cf   : > { %v9125_v48 = vsub.f32 %v9046_v33, %v4903_v54  ;;  %4958 = vadd.xlane.f32.xlu1 %v4934_v15 }
0x10d0   : > { %v4883_v61 = vpop.xlane.xlu1 %4882 }
0x10d1   : > { %v4904_v1 = vmul.f32 0.0078125, %v4883_v61  ;;  %v4935_v62 = vmul.f32 %v9125_v48, %v9125_v48 }
0x10d3   : > { %v9130_v25 = vsub.f32 %v9051_v37, %v4904_v1  ;;  %4960 = vadd.xlane.f32.xlu0 %v4935_v62 }
0x10d4   : > { %v4885_v34 = vpop.xlane.xlu0 %4884 }
0x10d5   : > { %v4905_v46 = vmul.f32 0.0078125, %v4885_v34  ;;  %v4936_v20 = vmul.f32 %v9130_v25, %v9130_v25 }
0x10d7   : > { %v9135_v6 = vsub.f32 %v9056_v24, %v4905_v46  ;;  %4962 = vadd.xlane.f32.xlu1 %v4936_v20 }
0x10d8   : > { %v4887_v33 = vpop.xlane.xlu1 %4886 }
0x10d9   : > { %v4906_v26 = vmul.f32 0.0078125, %v4887_v33  ;;  %v4937_v10 = vmul.f32 %v9135_v6, %v9135_v6 }
0x10db   : > { %v9140_v4 = vsub.f32 %v9061_v5, %v4906_v26  ;;  %4964 = vadd.xlane.f32.xlu0 %v4937_v10 }
0x10dc   : > { %v4889_v37 = vpop.xlane.xlu0 %4888 }
0x10dd   : > { %v4907_v59 = vmul.f32 0.0078125, %v4889_v37  ;;  %v4938_v47 = vmul.f32 %v9140_v4, %v9140_v4 }
0x10df   : > { %v9145_v29 = vsub.f32 %v9066_v13, %v4907_v59  ;;  %4966 = vadd.xlane.f32.xlu1 %v4938_v47 }
0x10e0   : > { %v4891_v24 = vpop.xlane.xlu1 %4890 }
0x10e1   : > { %v4908_v22 = vmul.f32 0.0078125, %v4891_v24  ;;  %v4939_v56 = vmul.f32 %v9145_v29, %v9145_v29 }
0x10e3   : > { %v9150_v53 = vsub.f32 %v9071_v14, %v4908_v22  ;;  %4968 = vadd.xlane.f32.xlu0 %v4939_v56 }
0x10e4   : > { %v4893_v5 = vpop.xlane.xlu0 %4892 }
0x10e5   : > { %v4909_v35 = vmul.f32 0.0078125, %v4893_v5  ;;  %v4940_v43 = vmul.f32 %v9150_v53, %v9150_v53 }
0x10e7   : > { %v9155_v0 = vsub.f32 %v9076_v42, %v4909_v35  ;;  %4970 = vadd.xlane.f32.xlu1 %v4940_v43 }
0x10e9   : > { %v4941_v13 = vmul.f32 %v9155_v0, %v9155_v0 }
0x10eb   : > { %4972 = vadd.xlane.f32.xlu0 %v4941_v13 }
0x1129   : > { %v4943_v17 = vpop.xlane.xlu1 %4942 }
0x112a   : > { %v4974_v45 = vmul.f32 0.0078125, %v4943_v17 }
0x112c   : > { %v4990_v2 = vadd.f32 1e-12, %v4974_v45 }
0x112d   : > { %v4945_v14 = vpop.xlane.xlu0 %4944 }
0x112e   : > { %6611 = vrsqrt.f32 %v4990_v2  ;;  %v4975_v63 = vmul.f32 0.0078125, %v4945_v14 }
0x1130   : > { %v4991_v49 = vadd.f32 1e-12, %v4975_v63 }
0x1131   : > { %v4947_v44 = vpop.xlane.xlu1 %4946 }
0x1132   : > { %6613 = vrsqrt.f32 %v4991_v49  ;;  %v4976_v41 = vmul.f32 0.0078125, %v4947_v44 }
0x1134   : > { %v4992_v27 = vadd.f32 1e-12, %v4976_v41 }
0x1135   : > { %v4949_v42 = vpop.xlane.xlu0 %4948 }
0x1136   : > { %6615 = vrsqrt.f32 %v4992_v27  ;;  %v4977_v38 = vmul.f32 0.0078125, %v4949_v42 }
0x1138   : > { %v4993_v19 = vadd.f32 1e-12, %v4977_v38 }
0x1139   : > { %v4951_v55 = vpop.xlane.xlu1 %4950 }
0x113a   : > { %6617 = vrsqrt.f32 %v4993_v19  ;;  %v4978_v7 = vmul.f32 0.0078125, %v4951_v55 }
0x113b   : > { %v6612_v23 = vpop.eup %6611 }
0x113c   : > { %v5022_v60 = vmul.f32 %v6612_v23, %v9080_v32  ;;  %v4994_v31 = vadd.f32 1e-12, %v4978_v7 }
0x113d   : > { %v4953_v52 = vpop.xlane.xlu0 %4952 }
0x113e   : > { %v5044_v18 = vmul.f32 %v9164_v28, %v5022_v60  ;;  %6619 = vrsqrt.f32 %v4994_v31  ;;  %v4979_v30 = vmul.f32 0.0078125, %v4953_v52 }
0x113f   : > { %v6614_v39 = vpop.eup %6613 }
0x1140   : > { %v5066_v57 = vadd.f32 %v9172_v8, %v5044_v18  ;;  %v5023_v51 = vmul.f32 %v6614_v39, %v9085_v36  ;;  %v4995_v9 = vadd.f32 1e-12, %v4979_v30 }
0x1142   : > { %5082 = vst [vmem:[%s6895_s11] sm:$0xff] %v5066_v57  ;;  %v5045_v32 = vmul.f32 %v9164_v28, %v5023_v51  ;;  %6621 = vrsqrt.f32 %v4995_v9 }
0x1143   : > { %v6616_v58 = vpop.eup %6615  ;;  %v4955_v61 = vpop.xlane.xlu1 %4954 }
0x1144   : > { %v5067_v54 = vadd.f32 %v9172_v8, %v5045_v32  ;;  %v5024_v15 = vmul.f32 %v6616_v58, %v9090_v40  ;;  %v4980_v62 = vmul.f32 0.0078125, %v4955_v61 }
0x1146   : > { %5083 = vst [vmem:[%s6895_s11 + $0x8] sm:$0xff] %v5067_v54  ;;  %v5046_v1 = vmul.f32 %v9164_v28, %v5024_v15  ;;  %v4996_v20 = vadd.f32 1e-12, %v4980_v62 }
0x1147   : > { %v6618_v36 = vpop.eup %6617  ;;  %v4957_v33 = vpop.xlane.xlu0 %4956 }
0x1148   : > { %v5068_v34 = vadd.f32 %v9172_v8, %v5046_v1  ;;  %v5025_v46 = vmul.f32 %v6618_v36, %v9095_v16  ;;  %6623 = vrsqrt.f32 %v4996_v20  ;;  %v4981_v40 = vmul.f32 0.0078125, %v4957_v33 }
0x114a   : > { %5084 = vst [vmem:[%s6895_s11 + $0x10] sm:$0xff] %v5068_v34  ;;  %v5047_v26 = vmul.f32 %v9164_v28, %v5025_v46  ;;  %v4997_v37 = vadd.f32 1e-12, %v4981_v40 }
0x114b   : > { %v6620_v59 = vpop.eup %6619 }
0x114c   : > { %v5069_v10 = vadd.f32 %v9172_v8, %v5047_v26  ;;  %v5026_v47 = vmul.f32 %v6620_v59, %v9100_v21  ;;  %6625 = vrsqrt.f32 %v4997_v37 }
0x114e   : > { %5085 = vst [vmem:[%s6895_s11 + $0x18] sm:$0xff] %v5069_v10  ;;  %v5048_v24 = vmul.f32 %v9164_v28, %v5026_v47 }
0x114f   : > { %v6622_v16 = vpop.eup %6621 }
0x1150   : > { %v5070_v22 = vadd.f32 %v9172_v8, %v5048_v24  ;;  %v5027_v56 = vmul.f32 %v6622_v16, %v9105_v11 }
0x1152   : > { %5086 = vst [vmem:[%s6895_s11 + $0x20] sm:$0xff] %v5070_v22  ;;  %v5049_v5 = vmul.f32 %v9164_v28, %v5027_v56 }
0x1154   : > { %v5071_v35 = vadd.f32 %v9172_v8, %v5049_v5 }
0x1155   : > { %v6624_v43 = vpop.eup %6623 }
0x1156   : > { %5087 = vst [vmem:[%s6895_s11 + $0x28] sm:$0xff] %v5071_v35  ;;  %v5028_v13 = vmul.f32 %v6624_v43, %v9110_v3 }
0x1158   : > { %v5050_v21 = vmul.f32 %v9164_v28, %v5028_v13  ;;  %v4959_v14 = vpop.xlane.xlu1 %4958 }
0x1159   : > { %v6626_v17 = vpop.eup %6625  ;;  %v4982_v63 = vmul.f32 0.0078125, %v4959_v14 }
0x115a   : > { %v5072_v45 = vadd.f32 %v9172_v8, %v5050_v21  ;;  %v5029_v2 = vmul.f32 %v6626_v17, %v9115_v50 }
0x115b   : > { %v4998_v49 = vadd.f32 1e-12, %v4982_v63 }
0x115c   : > { %5088 = vst [vmem:[%s6895_s11 + $0x30] sm:$0xff] %v5072_v45  ;;  %v5051_v11 = vmul.f32 %v9164_v28, %v5029_v2  ;;  %v4961_v41 = vpop.xlane.xlu0 %4960 }
0x115d   : > { %6627 = vrsqrt.f32 %v4998_v49  ;;  %v4983_v27 = vmul.f32 0.0078125, %v4961_v41 }
0x115e   : > { %v5073_v44 = vadd.f32 %v9172_v8, %v5051_v11 }
0x115f   : > { %v4999_v3 = vadd.f32 1e-12, %v4983_v27 }
0x1160   : > { %5089 = vst [vmem:[%s6895_s11 + $0x38] sm:$0xff] %v5073_v44  ;;  %v4963_v42 = vpop.xlane.xlu1 %4962 }
0x1161   : > { %6629 = vrsqrt.f32 %v4999_v3  ;;  %v4984_v38 = vmul.f32 0.0078125, %v4963_v42 }
0x1163   : > { %v5000_v19 = vadd.f32 1e-12, %v4984_v38 }
0x1164   : > { %v4965_v23 = vpop.xlane.xlu0 %4964 }
0x1165   : > { %6631 = vrsqrt.f32 %v5000_v19  ;;  %v4985_v50 = vmul.f32 0.0078125, %v4965_v23 }
0x1167   : > { %v5001_v55 = vadd.f32 1e-12, %v4985_v50 }
0x1168   : > { %v4967_v60 = vpop.xlane.xlu1 %4966 }
0x1169   : > { %6633 = vrsqrt.f32 %v5001_v55  ;;  %v4986_v7 = vmul.f32 0.0078125, %v4967_v60 }
0x116a   : > { %v6628_v18 = vpop.eup %6627 }
0x116b   : > { %v5030_v31 = vmul.f32 %v6628_v18, %v9120_v12  ;;  %v5002_v39 = vadd.f32 1e-12, %v4986_v7 }
0x116c   : > { %v4969_v52 = vpop.xlane.xlu0 %4968 }
0x116d   : > { %v5052_v57 = vmul.f32 %v9164_v28, %v5030_v31  ;;  %6635 = vrsqrt.f32 %v5002_v39  ;;  %v4987_v51 = vmul.f32 0.0078125, %v4969_v52 }
0x116e   : > { %v6630_v30 = vpop.eup %6629 }
0x116f   : > { %v5074_v32 = vadd.f32 %v9172_v8, %v5052_v57  ;;  %v5031_v9 = vmul.f32 %v6630_v30, %v9125_v48  ;;  %v5003_v58 = vadd.f32 1e-12, %v4987_v51 }
0x1170   : > { %v4971_v54 = vpop.xlane.xlu1 %4970 }
0x1171   : > { %5090 = vst [vmem:[%s6895_s11 + $0x40] sm:$0xff] %v5074_v32  ;;  %v5053_v15 = vmul.f32 %v9164_v28, %v5031_v9  ;;  %6637 = vrsqrt.f32 %v5003_v58  ;;  %v4988_v12 = vmul.f32 0.0078125, %v4971_v54 }
0x1172   : > { %v6632_v61 = vpop.eup %6631 }
0x1173   : > { %v5075_v1 = vadd.f32 %v9172_v8, %v5053_v15  ;;  %v5032_v62 = vmul.f32 %v6632_v61, %v9130_v25  ;;  %v5004_v36 = vadd.f32 1e-12, %v4988_v12 }
0x1174   : > { %v4973_v34 = vpop.xlane.xlu0 %4972 }
0x1175   : > { %5091 = vst [vmem:[%s6895_s11 + $0x48] sm:$0xff] %v5075_v1  ;;  %v5054_v46 = vmul.f32 %v9164_v28, %v5032_v62  ;;  %6639 = vrsqrt.f32 %v5004_v36  ;;  %v4989_v48 = vmul.f32 0.0078125, %v4973_v34 }
0x1176   : > { %v6634_v20 = vpop.eup %6633 }
0x1177   : > { %v5076_v33 = vadd.f32 %v9172_v8, %v5054_v46  ;;  %v5033_v26 = vmul.f32 %v6634_v20, %v9135_v6  ;;  %v5005_v40 = vadd.f32 1e-12, %v4989_v48 }
0x1179   : > { %5092 = vst [vmem:[%s6895_s11 + $0x50] sm:$0xff] %v5076_v33  ;;  %v5055_v10 = vmul.f32 %v9164_v28, %v5033_v26  ;;  %6641 = vrsqrt.f32 %v5005_v40 }
0x117a   : > { %v6636_v25 = vpop.eup %6635 }
0x117b   : > { %v5077_v37 = vadd.f32 %v9172_v8, %v5055_v10  ;;  %v5034_v59 = vmul.f32 %v6636_v25, %v9140_v4 }
0x117d   : > { %5093 = vst [vmem:[%s6895_s11 + $0x58] sm:$0xff] %v5077_v37  ;;  %v5056_v47 = vmul.f32 %v9164_v28, %v5034_v59 }
0x117e   : > { %v6638_v24 = vpop.eup %6637 }
0x117f   : > { %v5078_v16 = vadd.f32 %v9172_v8, %v5056_v47  ;;  %v5035_v6 = vmul.f32 %v6638_v24, %v9145_v29 }
0x1181   : > { %5094 = vst [vmem:[%s6895_s11 + $0x60] sm:$0xff] %v5078_v16  ;;  %v5057_v22 = vmul.f32 %v9164_v28, %v5035_v6 }
0x1182   : > { %v6640_v56 = vpop.eup %6639 }
0x1183   : > { %v5079_v5 = vadd.f32 %v9172_v8, %v5057_v22  ;;  %v5036_v35 = vmul.f32 %v6640_v56, %v9150_v53 }
0x1185   : > { %5095 = vst [vmem:[%s6895_s11 + $0x68] sm:$0xff] %v5079_v5  ;;  %v5058_v4 = vmul.f32 %v9164_v28, %v5036_v35 }
0x1186   : > { %v6642_v43 = vpop.eup %6641 }
0x1187   : > { %v5080_v13 = vadd.f32 %v9172_v8, %v5058_v4  ;;  %v5037_v21 = vmul.f32 %v6642_v43, %v9155_v0 }
0x1189   : > { %5096 = vst [vmem:[%s6895_s11 + $0x70] sm:$0xff] %v5080_v13  ;;  %v5059_v17 = vmul.f32 %v9164_v28, %v5037_v21 }
0x118b   : > { %v5081_v29 = vadd.f32 %v9172_v8, %v5059_v17 }
0x118d   : > { %5097 = vst [vmem:[%s6895_s11 + $0x78] sm:$0xff] %v5081_v29 }
0x118e PF: > { %s9333_s9 = sld [smem:[#allocation6_spill]] }
0x118f   : > { %s9334_s21 = sld [smem:[#allocation4_spill]] }
0x1190   : > { %s9335_s22 = sld [smem:[#allocation5_spill]] }
0x1191   : > { %s9336_s23 = sld [smem:[#allocation7_spill]] }
0x1192   : > { %s9337_s24 = sld [smem:[#allocation8_spill]] }
0x1194   : > { %s26_s25 = sadd.s32 1, %s9333_s9  }
0x1195   : > { %p23_p8 = scmp.ge.s32.totalorder %s26_s25, 6  }
0x1197   :  { %25 = sbr.rel (!%p23_p8) target bundleno = 13 (0xd), region = 155 }

</bundles_post_ra>
